<compile_context>
chip_gen: v7x
topology: tpu7x:2x2x1
jax: 0.10.0
libtpu: 0.0.40
codegen_flags: <defaults>
</compile_context>

<pallas_src>
import functools
import math

import jax
import jax.numpy as jnp
from jax import lax
from jax.experimental import pallas as pl
from jax.experimental.pallas import tpu as pltpu


def _arcface_kernel(hit_ref, x_ref, w_ref, lab_ref, out_ref, wn_ref, *,
                    s, cos_m_s, sin_m_s, th, mm_s, tile_c, n_bt):
    j = pl.program_id(0)  # class-tile index (outer, parallel)
    i = pl.program_id(1)  # batch-tile index (inner, arbitrary)

    # Normalize (in f32) + transpose the bf16 weight tile once per class tile.
    # NOTE: correctness of this re-init relies on the batch axis being the INNER
    # grid axis (i restarts at 0 for every class tile). Do not reorder the grid.
    @pl.when(i == 0)
    def _():
        w = w_ref[...].astype(jnp.float32)                               # (TC, D_p)
        inv_wn = lax.rsqrt(
            jnp.maximum(jnp.sum(w * w, axis=-1, keepdims=True), 1e-24))
        wn_ref[...] = jnp.transpose(w * inv_wn).astype(jnp.bfloat16)     # (D_p, TC)

    # cosine = x_n @ w_n  (MXU, bf16 operands, f32 accumulate).
    # x is already normalized (and bf16) from the wrapper.
    cosine = lax.dot_general(
        x_ref[...], wn_ref[...],
        dimension_numbers=(((1,), (0,)), ((), ())),
        preferred_element_type=jnp.float32)                              # (TB, TC)
    cos_s = cosine * s

    hit = hit_ref[j * n_bt + i]

    # Cold path: no label of this batch tile falls into this class tile.
    @pl.when(hit == 0)
    def _():
        out_ref[...] = cos_s

    # Hot path: ArcFace angular margin (easy_margin=False), s folded into the
    # constants. Clamp 1 - cos^2 before sqrt as a NaN guard for |cos| > 1 due to
    # bf16 rounding.
    @pl.when(hit != 0)
    def _():
        sine = jnp.sqrt(jnp.clip(1.0 - cosine * cosine, 0.0, 1.0))
        phi_s = jnp.where(cosine > th,
                          cosine * cos_m_s - sine * sin_m_s,
                          cos_s - mm_s)
        lab_local = lab_ref[...] - j * tile_c                            # (TB, 1)
        cls = lax.broadcasted_iota(jnp.int32, cosine.shape, 1)
        out_ref[...] = jnp.where(cls == lab_local, phi_s, cos_s)


def _round_up(n, k):
    return ((n + k - 1) // k) * k


def arcface_forward(inputs, weight, labels=None, *, s=32.0, m=0.5):
    """ArcFace forward (num_centers=1). labels=None -> eval path (cosine * s).

    Returns (logits, None) matching the PyTorch module.
    """
    # TODO(synk): num_centers > 1 (softmax-weighted multi-center pooling) is not
    # implemented; only the num_centers=1 path of the reference module is covered.
    B, D = inputs.shape
    C, D2 = weight.shape
    assert D == D2

    cos_m = math.cos(m)
    sin_m = math.sin(m)
    th = math.cos(math.pi - m)
    mm = math.sin(math.pi - m) * m

    # --- Tile sizing ---------------------------------------------------------
    D_p = _round_up(D, 128)

    if B >= 256:
        TB = 256            # fills the 256-wide MXU M dim on v6e/v7x
    elif B >= 128:
        TB = 128
    else:
        TB = _round_up(B, 8)
    B_p = _round_up(B, TB)

    # Pick TC first, then pad C up to a multiple of TC (never shrink TC to a
    # divisor of C). Smaller TC only when D is large, to keep VMEM in budget on
    # 64 MiB (v7x) parts.
    if D_p <= 2048:
        TC = 1024
    elif D_p <= 4096:
        TC = 512
    else:
        TC = 256
    TC = min(TC, _round_up(C, 128))
    C_p = _round_up(C, TC)

    n_ct = C_p // TC
    n_bt = B_p // TB

    # --- Host-side prep ------------------------------------------------------
    # Pre-normalize x once (f32), cast to bf16 (zero padding is harmless).
    x32 = inputs.astype(jnp.float32)
    inv_xn = lax.rsqrt(
        jnp.maximum(jnp.sum(x32 * x32, axis=-1, keepdims=True), 1e-24))
    x_n = (x32 * inv_xn).astype(jnp.bfloat16)
    if (B_p, D_p) != (B, D):
        x_n = jnp.pad(x_n, ((0, B_p - B), (0, D_p - D)))

    # Weight streamed as bf16; in-kernel normalization runs in f32.
    w_p = weight.astype(jnp.bfloat16)
    if (C_p, D_p) != (C, D):
        w_p = jnp.pad(w_p, ((0, C_p - C), (0, D_p - D)))

    if labels is None:
        lab = jnp.full((B_p,), -1, dtype=jnp.int32)
    else:
        lab = labels.reshape(-1).astype(jnp.int32)
        if B_p != B:
            lab = jnp.pad(lab, (0, B_p - B), constant_values=-1)
    lab_2d = lab.reshape(B_p, 1)

    # Hit-mask: does class tile j contain any label of batch tile i?  Prefetched
    # into SMEM so the margin epilogue can be skipped on miss tiles.
    lab_tile = jnp.where(lab >= 0, lab // TC, -1).reshape(n_bt, TB)
    hits = (lab_tile[None, :, :] ==
            jnp.arange(n_ct, dtype=jnp.int32)[:, None, None]).any(axis=2)
    hit_mask = hits.astype(jnp.int32).reshape(n_ct * n_bt)

    # --- VMEM budget (double-buffered bf16 weight + bf16 wn scratch + x + out)
    vmem_bytes = (2 * TC * D_p * 2          # weight double buffer (bf16)
                  + TC * D_p * 2            # normalized-weight scratch (bf16)
                  + 2 * TB * D_p * 2        # x double buffer (bf16)
                  + 2 * TB * TC * 4         # output double buffer (f32)
                  + 2 * TB * 128 * 4)       # labels (lane-padded)
    vmem_limit = int(min(max(2 * vmem_bytes, 32 * 1024 * 1024),
                         48 * 1024 * 1024))

    kernel = functools.partial(
        _arcface_kernel,
        s=s, cos_m_s=cos_m * s, sin_m_s=sin_m * s, th=th, mm_s=mm * s,
        tile_c=TC, n_bt=n_bt)

    out = pl.pallas_call(
        kernel,
        out_shape=jax.ShapeDtypeStruct((B_p, C_p), jnp.float32),
        grid_spec=pltpu.PrefetchScalarGridSpec(
            num_scalar_prefetch=1,
            grid=(n_ct, n_bt),
            in_specs=[
                pl.BlockSpec((TB, D_p), lambda j, i, hm: (i, 0)),   # x_n (bf16)
                pl.BlockSpec((TC, D_p), lambda j, i, hm: (j, 0)),   # weight (bf16, const in i)
                pl.BlockSpec((TB, 1), lambda j, i, hm: (i, 0)),     # labels
            ],
            out_specs=pl.BlockSpec((TB, TC), lambda j, i, hm: (i, j)),
            scratch_shapes=[pltpu.VMEM((D_p, TC), jnp.bfloat16)],
        ),
        compiler_params=pltpu.CompilerParams(
            dimension_semantics=("parallel", "arbitrary"),
            vmem_limit_bytes=vmem_limit,
        ),
    )(hit_mask, x_n, w_p, lab_2d)

    if (B_p, C_p) != (B, C):
        out = out[:B, :C]
    return out, None


def _arcface_reference(inputs, weight, labels, *, s, m):
    """Pure-JAX f32 reference matching the PyTorch module (training mode)."""
    x = inputs / jnp.maximum(
        jnp.linalg.norm(inputs, axis=1, keepdims=True), 1e-12)
    w = weight / jnp.maximum(
        jnp.linalg.norm(weight, axis=1, keepdims=True), 1e-12)
    cosine = x @ w.T
    sine = jnp.sqrt(jnp.clip(1.0 - cosine * cosine, 0.0, 1.0))
    cos_m = math.cos(m)
    sin_m = math.sin(m)
    th = math.cos(math.pi - m)
    mm = math.sin(math.pi - m) * m
    phi = jnp.where(cosine - th > 0, cosine * cos_m - sine * sin_m, cosine - mm)
    one_hot = jax.nn.one_hot(labels, weight.shape[0], dtype=cosine.dtype)
    return (one_hot * phi + (1.0 - one_hot) * cosine) * s


def _xavier_uniform(key, shape):
    # nn.init.xavier_uniform_ for a 2-D (fan_out, fan_in) tensor
    fan_out, fan_in = shape
    bound = math.sqrt(6.0 / (fan_in + fan_out))
    return jax.random.uniform(key, shape, minval=-bound, maxval=bound,
                              dtype=jnp.float32)


if __name__ == "__main__":
    in_channels = 64
    out_channels = 2048   # two class tiles at TC=1024 -> exercises the hit-mask skip
    batch = 8

    key = jax.random.PRNGKey(0)
    k_x, k_w, k_l = jax.random.split(key, 3)

    x = jax.random.normal(k_x, (batch, in_channels), dtype=jnp.float32)
    weight = _xavier_uniform(k_w, (out_channels, in_channels))
    labels = jax.random.randint(k_l, (batch,), 0, out_channels, dtype=jnp.int32)

    logits, _ = arcface_forward(x, weight, labels, s=32.0, m=0.5)
    logits = jax.block_until_ready(logits)

    ref = _arcface_reference(x, weight, labels, s=32.0, m=0.5)

    assert logits.shape == (batch, out_channels)
    assert logits.dtype == jnp.float32
    assert bool(jnp.all(jnp.isfinite(logits)))
    max_err = float(jnp.max(jnp.abs(logits - ref)))
    # Tolerance accounts for bf16 MXU operands amplified by s=32.
    assert max_err < 0.5, f"max abs error vs reference too large: {max_err}"
    print("KERNEL_OK")
</pallas_src>

<mosaic_0001>
module attributes {stable_mosaic.version = 11 : i64} {
  func.func @_arcface_kernel(%arg0: i32, %arg1: i32, %arg2: memref<2xi32, #tpu.memory_space<smem>>, %arg3: memref<8x128xbf16, #tpu.memory_space<vmem>>, %arg4: memref<1024x128xbf16, #tpu.memory_space<vmem>>, %arg5: memref<8x1xi32, #tpu.memory_space<vmem>>, %arg6: memref<8x1024xf32, #tpu.memory_space<vmem>>, %arg7: memref<128x1024xbf16, #tpu.memory_space<vmem>>) attributes {dimension_semantics = [#tpu.dimension_semantics<parallel>, #tpu.dimension_semantics<arbitrary>], iteration_bounds = array<i64: 2, 1>, scalar_prefetch = 1 : i64, scratch_operands = 1 : i64, tpu.core_type = #tpu.core_type<tc>, window_params = [{transform_indices = @transform_0, window_bounds = array<i64: 8, 128>}, {transform_indices = @transform_1, window_bounds = array<i64: 1024, 128>}, {transform_indices = @transform_2, window_bounds = array<i64: 8, 1>}, {transform_indices = @transform_3, window_bounds = array<i64: 8, 1024>}]} {
    %c0_i32 = arith.constant 0 : i32
    %0 = arith.cmpi eq, %arg1, %c0_i32 : i32
    %1 = arith.extui %0 : i1 to i32
    %c0_i32_0 = arith.constant 0 : i32
    %2 = arith.cmpi ne, %1, %c0_i32_0 : i32
    scf.if %2 {
      %c0_9 = arith.constant 0 : index
      %c0_10 = arith.constant 0 : index
      %18 = vector.load %arg4[%c0_9, %c0_10] : memref<1024x128xbf16, #tpu.memory_space<vmem>>, vector<1024x128xbf16>
      %19 = arith.extf %18 : vector<1024x128xbf16> to vector<1024x128xf32>
      %20 = arith.mulf %19, %19 : vector<1024x128xf32>
      %cst_11 = arith.constant dense<0.000000e+00> : vector<1024xf32>
      %21 = vector.multi_reduction <add>, %20, %cst_11 [1] : vector<1024x128xf32> to vector<1024xf32>
      %22 = vector.shape_cast %21 : vector<1024xf32> to vector<1024x1xf32>
      %cst_12 = arith.constant 1.000000e-24 : f32
      %23 = vector.broadcast %cst_12 : f32 to vector<1024x1xf32>
      %24 = arith.maximumf %22, %23 : vector<1024x1xf32>
      %25 = math.rsqrt %24 : vector<1024x1xf32>
      %26 = vector.broadcast %25 : vector<1024x1xf32> to vector<1024x128xf32>
      %27 = arith.mulf %19, %26 : vector<1024x128xf32>
      %28 = tpu.transpose %27, [1, 0] : vector<1024x128xf32> -> vector<128x1024xf32>
      %29 = arith.truncf %28 : vector<128x1024xf32> to vector<128x1024xbf16>
      %c0_13 = arith.constant 0 : index
      %c0_14 = arith.constant 0 : index
      %30 = vector.load %arg7[%c0_13, %c0_14] : memref<128x1024xbf16, #tpu.memory_space<vmem>>, vector<128x1024xbf16>
      tpu.vector_store %arg7[%c0_13, %c0_14], %29 {strides = array<i32>} : memref<128x1024xbf16, #tpu.memory_space<vmem>>, vector<128x1024xbf16>,
    } else {
    }
    %c0 = arith.constant 0 : index
    %c0_1 = arith.constant 0 : index
    %3 = vector.load %arg3[%c0, %c0_1] : memref<8x128xbf16, #tpu.memory_space<vmem>>, vector<8x128xbf16>
    %c0_2 = arith.constant 0 : index
    %c0_3 = arith.constant 0 : index
    %4 = vector.load %arg7[%c0_2, %c0_3] : memref<128x1024xbf16, #tpu.memory_space<vmem>>, vector<128x1024xbf16>
    %cst = arith.constant dense<0.000000e+00> : vector<8x1024xf32>
    %5 = tpu.matmul %3, %4, %cst {dimension_numbers = #tpu.dot_dimension_numbers<[1], [0], [0], [1], [0, 0, 1, 1], [], []>} : vector<8x128xbf16>, vector<128x1024xbf16>, vector<8x1024xf32> -> vector<8x1024xf32>
    %cst_4 = arith.constant 3.200000e+01 : f32
    %6 = vector.broadcast %cst_4 : f32 to vector<8x1024xf32>
    %7 = arith.mulf %5, %6 : vector<8x1024xf32>
    %c1_i32 = arith.constant 1 : i32
    %8 = arith.muli %arg0, %c1_i32 : i32
    %9 = arith.addi %8, %arg1 : i32
    %10 = arith.index_cast %9 : i32 to index
    %11 = memref.load %arg2[%10] : memref<2xi32, #tpu.memory_space<smem>>
    %c0_i32_5 = arith.constant 0 : i32
    %12 = arith.cmpi eq, %11, %c0_i32_5 : i32
    %13 = arith.extui %12 : i1 to i32
    %c0_i32_6 = arith.constant 0 : i32
    %14 = arith.cmpi ne, %13, %c0_i32_6 : i32
    scf.if %14 {
      %c0_9 = arith.constant 0 : index
      %c0_10 = arith.constant 0 : index
      %18 = vector.load %arg6[%c0_9, %c0_10] : memref<8x1024xf32, #tpu.memory_space<vmem>>, vector<8x1024xf32>
      tpu.vector_store %arg6[%c0_9, %c0_10], %7 {strides = array<i32>} : memref<8x1024xf32, #tpu.memory_space<vmem>>, vector<8x1024xf32>,
    } else {
    }
    %c0_i32_7 = arith.constant 0 : i32
    %15 = arith.cmpi ne, %11, %c0_i32_7 : i32
    %16 = arith.extui %15 : i1 to i32
    %c0_i32_8 = arith.constant 0 : i32
    %17 = arith.cmpi ne, %16, %c0_i32_8 : i32
    scf.if %17 {
      %18 = arith.mulf %5, %5 : vector<8x1024xf32>
      %cst_9 = arith.constant 1.000000e+00 : f32
      %19 = vector.broadcast %cst_9 : f32 to vector<8x1024xf32>
      %20 = arith.subf %19, %18 : vector<8x1024xf32>
      %cst_10 = arith.constant 0.000000e+00 : f32
      %cst_11 = arith.constant 1.000000e+00 : f32
      %21 = vector.broadcast %cst_10 : f32 to vector<8x1024xf32>
      %22 = arith.maximumf %21, %20 : vector<8x1024xf32>
      %23 = vector.broadcast %cst_11 : f32 to vector<8x1024xf32>
      %24 = arith.minimumf %23, %22 : vector<8x1024xf32>
      %25 = math.sqrt %24 : vector<8x1024xf32>
      %cst_12 = arith.constant -0.87758255 : f32
      %26 = vector.broadcast %cst_12 : f32 to vector<8x1024xf32>
      %27 = arith.cmpf ogt, %5, %26 : vector<8x1024xf32>
      %cst_13 = arith.constant 28.0826416 : f32
      %28 = vector.broadcast %cst_13 : f32 to vector<8x1024xf32>
      %29 = arith.mulf %5, %28 : vector<8x1024xf32>
      %cst_14 = arith.constant 15.3416176 : f32
      %30 = vector.broadcast %cst_14 : f32 to vector<8x1024xf32>
      %31 = arith.mulf %25, %30 : vector<8x1024xf32>
      %32 = arith.subf %29, %31 : vector<8x1024xf32>
      %cst_15 = arith.constant 7.67080879 : f32
      %33 = vector.broadcast %cst_15 : f32 to vector<8x1024xf32>
      %34 = arith.subf %7, %33 : vector<8x1024xf32>
      %35 = arith.select %27, %32, %34 : vector<8x1024xi1>, vector<8x1024xf32>
      %c0_16 = arith.constant 0 : index
      %c0_17 = arith.constant 0 : index
      %36 = vector.load %arg5[%c0_16, %c0_17] : memref<8x1xi32, #tpu.memory_space<vmem>>, vector<8x1xi32>
      %c1024_i32 = arith.constant 1024 : i32
      %37 = arith.muli %arg0, %c1024_i32 : i32
      %38 = vector.broadcast %37 : i32 to vector<8x1xi32>
      %39 = arith.subi %36, %38 : vector<8x1xi32>
      %40 = tpu.iota {dimensions = array<i32: 1>} : vector<8x1024xi32>
      %41 = vector.broadcast %39 : vector<8x1xi32> to vector<8x1024xi32>
      %42 = arith.cmpi eq, %40, %41 : vector<8x1024xi32>
      %43 = arith.select %42, %35, %7 : vector<8x1024xi1>, vector<8x1024xf32>
      %c0_18 = arith.constant 0 : index
      %c0_19 = arith.constant 0 : index
      %44 = vector.load %arg6[%c0_18, %c0_19] : memref<8x1024xf32, #tpu.memory_space<vmem>>, vector<8x1024xf32>
      tpu.vector_store %arg6[%c0_18, %c0_19], %43 {strides = array<i32>} : memref<8x1024xf32, #tpu.memory_space<vmem>>, vector<8x1024xf32>,
    } else {
    }
    return
  }
  func.func @transform_0(%arg0: i32, %arg1: i32, %arg2: memref<2xi32, #tpu.memory_space<smem>>) -> (i32, i32) {
    %c0_i32 = arith.constant 0 : i32
    %c0_i32_0 = arith.constant 0 : i32
    return %arg1, %c0_i32 : i32, i32
  }
  func.func @transform_1(%arg0: i32, %arg1: i32, %arg2: memref<2xi32, #tpu.memory_space<smem>>) -> (i32, i32) {
    %c0_i32 = arith.constant 0 : i32
    %c0_i32_0 = arith.constant 0 : i32
    return %arg0, %c0_i32 : i32, i32
  }
  func.func @transform_2(%arg0: i32, %arg1: i32, %arg2: memref<2xi32, #tpu.memory_space<smem>>) -> (i32, i32) {
    %c0_i32 = arith.constant 0 : i32
    %c0_i32_0 = arith.constant 0 : i32
    return %arg1, %c0_i32 : i32, i32
  }
  func.func @transform_3(%arg0: i32, %arg1: i32, %arg2: memref<2xi32, #tpu.memory_space<smem>>) -> (i32, i32) {
    %c0_i32 = arith.constant 0 : i32
    return %arg1, %arg0 : i32, i32
  }
}

</mosaic_0001>

<bundles_post_ra>
// kernel: tpu_custom_call.1
= control target key start
LH: loop header
LB: loop body
LE: loop exit
PB: predicated region body
PF: predicated region fallthrough
CT: control target
= control target key end

     0   :  { %s5144_s0 = inlined_call_operand.vmem [shape: s32[2], index: 0, kind: input, shape index: {}]   ;;  %s5145_s1 = inlined_call_operand.vmem [shape: bf16[8,128], index: 1, kind: input, shape index: {}]   ;;  %s5146_s2 = inlined_call_operand.hbm [shape: bf16[2048,128], index: 2, kind: input, shape index: {}]   ;;  %s5147_s3 = inlined_call_operand.vmem [shape: s32[8,1], index: 3, kind: input, shape index: {}]   ;;  %s5148_s4 = inlined_call_operand.hbm [shape: f32[8,2048], index: 4, kind: output, shape index: {}]  }
   0x1   :  { %s9_s17 = sshll.u32 %s5144_s0, 4  ;;  %s10_s17 = int_to_ptr.vmem [resolvable:$true] %s9_s17 }
   0x2   :  { %s3355_s18 = scalar_lea.vmem %s10_s17, 16  ;;  %p3360_p1 = scmp.lt.s32.totalorder %s10_s17, %s10_s17 }
   0x3   :  { %p3356_p0 = scmp.ne.s32.totalorder %s10_s17, %s3355_s18  ;;  %p3361_p2 = scmp.lt.s32.totalorder %s3355_s18, %s3355_s18 }
   0x5   :  { %p3362_p3 = por %p3361_p2, %p3360_p1 }
   0x7   :  { %p3363_p4 = pnand %p3362_p3, %p3356_p0 }
   0x9   :  { %3366 = shalt.err (!%p3363_p4)  }
   0xa   :  { %s3483_s19 = smov [#allocation4]  }
   0xb   :  { %12 = dma.vmem_to_smem %s10_s17, 16, %s3483_s19, [#allocation3] }
   0xc   :  { %3449 = dma.done.wait [#allocation3], 16 }
   0xd   :  { %3450 = vsyncadd [#allocation3], 4294967280 }
   0xe   :  { %14 = sfence }
   0xf   :  { %15 = vsyncpa [#allocation6], 0 }
  0x10   :  { %17 = vsyncpa [#allocation6 + $0x1], 0 }
  0x11   :  { %18 = vsyncpa [#allocation7], 0 }
  0x12   :  { %20 = vsyncpa [#allocation7 + $0x1], 0  ;;  %s3518_s20 = smov 0   ;;  %s3520_s0 = smov 0  }
  0x13   :  { %s3522_s21 = smov 0   ;;  %s3524_s22 = smov 0  }
  0x14   :  { %s3526_s23 = smov 0   ;;  %s3528_s24 = smov 0  }
  0x15 LB: > { %s2218_s25 = sadd.s32 4294967295, %s3481_s24   ;;  %s2219_s26 = sadd.s32 4294967294, %s3481_s24   ;;  %s3481_s24 = sphi %s3528_s24, %s26_s24   ;;  %s3477_s23 = sphi %s3526_s23, %s5542_s23   ;;  %s3473_s22 = sphi %s3524_s22, %s5541_s22   ;;  %s3469_s21 = sphi %s3522_s21, %s5540_s21   ;;  %s3465_s0 = sphi %s3520_s0, %s5539_s0   ;;  %s3461_s20 = sphi %s3518_s20, %s5538_s20  }
  0x16   : > { %s38_s27 = sadd.s32 1, %s3477_s23  ;;  %s71_s28 = sadd.s32 1, %s3469_s21 }
  0x17   : > { %p40_p5 = scmp.ge.s32.totalorder %s38_s27, 2  ;;  %p78_p6 = scmp.ne.s32.totalorder %s3469_s21, %s3465_s0 }
  0x18   : > { %p79_p7 = scmp.eq.s32.totalorder %s3481_s24, 0  ;;  %p84_p8 = scmp.ne.s32.totalorder %s3465_s0, %s3461_s20 }
  0x19   : > { %s5544_s27 = smov (%p40_p5, %s38_s27), 0  ;;  %p85_p10 = scmp.eq.s32.totalorder %s2218_s25, 0 }
  0x1a   : > { %p3559_p9 = por %p79_p7, %p78_p6  ;;  %s68_s30 = ssub.s32 %s3477_s23, %s5544_s27 }
  0x1b   : > { %p136_p11 = scmp.eq.s32.totalorder %s2218_s25, 1  ;;  %p69_p12 = scmp.eq.s32.totalorder %s68_s30, 0 }
  0x1c   : > { %p3565_p13 = por %p85_p10, %p84_p8  ;;  %p142_p1 = scmp.eq.s32.totalorder %s2219_s26, 1 }
  0x1d   : > { %p3569_p0 = por %p136_p11, %p78_p6  ;;  %p2579_p4 = scmp.lt.s32.totalorder %s3481_s24, 2 }
  0x1e   : > { %s3574_s7 = scalar_select %p69_p12, %s3469_s21, %s71_s28  }
  0x1f   : > { %s5259_s6 = scalar_select %p3569_p0, 1, 0 }
  0x20   : > { %p3576_p2 = por %p142_p1, %p84_p8  ;;  %s176_s9 = sand.u32 1, %s3469_s21  }
  0x21   : > { %s2224_s10 = sshll.u32 %s176_s9, 9  ;;  %s2246_s11 = sshll.u32 %s3477_s23, 13 }
  0x22   : > { %s5260_s8 = scalar_select %p3576_p2, 1, 0 }
  0x23   : > { %s3587_s14 = scalar_lea.hbm %s5146_s2, %s2246_s11  ;;  %s180_s15 = scalar_lea.vmem [#allocation5], %s2224_s10 }
  0x24   : > { %s187_s16 = sshll.u32 %s180_s15, 4  ;;  %p3593_p5 = pnand %p2579_p4, %p3559_p9  ;;  %s3589_s16 = int_to_ptr.vmem [resolvable:$true] %s187_s16 }
  0x25   : > { %s3598_s18 = scalar_lea.sflag [#allocation6], %s176_s9  ;;  %s3367_s19 = scalar_lea.hbm %s3587_s14, 8192 }
  0x26   : > { %p3368_p7 = scmp.ne.s32.totalorder %s3587_s14, %s3367_s19  ;;  %p3369_p8 = pneg %p3593_p5 }
  0x27   : > { %s3372_s28 = scalar_lea.hbm %s5146_s2, 16384  ;;  %p3373_p9 = scmp.lt.u32.totalorder %s3587_s14, %s5146_s2 }
  0x28   : > { %p3370_p10 = pnand %p3369_p8, %p3368_p7  ;;  %p3374_p12 = scmp.lt.u32.totalorder %s3372_s28, %s3367_s19 }
  0x29   : > { %p3376_p4 = scmp.lt.u32.totalorder %s3367_s19, %s3587_s14 }
  0x2a   : > { %p3371_p11 = pneg %p3370_p10  ;;  %p3375_p1 = por %p3374_p12, %p3373_p9 }
  0x2c   : > { %p3377_p3 = por %p3376_p4, %p3375_p1 }
  0x2e   : > { %p3378_p6 = pnand %p3377_p3, %p3371_p11 }
  0x30   : > { %3381 = shalt.err (!%p3378_p6)
}
  0x31   : > { %s3382_s9 = scalar_lea.vmem %s3589_s16, 8192  ;;  %s3484_s10 = smov [#allocation5]  }
  0x32   : > { %p3383_p7 = scmp.ne.s32.totalorder %s3589_s16, %s3382_s9  ;;  %s3387_s11 = sshll.u32 %s3484_s10, 4  ;;  %s3388_s11 = int_to_ptr.vmem [resolvable:$false] %s3387_s11 }
  0x33   : > { %s3389_s12 = scalar_lea.vmem %s3388_s11, 16384  ;;  %p3390_p0 = scmp.lt.s32.totalorder %s3589_s16, %s3388_s11 }
  0x34   : > { %p3385_p10 = pnand %p3383_p7, %p3369_p8  ;;  %p3391_p9 = scmp.lt.s32.totalorder %s3389_s12, %s3382_s9 }
  0x36   : > { %p3386_p2 = pneg %p3385_p10  ;;  %p3392_p12 = por %p3391_p9, %p3390_p0 }
  0x38   : > { %p3393_p1 = pnand %p3392_p12, %p3386_p2 }
  0x3a   : > { %3396 = shalt.err (!%p3393_p1)
}
  0x3b   : > { %s3485_s13 = smov 64   ;;  %s3486_s15 = smov 4  }
  0x3c   : > { %2574 = dma.hbm_to_vmem [thread:$0]  (!%p3593_p5), %s3587_s14, 8192, %s3589_s16, %s3598_s18, %s3485_s13, %s3485_s13, %s3486_s15  }
  0x3d   : > { %p195_p3 = scmp.lt.s32.totalorder %s3481_s24, 3  ;;  %p5262_p6 = scmp.ge.s32.totalorder %s3481_s24, 1 }
  0x3f   : > { %p196_p8 = pnand %p5262_p6, %p195_p3 }
  0x41   : > { %199 = sbr.rel (%p196_p8) target bundleno = 1026 (0x402), region = 32 }
  0x48   : > { %s3630_s19 = sand.u32 1, %s3465_s0  }
  0x49   : > { %s2228_s25 = sshll.u32 %s3630_s19, 9  ;;  %s202_s26 = scalar_lea.sflag [#allocation6], %s3630_s19 }
  0x4a   : > { %s3634_s28 = scalar_lea.vmem [#allocation5], %s2228_s25 }
  0x4b   : > { %3452 = dma.done.wait (%p3565_p13), %s202_s26, 8192  }
  0x4c   : > { %3454 = vsyncadd (%p3565_p13), %s202_s26, 4294959104  ;;  %s3641_s14 = sld [smem:[#allocation4 + %s3473_s22]]  ;;  %v2504_v0 = vld [vmem:[%s3634_s28 + $0x8] sm:$0xff]   ;;  %v2249_v1 = vld [vmem:[%s3634_s28] sm:$0xff]   ;;  %s2229_s5 = sshll.u32 %s3630_s19, 6 }
  0x4d   : > { %v3645_v2 = vunpack.c.l.bf16 %v2504_v0  ;;  %v3647_v3 = vunpack.c.l.bf16 %v2249_v1  ;;  %v3649_v4 = vunpack.c.h.bf16 %v2504_v0  ;;  %v3651_v5 = vunpack.c.h.bf16 %v2249_v1  ;;  %v2505_v6 = vld [vmem:[%s3634_s28 + $0x10] sm:$0xff]   ;;  %v2506_v13 = vld [vmem:[%s3634_s28 + $0x18] sm:$0xff]   ;;  %v2507_v18 = vld [vmem:[%s3634_s28 + $0x20] sm:$0xff]   ;;  %s4897_s18 = scalar_lea.vmem [#allocation8], %s2229_s5 }
  0x4e   : > { %v3662_v11 = vunpack.c.h.bf16 %v2505_v6  ;;  %v3664_v12 = vunpack.c.l.bf16 %v2505_v6  ;;  %v3671_v16 = vunpack.c.h.bf16 %v2506_v13  ;;  %v3673_v17 = vunpack.c.l.bf16 %v2506_v13  ;;  %v2508_v23 = vld [vmem:[%s3634_s28 + $0x28] sm:$0xff]   ;;  %v2509_v28 = vld [vmem:[%s3634_s28 + $0x30] sm:$0xff]   ;;  %v2510_v33 = vld [vmem:[%s3634_s28 + $0x38] sm:$0xff]  }
  0x4f   : > { %v509_v7 = vmul.f32 %v3645_v2, %v3645_v2  ;;  %v507_v8 = vmul.f32 %v3647_v3, %v3647_v3  ;;  %v510_v9 = vmul.f32 %v3649_v4, %v3649_v4  ;;  %v508_v10 = vmul.f32 %v3651_v5, %v3651_v5  ;;  %v2511_v38 = vld [vmem:[%s3634_s28 + $0x40] sm:$0xff]   ;;  %v2512_v43 = vld [vmem:[%s3634_s28 + $0x48] sm:$0xff]   ;;  %v2513_v48 = vld [vmem:[%s3634_s28 + $0x50] sm:$0xff]  }
  0x50   : > { %v512_v14 = vmul.f32 %v3662_v11, %v3662_v11  ;;  %v511_v15 = vmul.f32 %v3664_v12, %v3664_v12  ;;  %v514_v19 = vmul.f32 %v3671_v16, %v3671_v16  ;;  %v513_v20 = vmul.f32 %v3673_v17, %v3673_v17  ;;  %v2514_v53 = vld [vmem:[%s3634_s28 + $0x58] sm:$0xff]   ;;  %v2515_v58 = vld [vmem:[%s3634_s28 + $0x60] sm:$0xff]   ;;  %v2516_v63 = vld [vmem:[%s3634_s28 + $0x68] sm:$0xff]  }
  0x51   : > { %639 = vadd.xlane.f32.xlu1 %v509_v7  ;;  %635 = vadd.xlane.f32.xlu0 %v507_v8  ;;  %v3680_v21 = vunpack.c.h.bf16 %v2507_v18  ;;  %v3682_v22 = vunpack.c.l.bf16 %v2507_v18  ;;  %v3689_v26 = vunpack.c.h.bf16 %v2508_v23  ;;  %v3691_v27 = vunpack.c.l.bf16 %v2508_v23  ;;  %v2517_v8 = vld [vmem:[%s3634_s28 + $0x70] sm:$0xff]  }
  0x52   : > { %v3698_v31 = vunpack.c.h.bf16 %v2509_v28  ;;  %v3700_v32 = vunpack.c.l.bf16 %v2509_v28  ;;  %v3707_v36 = vunpack.c.h.bf16 %v2510_v33  ;;  %v3709_v37 = vunpack.c.l.bf16 %v2510_v33  ;;  %v2520_v33 = vld [vmem:[%s3634_s28 + $0x88] sm:$0xff]   ;;  %p2230_p13 = scmp.ne.s32.totalorder %s3641_s14, 0 }
  0x53   : > { %v516_v24 = vmul.f32 %v3680_v21, %v3680_v21  ;;  %v515_v25 = vmul.f32 %v3682_v22, %v3682_v22  ;;  %v518_v29 = vmul.f32 %v3689_v26, %v3689_v26  ;;  %v517_v30 = vmul.f32 %v3691_v27, %v3691_v27 }
  0x54   : > { %v520_v34 = vmul.f32 %v3698_v31, %v3698_v31  ;;  %v519_v35 = vmul.f32 %v3700_v32, %v3700_v32  ;;  %5263 = vst [vmem:[#allocation12_spill] sm:$0xff] %v3709_v37  ;;  %v522_v39 = vmul.f32 %v3707_v36, %v3707_v36  ;;  %v521_v40 = vmul.f32 %v3709_v37, %v3709_v37 }
  0x55   : > { %641 = vadd.xlane.f32.xlu1 %v510_v9  ;;  %637 = vadd.xlane.f32.xlu0 %v508_v10  ;;  %v3716_v41 = vunpack.c.h.bf16 %v2511_v38  ;;  %v3718_v42 = vunpack.c.l.bf16 %v2511_v38  ;;  %v3725_v46 = vunpack.c.h.bf16 %v2512_v43  ;;  %v3727_v47 = vunpack.c.l.bf16 %v2512_v43 }
  0x56   : > { %v3734_v51 = vunpack.c.h.bf16 %v2513_v48  ;;  %v3736_v52 = vunpack.c.l.bf16 %v2513_v48  ;;  %v3743_v56 = vunpack.c.h.bf16 %v2514_v53  ;;  %v3745_v57 = vunpack.c.l.bf16 %v2514_v53 }
  0x57   : > { %5264 = vst [vmem:[#allocation13_spill] sm:$0xff] %v3716_v41  ;;  %5265 = vst [vmem:[#allocation14_spill] sm:$0xff] %v3718_v42  ;;  %v524_v44 = vmul.f32 %v3716_v41, %v3716_v41  ;;  %v523_v45 = vmul.f32 %v3718_v42, %v3718_v42  ;;  %v526_v49 = vmul.f32 %v3725_v46, %v3725_v46  ;;  %v3752_v61 = vunpack.c.h.bf16 %v2515_v58 }
  0x58   : > { %5266 = vst [vmem:[#allocation15_spill] sm:$0xff] %v3725_v46  ;;  %5267 = vst [vmem:[#allocation16_spill] sm:$0xff] %v3727_v47  ;;  %v525_v50 = vmul.f32 %v3727_v47, %v3727_v47  ;;  %v528_v54 = vmul.f32 %v3734_v51, %v3734_v51  ;;  %v527_v55 = vmul.f32 %v3736_v52, %v3736_v52  ;;  %v3754_v62 = vunpack.c.l.bf16 %v2515_v58  ;;  %v2523_v58 = vld [vmem:[%s3634_s28 + $0xa0] sm:$0xff]   ;;  %v2562_v46 = vld [vmem:[%s3634_s28 + $0x1d8] sm:$0xff]  }
  0x59   : > { %645 = vadd.xlane.f32.xlu1 %v512_v14  ;;  %643 = vadd.xlane.f32.xlu0 %v511_v15  ;;  %5268 = vst [vmem:[#allocation17_spill] sm:$0xff] %v3734_v51  ;;  %5269 = vst [vmem:[#allocation18_spill] sm:$0xff] %v3736_v52  ;;  %v530_v59 = vmul.f32 %v3743_v56, %v3743_v56  ;;  %v529_v60 = vmul.f32 %v3745_v57, %v3745_v57  ;;  %v3761_v6 = vunpack.c.h.bf16 %v2516_v63  ;;  %v2518_v15 = vld [vmem:[%s3634_s28 + $0x78] sm:$0xff]  }
  0x5a   : > { %5270 = vst [vmem:[#allocation19_spill] sm:$0xff] %v3743_v56  ;;  %5271 = vst [vmem:[#allocation20_spill] sm:$0xff] %v3745_v57  ;;  %v532_v0 = vmul.f32 %v3752_v61, %v3752_v61  ;;  %v531_v1 = vmul.f32 %v3754_v62, %v3754_v62  ;;  %v3763_v7 = vunpack.c.l.bf16 %v2516_v63  ;;  %v3770_v13 = vunpack.c.h.bf16 %v2517_v8  ;;  %v2561_v56 = vld [vmem:[%s3634_s28 + $0x1d0] sm:$0xff]   ;;  %v2554_v47 = vld [vmem:[%s3634_s28 + $0x198] sm:$0xff]  }
  0x5b   : > { %5272 = vst [vmem:[#allocation21_spill] sm:$0xff] %v3752_v61  ;;  %5273 = vst [vmem:[#allocation22_spill] sm:$0xff] %v3754_v62  ;;  %v534_v9 = vmul.f32 %v3761_v6, %v3761_v6  ;;  %v3772_v14 = vunpack.c.l.bf16 %v2517_v8  ;;  %v3781_v23 = vunpack.c.l.bf16 %v2518_v15  ;;  %v3797_v38 = vunpack.c.h.bf16 %v2520_v33  ;;  %v2560_v61 = vld [vmem:[%s3634_s28 + $0x1c8] sm:$0xff]   ;;  %v2553_v57 = vld [vmem:[%s3634_s28 + $0x190] sm:$0xff]  }
  0x5c   : > { %5274 = vst [vmem:[#allocation23_spill] sm:$0xff] %v3761_v6  ;;  %5275 = vst [vmem:[#allocation24_spill] sm:$0xff] %v3763_v7  ;;  %v533_v10 = vmul.f32 %v3763_v7, %v3763_v7  ;;  %v536_v18 = vmul.f32 %v3770_v13, %v3770_v13  ;;  %v3824_v63 = vunpack.c.h.bf16 %v2523_v58  ;;  %v2534_v6 = vld [vmem:[%s3634_s28 + $0xf8] sm:$0xff]   ;;  %v2535_v7 = vld [vmem:[%s3634_s28 + $0x100] sm:$0xff]  }
  0x5d   : > { %649 = vadd.xlane.f32.xlu1 %v514_v19  ;;  %647 = vadd.xlane.f32.xlu0 %v513_v20  ;;  %5276 = vst [vmem:[#allocation25_spill] sm:$0xff] %v3770_v13  ;;  %5277 = vst [vmem:[#allocation26_spill] sm:$0xff] %v3772_v14  ;;  %v535_v19 = vmul.f32 %v3772_v14, %v3772_v14  ;;  %v3779_v20 = vunpack.c.h.bf16 %v2518_v15  ;;  %v537_v28 = vmul.f32 %v3781_v23, %v3781_v23  ;;  %v2533_v13 = vld [vmem:[%s3634_s28 + $0xf0] sm:$0xff]  }
  0x5e   : > { %5279 = vst [vmem:[#allocation28_spill] sm:$0xff] %v3781_v23  ;;  %v542_v43 = vmul.f32 %v3797_v38, %v3797_v38  ;;  %v548_v8 = vmul.f32 %v3824_v63, %v3824_v63  ;;  %v3916_v14 = vunpack.c.l.bf16 %v2533_v13 }
  0x5f   : > { %5278 = vst [vmem:[#allocation27_spill] sm:$0xff] %v3779_v20 }
  0x60   : > { %5294 = vst [vmem:[#allocation43_spill] sm:$0xff] %v3916_v14 }
  0x61   : > { %653 = vadd.xlane.f32.xlu1 %v516_v24  ;;  %651 = vadd.xlane.f32.xlu0 %v515_v25  ;;  %v2519_v24 = vld [vmem:[%s3634_s28 + $0x80] sm:$0xff]   ;;  %v538_v25 = vmul.f32 %v3779_v20, %v3779_v20  ;;  %v2532_v20 = vld [vmem:[%s3634_s28 + $0xe8] sm:$0xff]  }
  0x62   : > { %v3907_v23 = vunpack.c.l.bf16 %v2532_v20 }
  0x64   : > { %5292 = vst [vmem:[#allocation41_spill] sm:$0xff] %v3907_v23 }
  0x65   : > { %657 = vadd.xlane.f32.xlu1 %v518_v29  ;;  %655 = vadd.xlane.f32.xlu0 %v517_v30  ;;  %v3788_v29 = vunpack.c.h.bf16 %v2519_v24  ;;  %v3790_v30 = vunpack.c.l.bf16 %v2519_v24 }
  0x69   : > { %661 = vadd.xlane.f32.xlu1 %v520_v34  ;;  %659 = vadd.xlane.f32.xlu0 %v519_v35  ;;  %v540_v34 = vmul.f32 %v3788_v29, %v3788_v29  ;;  %v539_v35 = vmul.f32 %v3790_v30, %v3790_v30 }
  0x6d   : > { %665 = vadd.xlane.f32.xlu1 %v522_v39  ;;  %663 = vadd.xlane.f32.xlu0 %v521_v40  ;;  %v3799_v39 = vunpack.c.l.bf16 %v2520_v33  ;;  %v2521_v40 = vld [vmem:[%s3634_s28 + $0x90] sm:$0xff]   ;;  %v2526_v33 = vld [vmem:[%s3634_s28 + $0xb8] sm:$0xff]  }
  0x6e   : > { %v3808_v48 = vunpack.c.l.bf16 %v2521_v40 }
  0x70   : > { %v543_v53 = vmul.f32 %v3808_v48, %v3808_v48 }
  0x71   : > { %669 = vadd.xlane.f32.xlu1 %v524_v44  ;;  %667 = vadd.xlane.f32.xlu0 %v523_v45  ;;  %v541_v44 = vmul.f32 %v3799_v39, %v3799_v39  ;;  %v3806_v45 = vunpack.c.h.bf16 %v2521_v40  ;;  %v3851_v40 = vunpack.c.h.bf16 %v2526_v33 }
  0x75   : > { %673 = vadd.xlane.f32.xlu1 %v526_v49  ;;  %671 = vadd.xlane.f32.xlu0 %v525_v50  ;;  %v2522_v49 = vld [vmem:[%s3634_s28 + $0x98] sm:$0xff]   ;;  %v544_v50 = vmul.f32 %v3806_v45, %v3806_v45 }
  0x79   : > { %677 = vadd.xlane.f32.xlu1 %v528_v54  ;;  %675 = vadd.xlane.f32.xlu0 %v527_v55  ;;  %v3815_v54 = vunpack.c.h.bf16 %v2522_v49  ;;  %v3817_v55 = vunpack.c.l.bf16 %v2522_v49  ;;  %v554_v49 = vmul.f32 %v3851_v40, %v3851_v40 }
  0x7d   : > { %681 = vadd.xlane.f32.xlu1 %v530_v59  ;;  %679 = vadd.xlane.f32.xlu0 %v529_v60  ;;  %v546_v59 = vmul.f32 %v3815_v54, %v3815_v54  ;;  %v545_v60 = vmul.f32 %v3817_v55, %v3817_v55 }
  0x81   : > { %685 = vadd.xlane.f32.xlu1 %v532_v0  ;;  %683 = vadd.xlane.f32.xlu0 %v531_v1  ;;  %v3826_v0 = vunpack.c.l.bf16 %v2523_v58  ;;  %v2524_v1 = vld [vmem:[%s3634_s28 + $0xa8] sm:$0xff]  }
  0x82   : > { %v3835_v15 = vunpack.c.l.bf16 %v2524_v1 }
  0x84   : > { %v549_v24 = vmul.f32 %v3835_v15, %v3835_v15 }
  0x85   : > { %689 = vadd.xlane.f32.xlu1 %v534_v9  ;;  %687 = vadd.xlane.f32.xlu0 %v533_v10  ;;  %v547_v9 = vmul.f32 %v3826_v0, %v3826_v0  ;;  %v3833_v10 = vunpack.c.h.bf16 %v2524_v1 }
  0x89   : > { %693 = vadd.xlane.f32.xlu1 %v536_v18  ;;  %691 = vadd.xlane.f32.xlu0 %v535_v19  ;;  %v2525_v18 = vld [vmem:[%s3634_s28 + $0xb0] sm:$0xff]   ;;  %v550_v19 = vmul.f32 %v3833_v10, %v3833_v10 }
  0x8d   : > { %697 = vadd.xlane.f32.xlu1 %v538_v25  ;;  %695 = vadd.xlane.f32.xlu0 %v537_v28  ;;  %v3842_v25 = vunpack.c.h.bf16 %v2525_v18  ;;  %v3844_v28 = vunpack.c.l.bf16 %v2525_v18  ;;  %v2529_v18 = vld [vmem:[%s3634_s28 + $0xd0] sm:$0xff]  }
  0x91   : > { %701 = vadd.xlane.f32.xlu1 %v540_v34  ;;  %699 = vadd.xlane.f32.xlu0 %v539_v35  ;;  %v552_v34 = vmul.f32 %v3842_v25, %v3842_v25  ;;  %v551_v35 = vmul.f32 %v3844_v28, %v3844_v28 }
  0x95   : > { %705 = vadd.xlane.f32.xlu1 %v542_v43  ;;  %703 = vadd.xlane.f32.xlu0 %v541_v44  ;;  %v3853_v43 = vunpack.c.l.bf16 %v2526_v33  ;;  %v2527_v44 = vld [vmem:[%s3634_s28 + $0xc0] sm:$0xff]   ;;  %v3878_v33 = vunpack.c.h.bf16 %v2529_v18 }
  0x96   : > { %v3862_v58 = vunpack.c.l.bf16 %v2527_v44 }
  0x97   : > { %5280 = vst [vmem:[#allocation29_spill] sm:$0xff] %v3853_v43  ;;  %5285 = vst [vmem:[#allocation34_spill] sm:$0xff] %v3878_v33 }
  0x98   : > { %5282 = vst [vmem:[#allocation31_spill] sm:$0xff] %v3862_v58  ;;  %v555_v1 = vmul.f32 %v3862_v58, %v3862_v58 }
  0x99   : > { %709 = vadd.xlane.f32.xlu1 %v544_v50  ;;  %707 = vadd.xlane.f32.xlu0 %v543_v53  ;;  %v553_v50 = vmul.f32 %v3853_v43, %v3853_v43  ;;  %v3860_v53 = vunpack.c.h.bf16 %v2527_v44  ;;  %v560_v44 = vmul.f32 %v3878_v33, %v3878_v33 }
  0x9b   : > { %5281 = vst [vmem:[#allocation30_spill] sm:$0xff] %v3860_v53 }
  0x9d   : > { %713 = vadd.xlane.f32.xlu1 %v546_v59  ;;  %711 = vadd.xlane.f32.xlu0 %v545_v60  ;;  %v2528_v59 = vld [vmem:[%s3634_s28 + $0xc8] sm:$0xff]   ;;  %v556_v60 = vmul.f32 %v3860_v53, %v3860_v53 }
  0xa1   : > { %717 = vadd.xlane.f32.xlu1 %v548_v8  ;;  %715 = vadd.xlane.f32.xlu0 %v547_v9  ;;  %v3869_v8 = vunpack.c.h.bf16 %v2528_v59  ;;  %v3871_v9 = vunpack.c.l.bf16 %v2528_v59 }
  0xa3   : > { %5283 = vst [vmem:[#allocation32_spill] sm:$0xff] %v3869_v8  ;;  %5284 = vst [vmem:[#allocation33_spill] sm:$0xff] %v3871_v9 }
  0xa5   : > { %721 = vadd.xlane.f32.xlu1 %v550_v19  ;;  %719 = vadd.xlane.f32.xlu0 %v549_v24  ;;  %v558_v19 = vmul.f32 %v3869_v8, %v3869_v8  ;;  %v557_v24 = vmul.f32 %v3871_v9, %v3871_v9  ;;  %v2546_v8 = vld [vmem:[%s3634_s28 + $0x158] sm:$0xff]  }
  0xa6   : > { %v2538_v9 = vld [vmem:[%s3634_s28 + $0x118] sm:$0xff]  }
  0xa9   : > { %725 = vadd.xlane.f32.xlu1 %v552_v34  ;;  %723 = vadd.xlane.f32.xlu0 %v551_v35  ;;  %v3880_v34 = vunpack.c.l.bf16 %v2529_v18  ;;  %v2530_v35 = vld [vmem:[%s3634_s28 + $0xd8] sm:$0xff]  }
  0xaa   : > { %v3889_v59 = vunpack.c.l.bf16 %v2530_v35 }
  0xab   : > { %5286 = vst [vmem:[#allocation35_spill] sm:$0xff] %v3880_v34 }
  0xac   : > { %5288 = vst [vmem:[#allocation37_spill] sm:$0xff] %v3889_v59  ;;  %v561_v18 = vmul.f32 %v3889_v59, %v3889_v59  ;;  %v2537_v59 = vld [vmem:[%s3634_s28 + $0x110] sm:$0xff]  }
  0xad   : > { %729 = vadd.xlane.f32.xlu1 %v554_v49  ;;  %727 = vadd.xlane.f32.xlu0 %v553_v50  ;;  %v559_v49 = vmul.f32 %v3880_v34, %v3880_v34  ;;  %v3887_v50 = vunpack.c.h.bf16 %v2530_v35 }
  0xaf   : > { %5287 = vst [vmem:[#allocation36_spill] sm:$0xff] %v3887_v50 }
  0xb1   : > { %733 = vadd.xlane.f32.xlu1 %v556_v60  ;;  %731 = vadd.xlane.f32.xlu0 %v555_v1  ;;  %v2531_v60 = vld [vmem:[%s3634_s28 + $0xe0] sm:$0xff]   ;;  %v562_v1 = vmul.f32 %v3887_v50, %v3887_v50  ;;  %v2545_v50 = vld [vmem:[%s3634_s28 + $0x150] sm:$0xff]  }
  0xb5   : > { %737 = vadd.xlane.f32.xlu1 %v558_v19  ;;  %735 = vadd.xlane.f32.xlu0 %v557_v24  ;;  %v3896_v19 = vunpack.c.h.bf16 %v2531_v60  ;;  %v3898_v24 = vunpack.c.l.bf16 %v2531_v60 }
  0xb7   : > { %5289 = vst [vmem:[#allocation38_spill] sm:$0xff] %v3896_v19  ;;  %5290 = vst [vmem:[#allocation39_spill] sm:$0xff] %v3898_v24  ;;  %v564_v35 = vmul.f32 %v3896_v19, %v3896_v19  ;;  %v2552_v19 = vld [vmem:[%s3634_s28 + $0x188] sm:$0xff]  }
  0xb9   : > { %741 = vadd.xlane.f32.xlu1 %v560_v44  ;;  %739 = vadd.xlane.f32.xlu0 %v559_v49  ;;  %v563_v44 = vmul.f32 %v3898_v24, %v3898_v24  ;;  %v3905_v49 = vunpack.c.h.bf16 %v2532_v20 }
  0xbb   : > { %5291 = vst [vmem:[#allocation40_spill] sm:$0xff] %v3905_v49  ;;  %v566_v60 = vmul.f32 %v3905_v49, %v3905_v49  ;;  %v3925_v49 = vunpack.c.l.bf16 %v2534_v6 }
  0xbd   : > { %745 = vadd.xlane.f32.xlu1 %v562_v1  ;;  %743 = vadd.xlane.f32.xlu0 %v561_v18  ;;  %v565_v1 = vmul.f32 %v3907_v23, %v3907_v23  ;;  %v3914_v18 = vunpack.c.h.bf16 %v2533_v13  ;;  %5296 = vst [vmem:[#allocation45_spill] sm:$0xff] %v3925_v49  ;;  %v2559_v23 = vld [vmem:[%s3634_s28 + $0x1c0] sm:$0xff]  }
  0xbf   : > { %5293 = vst [vmem:[#allocation42_spill] sm:$0xff] %v3914_v18  ;;  %v568_v20 = vmul.f32 %v3914_v18, %v3914_v18  ;;  %v3934_v18 = vunpack.c.l.bf16 %v2535_v7 }
  0xc1   : > { %749 = vadd.xlane.f32.xlu1 %v564_v35  ;;  %747 = vadd.xlane.f32.xlu0 %v563_v44  ;;  %v567_v35 = vmul.f32 %v3916_v14, %v3916_v14  ;;  %v3923_v44 = vunpack.c.h.bf16 %v2534_v6  ;;  %5298 = vst [vmem:[#allocation47_spill] sm:$0xff] %v3934_v18  ;;  %v2543_v14 = vld [vmem:[%s3634_s28 + $0x140] sm:$0xff]  }
  0xc3   : > { %5295 = vst [vmem:[#allocation44_spill] sm:$0xff] %v3923_v44  ;;  %v570_v13 = vmul.f32 %v3923_v44, %v3923_v44  ;;  %v3944_v44 = vunpack.c.l.bf16 %v2543_v14 }
  0xc5   : > { %753 = vadd.xlane.f32.xlu1 %v566_v60  ;;  %751 = vadd.xlane.f32.xlu0 %v565_v1  ;;  %v569_v60 = vmul.f32 %v3925_v49, %v3925_v49  ;;  %v3932_v1 = vunpack.c.h.bf16 %v2535_v7  ;;  %5300 = vst [vmem:[#allocation49_spill] sm:$0xff] %v3944_v44  ;;  %v2551_v49 = vld [vmem:[%s3634_s28 + $0x180] sm:$0xff]  }
  0xc7   : > { %5297 = vst [vmem:[#allocation46_spill] sm:$0xff] %v3932_v1  ;;  %v572_v6 = vmul.f32 %v3932_v1, %v3932_v1  ;;  %v3953_v1 = vunpack.c.l.bf16 %v2551_v49 }
  0xc9   : > { %757 = vadd.xlane.f32.xlu1 %v568_v20  ;;  %755 = vadd.xlane.f32.xlu0 %v567_v35  ;;  %v571_v20 = vmul.f32 %v3934_v18, %v3934_v18  ;;  %v3942_v35 = vunpack.c.l.bf16 %v2559_v23  ;;  %5302 = vst [vmem:[#allocation51_spill] sm:$0xff] %v3953_v1 }
  0xcb   : > { %5299 = vst [vmem:[#allocation48_spill] sm:$0xff] %v3942_v35  ;;  %v619_v7 = vmul.f32 %v3942_v35, %v3942_v35  ;;  %v3961_v35 = vunpack.c.h.bf16 %v2559_v23 }
  0xcd   : > { %761 = vadd.xlane.f32.xlu1 %v570_v13  ;;  %759 = vadd.xlane.f32.xlu0 %v569_v60  ;;  %v587_v13 = vmul.f32 %v3944_v44, %v3944_v44  ;;  %v3951_v60 = vunpack.c.h.bf16 %v2543_v14  ;;  %5304 = vst [vmem:[#allocation53_spill] sm:$0xff] %v3961_v35  ;;  %v2544_v44 = vld [vmem:[%s3634_s28 + $0x148] sm:$0xff]  }
  0xcf   : > { %5301 = vst [vmem:[#allocation50_spill] sm:$0xff] %v3951_v60  ;;  %v588_v18 = vmul.f32 %v3951_v60, %v3951_v60  ;;  %v3971_v60 = vunpack.c.l.bf16 %v2544_v44 }
  0xd1   : > { %765 = vadd.xlane.f32.xlu1 %v572_v6  ;;  %763 = vadd.xlane.f32.xlu0 %v571_v20  ;;  %v603_v6 = vmul.f32 %v3953_v1, %v3953_v1  ;;  %v3959_v20 = vunpack.c.h.bf16 %v2551_v49  ;;  %5306 = vst [vmem:[#allocation55_spill] sm:$0xff] %v3971_v60  ;;  %v2536_v1 = vld [vmem:[%s3634_s28 + $0x108] sm:$0xff]   ;;  %v589_v49 = vmul.f32 %v3971_v60, %v3971_v60  ;;  %v3993_v60 = vunpack.c.h.bf16 %v2544_v44 }
  0xd3   : > { %5303 = vst [vmem:[#allocation52_spill] sm:$0xff] %v3959_v20  ;;  %v604_v14 = vmul.f32 %v3959_v20, %v3959_v20  ;;  %5310 = vst [vmem:[#allocation59_spill] sm:$0xff] %v3993_v60 }
  0xd5   : > { %859 = vadd.xlane.f32.xlu1 %v619_v7  ;;  %795 = vadd.xlane.f32.xlu0 %v587_v13  ;;  %v620_v7 = vmul.f32 %v3961_v35, %v3961_v35  ;;  %v3969_v13 = vunpack.c.l.bf16 %v2560_v61 }
  0xd7   : > { %5305 = vst [vmem:[#allocation54_spill] sm:$0xff] %v3969_v13  ;;  %v621_v23 = vmul.f32 %v3969_v13, %v3969_v13  ;;  %v3991_v13 = vunpack.c.h.bf16 %v2560_v61  ;;  %v4005_v61 = vunpack.c.h.bf16 %v2536_v1 }
  0xd9   : > { %797 = vadd.xlane.f32.xlu1 %v588_v18  ;;  %827 = vadd.xlane.f32.xlu0 %v603_v6  ;;  %v3979_v18 = vunpack.c.l.bf16 %v2552_v19  ;;  %v3981_v6 = vunpack.c.l.bf16 %v2536_v1  ;;  %5309 = vst [vmem:[#allocation58_spill] sm:$0xff] %v3991_v13  ;;  %5312 = vst [vmem:[#allocation61_spill] sm:$0xff] %v4005_v61 }
  0xdb   : > { %5307 = vst [vmem:[#allocation56_spill] sm:$0xff] %v3979_v18  ;;  %5308 = vst [vmem:[#allocation57_spill] sm:$0xff] %v3981_v6 }
  0xdd   : > { %829 = vadd.xlane.f32.xlu1 %v604_v14  ;;  %861 = vadd.xlane.f32.xlu0 %v620_v7  ;;  %v605_v14 = vmul.f32 %v3979_v18, %v3979_v18  ;;  %v573_v7 = vmul.f32 %v3981_v6, %v3981_v6  ;;  %v4003_v18 = vunpack.c.h.bf16 %v2552_v19  ;;  %v4019_v19 = vunpack.c.l.bf16 %v2545_v50 }
  0xde   : > { %v3983_v20 = vpop.xlane.xlu1 %639  ;;  %v3985_v35 = vpop.xlane.xlu0 %635 }
  0xdf   : > { %5311 = vst [vmem:[#allocation60_spill] sm:$0xff] %v4003_v18  ;;  %5314 = vst [vmem:[#allocation63_spill] sm:$0xff] %v4019_v19 }
  0xe1   : > { %863 = vadd.xlane.f32.xlu1 %v621_v23  ;;  %799 = vadd.xlane.f32.xlu0 %v589_v49  ;;  %v622_v23 = vmul.f32 %v3991_v13, %v3991_v13  ;;  %v590_v49 = vmul.f32 %v3993_v60, %v3993_v60  ;;  %v4017_v13 = vunpack.c.l.bf16 %v2561_v56 }
  0xe2   : > { %v3995_v62 = vpop.xlane.xlu1 %641  ;;  %v3997_v24 = vpop.xlane.xlu0 %637 }
  0xe3   : > { %5313 = vst [vmem:[#allocation62_spill] sm:$0xff] %v4017_v13 }
  0xe5   : > { %831 = vadd.xlane.f32.xlu1 %v605_v14  ;;  %767 = vadd.xlane.f32.xlu0 %v573_v7  ;;  %v606_v14 = vmul.f32 %v4003_v18, %v4003_v18  ;;  %v574_v7 = vmul.f32 %v4005_v61, %v4005_v61  ;;  %v4031_v18 = vunpack.c.l.bf16 %v2553_v57  ;;  %v4033_v61 = vunpack.c.l.bf16 %v2537_v59 }
  0xe6   : > { %v4007_v44 = vpop.xlane.xlu1 %645  ;;  %v4009_v6 = vpop.xlane.xlu0 %643 }
  0xe7   : > { %5315 = vst [vmem:[#allocation64_spill] sm:$0xff] %v4031_v18  ;;  %5316 = vst [vmem:[#allocation65_spill] sm:$0xff] %v4033_v61 }
  0xe9   : > { %865 = vadd.xlane.f32.xlu1 %v622_v23  ;;  %801 = vadd.xlane.f32.xlu0 %v590_v49  ;;  %v623_v23 = vmul.f32 %v4017_v13, %v4017_v13  ;;  %v591_v49 = vmul.f32 %v4019_v19, %v4019_v19  ;;  %v4043_v13 = vunpack.c.h.bf16 %v2561_v56  ;;  %v4045_v19 = vunpack.c.h.bf16 %v2545_v50 }
  0xea   : > { %v4021_v1 = vpop.xlane.xlu1 %649  ;;  %v4023_v60 = vpop.xlane.xlu0 %647  ;;  %v4057_v56 = vunpack.c.h.bf16 %v2537_v59 }
  0xeb   : > { %5317 = vst [vmem:[#allocation66_spill] sm:$0xff] %v4043_v13  ;;  %5318 = vst [vmem:[#allocation67_spill] sm:$0xff] %v4045_v19 }
  0xec   : > { %5320 = vst [vmem:[#allocation69_spill] sm:$0xff] %v4057_v56 }
  0xed   : > { %833 = vadd.xlane.f32.xlu1 %v606_v14  ;;  %769 = vadd.xlane.f32.xlu0 %v574_v7  ;;  %v607_v14 = vmul.f32 %v4031_v18, %v4031_v18  ;;  %v575_v7 = vmul.f32 %v4033_v61, %v4033_v61  ;;  %v4055_v18 = vunpack.c.h.bf16 %v2553_v57  ;;  %v4071_v57 = vunpack.c.l.bf16 %v2546_v8 }
  0xee   : > { %v4035_v51 = vpop.xlane.xlu1 %653  ;;  %v4037_v33 = vpop.xlane.xlu0 %651 }
  0xef   : > { %5319 = vst [vmem:[#allocation68_spill] sm:$0xff] %v4055_v18  ;;  %5322 = vst [vmem:[#allocation71_spill] sm:$0xff] %v4071_v57 }
  0xf1   : > { %867 = vadd.xlane.f32.xlu1 %v623_v23  ;;  %803 = vadd.xlane.f32.xlu0 %v591_v49  ;;  %v624_v23 = vmul.f32 %v4043_v13, %v4043_v13  ;;  %v592_v49 = vmul.f32 %v4045_v19, %v4045_v19  ;;  %v4069_v19 = vunpack.c.l.bf16 %v2562_v46 }
  0xf2   : > { %v4047_v52 = vpop.xlane.xlu1 %657  ;;  %v4049_v34 = vpop.xlane.xlu0 %655 }
  0xf3   : > { %5321 = vst [vmem:[#allocation70_spill] sm:$0xff] %v4069_v19 }
  0xf5   : > { %835 = vadd.xlane.f32.xlu1 %v607_v14  ;;  %771 = vadd.xlane.f32.xlu0 %v575_v7  ;;  %v608_v14 = vmul.f32 %v4055_v18, %v4055_v18  ;;  %v576_v7 = vmul.f32 %v4057_v56, %v4057_v56  ;;  %v4083_v18 = vunpack.c.l.bf16 %v2554_v47  ;;  %v4085_v56 = vunpack.c.l.bf16 %v2538_v9 }
  0xf6   : > { %v4059_v50 = vpop.xlane.xlu1 %661  ;;  %v4061_v61 = vpop.xlane.xlu0 %659 }
  0xf7   : > { %5323 = vst [vmem:[#allocation72_spill] sm:$0xff] %v4083_v18  ;;  %5324 = vst [vmem:[#allocation73_spill] sm:$0xff] %v4085_v56 }
  0xf9   : > { %869 = vadd.xlane.f32.xlu1 %v624_v23  ;;  %805 = vadd.xlane.f32.xlu0 %v592_v49  ;;  %v625_v23 = vmul.f32 %v4069_v19, %v4069_v19  ;;  %v593_v49 = vmul.f32 %v4071_v57, %v4071_v57  ;;  %v4095_v19 = vunpack.c.h.bf16 %v2562_v46  ;;  %v4097_v57 = vunpack.c.h.bf16 %v2546_v8 }
  0xfa   : > { %v4073_v59 = vpop.xlane.xlu1 %665  ;;  %v4075_v13 = vpop.xlane.xlu0 %663  ;;  %v4109_v46 = vunpack.c.h.bf16 %v2538_v9 }
  0xfb   : > { %5327 = vst [vmem:[#allocation76_spill] sm:$0xff] %v4095_v19  ;;  %5328 = vst [vmem:[#allocation77_spill] sm:$0xff] %v4097_v57 }
  0xfc   : > { %5332 = vst [vmem:[#allocation81_spill] sm:$0xff] %v4109_v46 }
  0xfd   : > { %837 = vadd.xlane.f32.xlu1 %v608_v14  ;;  %773 = vadd.xlane.f32.xlu0 %v576_v7  ;;  %v609_v14 = vmul.f32 %v4083_v18, %v4083_v18  ;;  %v577_v7 = vmul.f32 %v4085_v56, %v4085_v56  ;;  %v4107_v18 = vunpack.c.h.bf16 %v2554_v47 }
  0xfe   : > { %v4087_v41 = vpop.xlane.xlu1 %669  ;;  %v4089_v53 = vpop.xlane.xlu0 %667 }
  0xff   : > { %5325 = vst [vmem:[#allocation74_spill] sm:$0xff] %v4087_v41  ;;  %5326 = vst [vmem:[#allocation75_spill] sm:$0xff] %v4089_v53 }
 0x100   : > { %5331 = vst [vmem:[#allocation80_spill] sm:$0xff] %v4107_v18 }
 0x101   : > { %871 = vadd.xlane.f32.xlu1 %v625_v23  ;;  %807 = vadd.xlane.f32.xlu0 %v593_v49  ;;  %v626_v23 = vmul.f32 %v4095_v19, %v4095_v19  ;;  %v594_v49 = vmul.f32 %v4097_v57, %v4097_v57 }
 0x102   : > { %v4099_v42 = vpop.xlane.xlu1 %673  ;;  %v4101_v58 = vpop.xlane.xlu0 %671 }
 0x103   : > { %5329 = vst [vmem:[#allocation78_spill] sm:$0xff] %v4099_v42  ;;  %5330 = vst [vmem:[#allocation79_spill] sm:$0xff] %v4101_v58  ;;  %v2563_v42 = vld [vmem:[%s3634_s28 + $0x1e0] sm:$0xff]  }
 0x104   : > { %v2547_v58 = vld [vmem:[%s3634_s28 + $0x160] sm:$0xff]   ;;  %v4121_v19 = vunpack.c.l.bf16 %v2563_v42 }
 0x105   : > { %839 = vadd.xlane.f32.xlu1 %v609_v14  ;;  %775 = vadd.xlane.f32.xlu0 %v577_v7  ;;  %v610_v14 = vmul.f32 %v4107_v18, %v4107_v18  ;;  %v578_v7 = vmul.f32 %v4109_v46, %v4109_v46  ;;  %v4123_v47 = vunpack.c.l.bf16 %v2547_v58 }
 0x106   : > { %v4111_v8 = vpop.xlane.xlu1 %677  ;;  %v4113_v56 = vpop.xlane.xlu0 %675  ;;  %5335 = vst [vmem:[#allocation84_spill] sm:$0xff] %v4121_v19 }
 0x107   : > { %5333 = vst [vmem:[#allocation82_spill] sm:$0xff] %v4111_v8  ;;  %5334 = vst [vmem:[#allocation83_spill] sm:$0xff] %v4113_v56  ;;  %v2555_v8 = vld [vmem:[%s3634_s28 + $0x1a0] sm:$0xff]  }
 0x108   : > { %5336 = vst [vmem:[#allocation85_spill] sm:$0xff] %v4123_v47  ;;  %v2539_v56 = vld [vmem:[%s3634_s28 + $0x120] sm:$0xff]   ;;  %v4135_v18 = vunpack.c.l.bf16 %v2555_v8 }
 0x109   : > { %873 = vadd.xlane.f32.xlu1 %v626_v23  ;;  %809 = vadd.xlane.f32.xlu0 %v594_v49  ;;  %v627_v23 = vmul.f32 %v4121_v19, %v4121_v19  ;;  %v595_v49 = vmul.f32 %v4123_v47, %v4123_v47  ;;  %v4137_v46 = vunpack.c.l.bf16 %v2539_v56 }
 0x10a   : > { %v4125_v9 = vpop.xlane.xlu1 %681  ;;  %v4127_v57 = vpop.xlane.xlu0 %679  ;;  %5339 = vst [vmem:[#allocation88_spill] sm:$0xff] %v4135_v18 }
 0x10b   : > { %5337 = vst [vmem:[#allocation86_spill] sm:$0xff] %v4125_v9  ;;  %5338 = vst [vmem:[#allocation87_spill] sm:$0xff] %v4127_v57  ;;  %v4143_v57 = vunpack.c.h.bf16 %v2563_v42  ;;  %v579_v19 = vmul.f32 %v4137_v46, %v4137_v46 }
 0x10c   : > { %5340 = vst [vmem:[#allocation89_spill] sm:$0xff] %v4137_v46 }
 0x10d   : > { %841 = vadd.xlane.f32.xlu1 %v610_v14  ;;  %777 = vadd.xlane.f32.xlu0 %v578_v7  ;;  %5343 = vst [vmem:[#allocation92_spill] sm:$0xff] %v4143_v57  ;;  %v4145_v14 = vunpack.c.h.bf16 %v2547_v58  ;;  %v611_v7 = vmul.f32 %v4135_v18, %v4135_v18  ;;  %v628_v42 = vmul.f32 %v4143_v57, %v4143_v57  ;;  %v2564_v18 = vld [vmem:[%s3634_s28 + $0x1e8] sm:$0xff]  }
 0x10e   : > { %v4139_v41 = vpop.xlane.xlu1 %685  ;;  %v4141_v9 = vpop.xlane.xlu0 %683 }
 0x10f   : > { %5341 = vst [vmem:[#allocation90_spill] sm:$0xff] %v4139_v41  ;;  %5342 = vst [vmem:[#allocation91_spill] sm:$0xff] %v4141_v9  ;;  %v596_v58 = vmul.f32 %v4145_v14, %v4145_v14  ;;  %v2556_v41 = vld [vmem:[%s3634_s28 + $0x1a8] sm:$0xff]  }
 0x110   : > { %5344 = vst [vmem:[#allocation93_spill] sm:$0xff] %v4145_v14  ;;  %v891_v14 = vmax.f32 %v3985_v35, 1e-24  ;;  %v2540_v9 = vld [vmem:[%s3634_s28 + $0x128] sm:$0xff]   ;;  %v4191_v35 = vunpack.c.l.bf16 %v2556_v41 }
 0x111   : > { %875 = vadd.xlane.f32.xlu1 %v627_v23  ;;  %811 = vadd.xlane.f32.xlu0 %v595_v49  ;;  %v4159_v23 = vunpack.c.h.bf16 %v2555_v8  ;;  %v4161_v49 = vunpack.c.h.bf16 %v2539_v56 }
 0x112   : > { %v4151_v47 = vpop.xlane.xlu1 %689  ;;  %v4153_v53 = vpop.xlane.xlu0 %687  ;;  %5355 = vst [vmem:[#allocation104_spill] sm:$0xff] %v4191_v35 }
 0x113   : > { %5345 = vst [vmem:[#allocation94_spill] sm:$0xff] %v4151_v47  ;;  %5346 = vst [vmem:[#allocation95_spill] sm:$0xff] %v4153_v53  ;;  %v2548_v53 = vld [vmem:[%s3634_s28 + $0x168] sm:$0xff]   ;;  %v612_v8 = vmul.f32 %v4159_v23, %v4159_v23  ;;  %v580_v56 = vmul.f32 %v4161_v49, %v4161_v49 }
 0x114   : > { %5347 = vst [vmem:[#allocation96_spill] sm:$0xff] %v4159_v23  ;;  %5348 = vst [vmem:[#allocation97_spill] sm:$0xff] %v4161_v49  ;;  %v4176_v57 = vunpack.c.l.bf16 %v2548_v53  ;;  %v4193_v49 = vunpack.c.l.bf16 %v2540_v9 }
 0x115   : > { %843 = vadd.xlane.f32.xlu1 %v611_v7  ;;  %779 = vadd.xlane.f32.xlu0 %v579_v19  ;;  %v4169_v7 = vunpack.c.l.bf16 %v2564_v18  ;;  %v893_v19 = vmax.f32 %v3983_v20, 1e-24  ;;  %v892_v20 = vmax.f32 %v3997_v24, 1e-24 }
 0x116   : > { %v4164_v46 = vpop.xlane.xlu1 %693  ;;  %v4166_v47 = vpop.xlane.xlu0 %691  ;;  %5352 = vst [vmem:[#allocation101_spill] sm:$0xff] %v4176_v57  ;;  %v597_v23 = vmul.f32 %v4176_v57, %v4176_v57  ;;  %5356 = vst [vmem:[#allocation105_spill] sm:$0xff] %v4193_v49 }
 0x117   : > { %5349 = vst [vmem:[#allocation98_spill] sm:$0xff] %v4164_v46  ;;  %5350 = vst [vmem:[#allocation99_spill] sm:$0xff] %v4166_v47  ;;  %3082 = vrsqrt.f32 %v893_v19 }
 0x118   : > { %5351 = vst [vmem:[#allocation100_spill] sm:$0xff] %v4169_v7  ;;  %3084 = vrsqrt.f32 %v891_v14  ;;  %v613_v14 = vmul.f32 %v4191_v35, %v4191_v35  ;;  %v4218_v35 = vunpack.c.h.bf16 %v2556_v41  ;;  %v900_v41 = vmax.f32 %v4035_v51, 1e-24 }
 0x119   : > { %877 = vadd.xlane.f32.xlu1 %v628_v42  ;;  %813 = vadd.xlane.f32.xlu0 %v596_v58  ;;  %v894_v42 = vmax.f32 %v3995_v62, 1e-24  ;;  %v629_v58 = vmul.f32 %v4169_v7, %v4169_v7  ;;  %3086 = vrsqrt.f32 %v892_v20  ;;  %v896_v62 = vmax.f32 %v4007_v44, 1e-24 }
 0x11a   : > { %v4179_v46 = vpop.xlane.xlu1 %697  ;;  %v4181_v47 = vpop.xlane.xlu0 %695  ;;  %v581_v20 = vmul.f32 %v4193_v49, %v4193_v49  ;;  %v4203_v7 = vunpack.c.h.bf16 %v2548_v53  ;;  %5359 = vst [vmem:[#allocation108_spill] sm:$0xff] %v4218_v35 }
 0x11b   : > { %5353 = vst [vmem:[#allocation102_spill] sm:$0xff] %v4179_v46  ;;  %5354 = vst [vmem:[#allocation103_spill] sm:$0xff] %v4181_v47  ;;  %3088 = vrsqrt.f32 %v894_v42  ;;  %v4207_v42 = vld [vmem:[%s3634_s28 + $0x170] sm:$0xff]  }
 0x11c   : > { %5358 = vst [vmem:[#allocation107_spill] sm:$0xff] %v4203_v7 }
 0x11d   : > { %845 = vadd.xlane.f32.xlu1 %v612_v8  ;;  %781 = vadd.xlane.f32.xlu0 %v580_v56  ;;  %v895_v8 = vmax.f32 %v4009_v6, 1e-24  ;;  %v4197_v56 = vunpack.c.h.bf16 %v2564_v18  ;;  %v4210_v6 = vld [vmem:[%s3634_s28 + $0x1b0] sm:$0xff]   ;;  %v898_v18 = vmax.f32 %v4021_v1, 1e-24 }
 0x11e   : > { %v702_v46 = vpop.xlane.xlu1 %701  ;;  %v700_v47 = vpop.xlane.xlu0 %699 }
 0x11f   : > { %v924_v24 = vmax.f32 %v702_v46, 1e-24  ;;  %v923_v19 = vmax.f32 %v700_v47, 1e-24  ;;  %5357 = vst [vmem:[#allocation106_spill] sm:$0xff] %v4197_v56  ;;  %v2565_v47 = vld [vmem:[%s3634_s28 + $0x1f0] sm:$0xff]   ;;  %v630_v53 = vmul.f32 %v4197_v56, %v4197_v56 }
 0x121   : > { %3090 = vrsqrt.f32 %v924_v24  ;;  %879 = vadd.xlane.f32.xlu1 %v629_v58  ;;  %815 = vadd.xlane.f32.xlu0 %v597_v23  ;;  %v897_v24 = vmax.f32 %v4023_v60, 1e-24  ;;  %v4225_v60 = vunpack.c.l.bf16 %v4207_v42 }
 0x122   : > { %3092 = vrsqrt.f32 %v923_v19  ;;  %v706_v44 = vpop.xlane.xlu1 %705  ;;  %v704_v46 = vpop.xlane.xlu0 %703  ;;  %v598_v19 = vmul.f32 %v4203_v7, %v4203_v7  ;;  %v614_v7 = vmul.f32 %v4218_v35, %v4218_v35 }
 0x123   : > { %3094 = vrsqrt.f32 %v896_v62  ;;  %v926_v23 = vmax.f32 %v706_v44, 1e-24  ;;  %v925_v58 = vmax.f32 %v704_v46, 1e-24  ;;  %v4220_v62 = vunpack.c.h.bf16 %v2540_v9  ;;  %5362 = vst [vmem:[#allocation111_spill] sm:$0xff] %v4225_v60 }
 0x124   : > { %3096 = vrsqrt.f32 %v895_v8  ;;  %v4222_v46 = vunpack.c.l.bf16 %v2565_v47  ;;  %v4228_v8 = vunpack.c.l.bf16 %v4210_v6 }
 0x125   : > { %3098 = vrsqrt.f32 %v926_v23  ;;  %847 = vadd.xlane.f32.xlu1 %v613_v14  ;;  %783 = vadd.xlane.f32.xlu0 %v581_v20  ;;  %5360 = vst [vmem:[#allocation109_spill] sm:$0xff] %v4220_v62  ;;  %v4231_v14 = vld [vmem:[%s3634_s28 + $0x130] sm:$0xff]   ;;  %v3083_v20 = vpop.eup %3082  ;;  %v582_v57 = vmul.f32 %v4220_v62, %v4220_v62 }
 0x126   : > { %3100 = vrsqrt.f32 %v925_v58  ;;  %v710_v1 = vpop.xlane.xlu1 %709  ;;  %v708_v44 = vpop.xlane.xlu0 %707  ;;  %5361 = vst [vmem:[#allocation110_spill] sm:$0xff] %v4222_v46  ;;  %5363 = vst [vmem:[#allocation112_spill] sm:$0xff] %v4228_v8  ;;  %v899_v58 = vmax.f32 %v4037_v33, 1e-24  ;;  %v631_v33 = vmul.f32 %v4222_v46, %v4222_v46  ;;  %v615_v62 = vmul.f32 %v4228_v8, %v4228_v8 }
 0x127   : > { %3102 = vrsqrt.f32 %v898_v18  ;;  %v928_v23 = vmax.f32 %v710_v1, 1e-24  ;;  %v927_v9 = vmax.f32 %v708_v44, 1e-24  ;;  %v3085_v49 = vpop.eup %3084  ;;  %v4240_v18 = vunpack.c.l.bf16 %v4231_v14 }
 0x128   : > { %3104 = vrsqrt.f32 %v897_v24  ;;  %v3087_v56 = vpop.eup %3086  ;;  %v599_v24 = vmul.f32 %v4225_v60, %v4225_v60 }
 0x129   : > { %3106 = vrsqrt.f32 %v928_v23  ;;  %881 = vadd.xlane.f32.xlu1 %v630_v53  ;;  %817 = vadd.xlane.f32.xlu0 %v598_v19  ;;  %5364 = vst [vmem:[#allocation113_spill] sm:$0xff] %v4240_v18  ;;  %v3089_v51 = vpop.eup %3088  ;;  %v4246_v53 = vunpack.c.h.bf16 %v2565_v47  ;;  %v4252_v37 = vmul.f32 %v3087_v56, %v3651_v5  ;;  %v583_v47 = vmul.f32 %v4240_v18, %v4240_v18 }
 0x12a   : > { %3108 = vrsqrt.f32 %v927_v9  ;;  %v714_v1 = vpop.xlane.xlu1 %713  ;;  %v712_v44 = vpop.xlane.xlu0 %711  ;;  %v902_v9 = vmax.f32 %v4047_v52, 1e-24 }
 0x12b   : > { %5365 = vst [vmem:[#allocation114_spill] sm:$0xff] %v4246_v53  ;;  %v3091_v19 = vpop.eup %3090  ;;  %3110 = vrsqrt.f32 %v900_v41  ;;  %v930_v23 = vmax.f32 %v714_v1, 1e-24  ;;  %v929_v35 = vmax.f32 %v712_v44, 1e-24  ;;  %v4260_v41 = vmul.f32 %v3085_v49, %v3647_v3 }
 0x12c   : > { %v3093_v43 = vpop.eup %3092  ;;  %3112 = vrsqrt.f32 %v899_v58  ;;  %v4255_v46 = vmul.f32 %v3091_v19, %v3788_v29  ;;  %v4267_v29 = vmul.f32 %v4246_v53, %v4246_v53  ;;  %v901_v3 = vmax.f32 %v4049_v34, 1e-24 }
 0x12d   : > { %v3095_v60 = vpop.eup %3094  ;;  %3114 = vrsqrt.f32 %v930_v23  ;;  %849 = vadd.xlane.f32.xlu1 %v614_v7  ;;  %785 = vadd.xlane.f32.xlu0 %v582_v57  ;;  %v4263_v58 = vmul.f32 %v3093_v43, %v3790_v30  ;;  %v4270_v7 = vunpack.c.h.bf16 %v4207_v42  ;;  %v904_v44 = vmax.f32 %v4059_v50, 1e-24  ;;  %v5386_v43 = vld [vmem:[#allocation29_spill] sm:$0xff] }
 0x12e   : > { %v3097_v52 = vpop.eup %3096  ;;  %3116 = vrsqrt.f32 %v929_v35  ;;  %v718_v5 = vpop.xlane.xlu1 %717  ;;  %v4279_v19 = vmul.f32 %v3089_v51, %v3649_v4  ;;  %v4285_v34 = vunpack.c.h.bf16 %v4210_v6 }
 0x12f   : > { %v716_v56 = vpop.xlane.xlu0 %715  ;;  %5366 = vst [vmem:[#allocation115_spill] sm:$0xff] %v4270_v7  ;;  %v3099_v1 = vpop.eup %3098  ;;  %v932_v49 = vmax.f32 %v718_v5, 1e-24  ;;  %3118 = vrsqrt.f32 %v902_v9  ;;  %v4288_v5 = vmul.f32 %v3083_v20, %v3645_v2  ;;  %v600_v9 = vmul.f32 %v4270_v7, %v4270_v7 }
 0x130   : > { %v931_v30 = vmax.f32 %v716_v56, 1e-24  ;;  %v3101_v35 = vpop.eup %3100  ;;  %v4282_v42 = vmul.f32 %v3099_v1, %v3797_v38  ;;  %5367 = vst [vmem:[#allocation116_spill] sm:$0xff] %v4285_v34  ;;  %v4301_v56 = vld [vmem:[%s3634_s28 + $0x1f8] sm:$0xff]  }
 0x131   : > { %v3103_v23 = vpop.eup %3102  ;;  %3120 = vrsqrt.f32 %v932_v49  ;;  %883 = vadd.xlane.f32.xlu1 %v631_v33  ;;  %819 = vadd.xlane.f32.xlu0 %v599_v24  ;;  %v4291_v50 = vmul.f32 %v3101_v35, %v3799_v39  ;;  %v4296_v33 = vunpack.c.h.bf16 %v4231_v14  ;;  %v4304_v39 = vld [vmem:[%s3634_s28 + $0x178] sm:$0xff]   ;;  %v4310_v14 = vmul.f32 %v3095_v60, %v3662_v11 }
 0x132   : > { %v3105_v4 = vpop.eup %3104  ;;  %3122 = vrsqrt.f32 %v931_v30  ;;  %v722_v51 = vpop.xlane.xlu1 %721  ;;  %v903_v30 = vmax.f32 %v4061_v61, 1e-24  ;;  %v4336_v6 = vmul.f32 %v3103_v23, %v3671_v16 }
 0x133   : > { %v720_v38 = vpop.xlane.xlu0 %719  ;;  %5368 = vst [vmem:[#allocation117_spill] sm:$0xff] %v4296_v33  ;;  %v3107_v24 = vpop.eup %3106  ;;  %3124 = vrsqrt.f32 %v901_v3  ;;  %v934_v2 = vmax.f32 %v722_v51, 1e-24  ;;  %v616_v51 = vmul.f32 %v4285_v34, %v4285_v34 }
 0x134   : > { %v933_v20 = vmax.f32 %v720_v38, 1e-24  ;;  %v3109_v49 = vpop.eup %3108  ;;  %3126 = vrsqrt.f32 %v904_v44  ;;  %v4313_v35 = vmul.f32 %v3107_v24, %v3806_v45  ;;  %v4318_v38 = vmul.f32 %v3097_v52, %v3664_v12 }
 0x135   : > { %v3111_v3 = vpop.eup %3110  ;;  %3128 = vrsqrt.f32 %v934_v2  ;;  %851 = vadd.xlane.f32.xlu1 %v615_v62  ;;  %787 = vadd.xlane.f32.xlu0 %v583_v47  ;;  %v4321_v44 = vmul.f32 %v3109_v49, %v3808_v48  ;;  %v4324_v45 = vunpack.c.l.bf16 %v4301_v56  ;;  %v4327_v24 = vunpack.c.l.bf16 %v4304_v39 }
 0x136   : > { %v3113_v61 = vpop.eup %3112  ;;  %3130 = vrsqrt.f32 %v933_v20  ;;  %v726_v11 = vpop.xlane.xlu1 %725  ;;  %v906_v12 = vmax.f32 %v4073_v59, 1e-24  ;;  %v905_v49 = vmax.f32 %v4075_v13, 1e-24  ;;  %v584_v59 = vmul.f32 %v4296_v33, %v4296_v33 }
 0x137   : > { %v724_v60 = vpop.xlane.xlu0 %723  ;;  %5369 = vst [vmem:[#allocation118_spill] sm:$0xff] %v4324_v45  ;;  %5370 = vst [vmem:[#allocation119_spill] sm:$0xff] %v4327_v24  ;;  %v3115_v47 = vpop.eup %3114  ;;  %v936_v52 = vmax.f32 %v726_v11, 1e-24  ;;  %3132 = vrsqrt.f32 %v903_v30  ;;  %v2558_v11 = vld [vmem:[%s3634_s28 + $0x1b8] sm:$0xff]   ;;  %v4363_v62 = vmul.f32 %v3111_v3, %v3680_v21 }
 0x138   : > { %v935_v48 = vmax.f32 %v724_v60, 1e-24  ;;  %v3117_v20 = vpop.eup %3116  ;;  %v4339_v1 = vmul.f32 %v3115_v47, %v3815_v54  ;;  %v4346_v60 = vmul.f32 %v3105_v4, %v3673_v17  ;;  %v633_v54 = vmul.f32 %v4324_v45, %v4324_v45  ;;  %v5389_v45 = vld [vmem:[#allocation74_spill] sm:$0xff] }
 0x139   : > { %3134 = vrsqrt.f32 %v936_v52  ;;  %885 = vadd.xlane.f32.xlu1 %v4267_v29  ;;  %821 = vadd.xlane.f32.xlu0 %v600_v9  ;;  %v4349_v13 = vmul.f32 %v3117_v20, %v3817_v55  ;;  %v3119_v30 = vpop.eup %3118  ;;  %v601_v29 = vmul.f32 %v4327_v24, %v4327_v24  ;;  %v2542_v9 = vld [vmem:[%s3634_s28 + $0x138] sm:$0xff]   ;;  %v4360_v20 = vunpack.c.l.bf16 %v2558_v11 }
 0x13a   : > { %3136 = vrsqrt.f32 %v935_v48  ;;  %v730_v16 = vpop.xlane.xlu1 %729  ;;  %v908_v24 = vmax.f32 %v5389_v45, 1e-24  ;;  %v5391_v45 = vld [vmem:[#allocation78_spill] sm:$0xff] }
 0x13b   : > { %v728_v23 = vpop.xlane.xlu0 %727  ;;  %v3121_v52 = vpop.eup %3120  ;;  %3138 = vrsqrt.f32 %v906_v12  ;;  %v938_v17 = vmax.f32 %v730_v16, 1e-24  ;;  %5371 = vst [vmem:[#allocation120_spill] sm:$0xff] %v4360_v20  ;;  %v4368_v12 = vunpack.c.l.bf16 %v2542_v9  ;;  %v4371_v16 = vmul.f32 %v3113_v61, %v3682_v22 }
 0x13c   : > { %v937_v4 = vmax.f32 %v728_v23, 1e-24  ;;  %v3123_v48 = vpop.eup %3122  ;;  %3140 = vrsqrt.f32 %v905_v49  ;;  %v4366_v2 = vmul.f32 %v3121_v52, %v3824_v63  ;;  %v617_v22 = vmul.f32 %v4360_v20, %v4360_v20 }
 0x13d   : > { %v3125_v57 = vpop.eup %3124  ;;  %3142 = vrsqrt.f32 %v938_v17  ;;  %853 = vadd.xlane.f32.xlu1 %v616_v51  ;;  %789 = vadd.xlane.f32.xlu0 %v584_v59  ;;  %5372 = vst [vmem:[#allocation121_spill] sm:$0xff] %v4368_v12  ;;  %v4374_v23 = vmul.f32 %v3123_v48, %v3826_v0  ;;  %v4387_v0 = vunpack.c.h.bf16 %v4301_v56  ;;  %v4390_v61 = vmul.f32 %v3119_v30, %v3689_v26 }
 0x13e   : > { %v3127_v49 = vpop.eup %3126  ;;  %3144 = vrsqrt.f32 %v937_v4  ;;  %v4376_v47 = vpop.xlane.xlu1 %733  ;;  %v585_v17 = vmul.f32 %v4368_v12, %v4368_v12  ;;  %v4398_v4 = vunpack.c.h.bf16 %v4304_v39  ;;  %v4401_v48 = vmul.f32 %v3125_v57, %v3691_v27  ;;  %v5388_v12 = vld [vmem:[#allocation75_spill] sm:$0xff] }
 0x13f   : > { %v4378_v21 = vpop.xlane.xlu0 %731  ;;  %v3129_v3 = vpop.eup %3128  ;;  %5373 = vst [vmem:[#allocation122_spill] sm:$0xff] %v4387_v0  ;;  %5374 = vst [vmem:[#allocation123_spill] sm:$0xff] %v4390_v61  ;;  %v634_v27 = vmul.f32 %v4387_v0, %v4387_v0  ;;  %v4416_v57 = vunpack.c.h.bf16 %v2558_v11  ;;  %v4426_v51 = vunpack.c.h.bf16 %v2542_v9  ;;  %v907_v0 = vmax.f32 %v5388_v12, 1e-24  ;;  %v5400_v61 = vld [vmem:[#allocation82_spill] sm:$0xff] }
 0x140   : > { %v3131_v59 = vpop.eup %3130  ;;  %v4393_v52 = vmul.f32 %v3129_v3, %v3833_v10  ;;  %5375 = vst [vmem:[#allocation124_spill] sm:$0xff] %v4398_v4  ;;  %v602_v10 = vmul.f32 %v4398_v4, %v4398_v4  ;;  %v940_v33 = vmax.f32 %v4376_v47, 1e-24 }
 0x141   : > { %887 = vadd.xlane.f32.xlu1 %v633_v54  ;;  %823 = vadd.xlane.f32.xlu0 %v601_v29  ;;  %v4404_v56 = vmul.f32 %v3131_v59, %v3835_v15  ;;  %v3133_v63 = vpop.eup %3132  ;;  %5376 = vst [vmem:[#allocation125_spill] sm:$0xff] %v4416_v57  ;;  %v4419_v15 = vmul.f32 %v3127_v49, %v3698_v31  ;;  %5379 = vst [vmem:[#allocation128_spill] sm:$0xff] %v4426_v51 }
 0x142   : > { %v4406_v26 = vpop.xlane.xlu1 %737  ;;  %v4429_v29 = vmul.f32 %v3133_v63, %v3700_v32  ;;  %v618_v32 = vmul.f32 %v4416_v57, %v4416_v57 }
 0x143   : > { %v4408_v30 = vpop.xlane.xlu0 %735  ;;  %v3135_v54 = vpop.eup %3134  ;;  %5377 = vst [vmem:[#allocation126_spill] sm:$0xff] %v4419_v15  ;;  %v942_v47 = vmax.f32 %v4406_v26, 1e-24  ;;  %v5395_v15 = vld [vmem:[#allocation83_spill] sm:$0xff] }
 0x144   : > { %v3137_v39 = vpop.eup %3136  ;;  %v4422_v3 = vmul.f32 %v3135_v54, %v3842_v25  ;;  %5380 = vst [vmem:[#allocation129_spill] sm:$0xff] %v4429_v29  ;;  %v586_v54 = vmul.f32 %v4426_v51, %v4426_v51  ;;  %v939_v51 = vmax.f32 %v4378_v21, 1e-24  ;;  %v941_v53 = vmax.f32 %v4408_v30, 1e-24  ;;  %v5390_v21 = vld [vmem:[#allocation79_spill] sm:$0xff] }
 0x145   : > { %v3139_v59 = vpop.eup %3138  ;;  %855 = vadd.xlane.f32.xlu1 %v617_v22  ;;  %791 = vadd.xlane.f32.xlu0 %v585_v17  ;;  %v4432_v11 = vmul.f32 %v3137_v39, %v3844_v28  ;;  %v5384_v39 = vld [vmem:[#allocation12_spill] sm:$0xff]  ;;  %v909_v12 = vmax.f32 %v5390_v21, 1e-24  ;;  %v5394_v30 = vld [vmem:[#allocation31_spill] sm:$0xff] }
 0x146   : > { %5378 = vst [vmem:[#allocation127_spill] sm:$0xff] %v4422_v3  ;;  %v3141_v55 = vpop.eup %3140  ;;  %v4434_v31 = vpop.xlane.xlu1 %741  ;;  %v4445_v63 = vmul.f32 %v3139_v59, %v3707_v36  ;;  %3146 = vrsqrt.f32 %v939_v51  ;;  %v911_v3 = vmax.f32 %v5395_v15, 1e-24 }
 0x147   : > { %5381 = vst [vmem:[#allocation130_spill] sm:$0xff] %v4432_v11  ;;  %v4436_v49 = vpop.xlane.xlu0 %739  ;;  %v3143_v22 = vpop.eup %3142  ;;  %v4453_v25 = vmul.f32 %v3141_v55, %v5384_v39  ;;  %3148 = vrsqrt.f32 %v907_v0  ;;  %v910_v0 = vmax.f32 %v5391_v45, 1e-24  ;;  %v5398_v45 = vld [vmem:[#allocation14_spill] sm:$0xff]  ;;  %v944_v11 = vmax.f32 %v4434_v31, 1e-24 }
 0x148   : > { %v3145_v9 = vpop.eup %3144  ;;  %5382 = vst [vmem:[#allocation131_spill] sm:$0xff] %v4445_v63  ;;  %v4448_v28 = vmul.f32 %v3143_v22, %v3851_v40  ;;  %3150 = vrsqrt.f32 %v940_v33 }
 0x149   : > { %889 = vadd.xlane.f32.xlu1 %v634_v27  ;;  %825 = vadd.xlane.f32.xlu0 %v602_v10  ;;  %5385 = vst [vmem:[#allocation12_spill] sm:$0xff] %v4453_v25  ;;  %v4456_v17 = vmul.f32 %v3145_v9, %v5386_v43  ;;  %3152 = vrsqrt.f32 %v908_v24  ;;  %v943_v24 = vmax.f32 %v4436_v49, 1e-24 }
 0x14a   : > { %5383 = vst [vmem:[#allocation132_spill] sm:$0xff] %v4448_v28  ;;  %v4458_v20 = vpop.xlane.xlu1 %745  ;;  %3154 = vrsqrt.f32 %v941_v53 }
 0x14b   : > { %5387 = vst [vmem:[#allocation29_spill] sm:$0xff] %v4456_v17  ;;  %v4460_v57 = vpop.xlane.xlu0 %743  ;;  %3156 = vrsqrt.f32 %v909_v12 }
 0x14c   : > { %3158 = vrsqrt.f32 %v942_v47  ;;  %v5399_v47 = vld [vmem:[#allocation30_spill] sm:$0xff] }
 0x14d   : > { %857 = vadd.xlane.f32.xlu1 %v618_v32  ;;  %793 = vadd.xlane.f32.xlu0 %v586_v54  ;;  %3160 = vrsqrt.f32 %v910_v0 }
 0x14e   : > { %v4466_v10 = vpop.xlane.xlu1 %749  ;;  %3162 = vrsqrt.f32 %v943_v24  ;;  %v5403_v24 = vld [vmem:[#allocation33_spill] sm:$0xff] }
 0x14f   : > { %v4468_v27 = vpop.xlane.xlu0 %747  ;;  %3164 = vrsqrt.f32 %v911_v3 }
 0x150   : > { %v3147_v51 = vpop.eup %3146  ;;  %3166 = vrsqrt.f32 %v944_v11 }
 0x151   : > { %v3149_v33 = vpop.eup %3148  ;;  %v1195_v21 = vmul.f32 %v3147_v51, %v5394_v30  ;;  %v912_v51 = vmax.f32 %v5400_v61, 1e-24  ;;  %v5402_v30 = vld [vmem:[#allocation13_spill] sm:$0xff] }
 0x152   : > { %v4470_v55 = vpop.xlane.xlu1 %753  ;;  %v3151_v17 = vpop.eup %3150  ;;  %v1163_v12 = vmul.f32 %v3149_v33, %v5398_v45  ;;  %v945_v33 = vmax.f32 %v4460_v57, 1e-24  ;;  %v5406_v57 = vpack.i.bf16 %v4263_v58, %v4260_v41  ;;  %v947_v41 = vmax.f32 %v4468_v27, 1e-24 }
 0x153   : > { %v4472_v43 = vpop.xlane.xlu0 %751  ;;  %v3153_v29 = vpop.eup %3152  ;;  %3168 = vrsqrt.f32 %v912_v51  ;;  %v5408_v51 = vld [vmem:[#allocation86_spill] sm:$0xff]  ;;  %v5410_v58 = vpack.i.bf16 %v4255_v46, %v4252_v37  ;;  %v5414_v37 = vpack.i.bf16 %v4291_v50, %v4288_v5  ;;  %v5418_v5 = vpack.i.bf16 %v4282_v42, %v4279_v19 }
 0x154   : > { %v3155_v49 = vpop.eup %3154  ;;  %3170 = vrsqrt.f32 %v945_v33  ;;  %v5422_v19 = vpack.i.bf16 %v4321_v44, %v4318_v38  ;;  %v5426_v38 = vpack.i.bf16 %v4313_v35, %v4310_v14  ;;  %v5430_v14 = vpack.i.bf16 %v4349_v13, %v4346_v60 }
 0x155   : > { %v5434_v60 = vpack.i.bf16 %v4339_v1, %v4336_v6  ;;  %v5438_v6 = vld [vmem:[#allocation102_spill] sm:$0xff] }
 0x156   : > { %v4474_v59 = vpop.xlane.xlu1 %757  ;;  %v922_v1 = vmax.f32 %v5438_v6, 1e-24 }
 0x157   : > { %v4476_v22 = vpop.xlane.xlu0 %755 }
 0x15a   : > { %v4478_v9 = vpop.xlane.xlu1 %761 }
 0x15b   : > { %v4480_v39 = vpop.xlane.xlu0 %759 }
 0x15e   : > { %v4482_v36 = vpop.xlane.xlu1 %765 }
 0x15f   : > { %v4484_v32 = vpop.xlane.xlu0 %763 }
 0x162   : > { %v4486_v54 = vpop.xlane.xlu1 %859 }
 0x163   : > { %v4488_v40 = vpop.xlane.xlu0 %795 }
 0x166   : > { %v4492_v4 = vpop.xlane.xlu1 %797 }
 0x167   : > { %v4494_v34 = vpop.xlane.xlu0 %827 }
 0x16a   : > { %v4498_v8 = vpop.xlane.xlu1 %829 }
 0x16b   : > { %v4500_v18 = vpop.xlane.xlu0 %861 }
 0x16e   : > { %v4504_v7 = vpop.xlane.xlu1 %863 }
 0x16f   : > { %v4506_v63 = vpop.xlane.xlu0 %799 }
 0x172   : > { %v4510_v28 = vpop.xlane.xlu1 %831 }
 0x173   : > { %5392 = vst [vmem:[#allocation75_spill] sm:$0xff] %v4510_v28  ;;  %v4512_v25 = vpop.xlane.xlu0 %767  ;;  %v1196_v28 = vmul.f32 %v3151_v17, %v5399_v47  ;;  %v5404_v17 = vld [vmem:[#allocation87_spill] sm:$0xff] }
 0x174   : > { %5393 = vst [vmem:[#allocation74_spill] sm:$0xff] %v4512_v25  ;;  %v2634_v25 = vpack.i.bf16 %v1195_v21, %v1163_v12  ;;  %v1197_v21 = vmul.f32 %v3155_v49, %v5403_v24  ;;  %v913_v12 = vmax.f32 %v5404_v17, 1e-24  ;;  %v5409_v24 = vld [vmem:[#allocation15_spill] sm:$0xff] }
 0x176   : > { %v4517_v26 = vpop.xlane.xlu1 %865  ;;  %3172 = vrsqrt.f32 %v913_v12  ;;  %v5412_v12 = vld [vmem:[#allocation91_spill] sm:$0xff] }
 0x177   : > { %5396 = vst [vmem:[#allocation79_spill] sm:$0xff] %v4517_v26  ;;  %v4519_v53 = vpop.xlane.xlu0 %801  ;;  %v3157_v26 = vpop.eup %3156 }
 0x178   : > { %5397 = vst [vmem:[#allocation78_spill] sm:$0xff] %v4519_v53  ;;  %v1164_v53 = vmul.f32 %v3153_v29, %v5402_v30  ;;  %v3159_v45 = vpop.eup %3158  ;;  %v946_v29 = vmax.f32 %v4458_v20, 1e-24  ;;  %v914_v30 = vmax.f32 %v5408_v51, 1e-24 }
 0x17a   : > { %v4525_v0 = vpop.xlane.xlu1 %833  ;;  %2635 = vxpose.xlu0.b32.start [1/16] %v2634_v25, 128  ;;  %v2636_v31 = vpack.i.bf16 %v1196_v28, %v1164_v53  ;;  %v5405_v25 = vld [vmem:[#allocation16_spill] sm:$0xff]  ;;  %3174 = vrsqrt.f32 %v946_v29  ;;  %v5413_v29 = vld [vmem:[#allocation18_spill] sm:$0xff] }
 0x17b   : > { %v4527_v15 = vpop.xlane.xlu0 %769  ;;  %v1165_v47 = vmul.f32 %v3157_v26, %v5405_v25  ;;  %v5407_v28 = vld [vmem:[#allocation32_spill] sm:$0xff]  ;;  %3176 = vrsqrt.f32 %v914_v30  ;;  %v5416_v30 = vld [vmem:[#allocation90_spill] sm:$0xff] }
 0x17c   : > { %5401 = vst [vmem:[#allocation31_spill] sm:$0xff] %v4527_v15  ;;  %v3161_v15 = vpop.eup %3160  ;;  %v1198_v53 = vmul.f32 %v3159_v45, %v5407_v28  ;;  %v5411_v45 = vld [vmem:[#allocation35_spill] sm:$0xff]  ;;  %v948_v28 = vmax.f32 %v4466_v10, 1e-24  ;;  %3178 = vrsqrt.f32 %v947_v41  ;;  %v949_v41 = vmax.f32 %v4472_v43, 1e-24 }
 0x17d   : > { %v2638_v11 = vpack.i.bf16 %v1197_v21, %v1165_v47  ;;  %v3163_v49 = vpop.eup %3162  ;;  %v1166_v20 = vmul.f32 %v3161_v15, %v5409_v24  ;;  %v915_v47 = vmax.f32 %v5412_v12, 1e-24  ;;  %v916_v24 = vmax.f32 %v5416_v30, 1e-24  ;;  %v5420_v12 = vld [vmem:[#allocation95_spill] sm:$0xff] }
 0x17e   : > { %v4533_v61 = vpop.xlane.xlu1 %867  ;;  %2637 = vxpose.xlu0.b32.cont [2/16] %v2636_v31, 128  ;;  %v3165_v33 = vpop.eup %3164  ;;  %v1199_v17 = vmul.f32 %v3163_v49, %v5411_v45  ;;  %v5419_v45 = vld [vmem:[#allocation37_spill] sm:$0xff]  ;;  %v950_v43 = vmax.f32 %v4470_v55, 1e-24 }
 0x17f   : > { %v4535_v3 = vpop.xlane.xlu0 %803  ;;  %v2640_v21 = vpack.i.bf16 %v1198_v53, %v1166_v20  ;;  %v3167_v25 = vpop.eup %3166  ;;  %v5415_v53 = vld [vmem:[#allocation34_spill] sm:$0xff]  ;;  %3180 = vrsqrt.f32 %v915_v47  ;;  %v917_v47 = vmax.f32 %v5420_v12, 1e-24 }
 0x180   : > { %2747 = vxpose.xlu1.b32.start [1/16] %v5406_v57, 128  ;;  %v3169_v27 = vpop.eup %3168  ;;  %v1200_v49 = vmul.f32 %v3167_v25, %v5415_v53  ;;  %3182 = vrsqrt.f32 %v948_v28 }
 0x181   : > { %v3171_v51 = vpop.eup %3170  ;;  %3184 = vrsqrt.f32 %v916_v24 }
 0x182   : > { %v4544_v31 = vpop.xlane.xlu1 %835  ;;  %2639 = vxpose.xlu0.b32.cont [3/16] %v2638_v11, 128  ;;  %v1167_v11 = vmul.f32 %v3165_v33, %v5413_v29  ;;  %v5417_v33 = vld [vmem:[#allocation17_spill] sm:$0xff]  ;;  %v3173_v10 = vpop.eup %3172  ;;  %3186 = vrsqrt.f32 %v949_v41  ;;  %v951_v41 = vmax.f32 %v4476_v22, 1e-24  ;;  %v952_v22 = vmax.f32 %v4474_v59, 1e-24 }
 0x183   : > { %v4546_v26 = vpop.xlane.xlu0 %771  ;;  %3188 = vrsqrt.f32 %v917_v47 }
 0x184   : > { %2749 = vxpose.xlu1.b32.cont [2/16] %v5410_v58, 128  ;;  %v2642_v46 = vpack.i.bf16 %v1199_v17, %v1167_v11  ;;  %v1201_v17 = vmul.f32 %v3171_v51, %v5419_v45  ;;  %v3175_v25 = vpop.eup %3174  ;;  %v5424_v51 = vld [vmem:[#allocation94_spill] sm:$0xff]  ;;  %3190 = vrsqrt.f32 %v950_v43 }
 0x185   : > { %v918_v30 = vmax.f32 %v5424_v51, 1e-24  ;;  %v5431_v43 = vld [vmem:[#allocation38_spill] sm:$0xff] }
 0x186   : > { %v4556_v57 = vpop.xlane.xlu1 %869  ;;  %2641 = vxpose.xlu0.b32.cont [4/16] %v2640_v21, 128  ;;  %v1168_v21 = vmul.f32 %v3169_v27, %v5417_v33  ;;  %v5421_v27 = vld [vmem:[#allocation20_spill] sm:$0xff] }
 0x187   : > { %v4558_v15 = vpop.xlane.xlu0 %805  ;;  %v1169_v28 = vmul.f32 %v3173_v10, %v5421_v27  ;;  %3192 = vrsqrt.f32 %v918_v30  ;;  %v5429_v27 = vld [vmem:[#allocation22_spill] sm:$0xff]  ;;  %v5433_v30 = vld [vmem:[#allocation21_spill] sm:$0xff] }
 0x188   : > { %2751 = vxpose.xlu1.b32.cont [3/16] %v5414_v37, 128  ;;  %v2644_v50 = vpack.i.bf16 %v1200_v49, %v1168_v21  ;;  %v3177_v37 = vpop.eup %3176  ;;  %v5425_v21 = vld [vmem:[#allocation19_spill] sm:$0xff]  ;;  %3194 = vrsqrt.f32 %v951_v41 }
 0x189   : > { %v2646_v42 = vpack.i.bf16 %v1201_v17, %v1169_v28  ;;  %v3179_v49 = vpop.eup %3178  ;;  %v1170_v10 = vmul.f32 %v3177_v37, %v5425_v21  ;;  %v5428_v17 = vld [vmem:[#allocation99_spill] sm:$0xff] }
 0x18a   : > { %v4567_v20 = vpop.xlane.xlu1 %837  ;;  %2643 = vxpose.xlu0.b32.cont [5/16] %v2642_v46, 128  ;;  %v5423_v46 = vld [vmem:[#allocation36_spill] sm:$0xff]  ;;  %v3181_v55 = vpop.eup %3180 }
 0x18b   : > { %v4569_v58 = vpop.xlane.xlu0 %773  ;;  %v1202_v53 = vmul.f32 %v3175_v25, %v5423_v46  ;;  %v3183_v45 = vpop.eup %3182  ;;  %v919_v25 = vmax.f32 %v5428_v17, 1e-24  ;;  %v1171_v28 = vmul.f32 %v3181_v55, %v5429_v27  ;;  %v5432_v46 = vld [vmem:[#allocation98_spill] sm:$0xff]  ;;  %v5435_v55 = vld [vmem:[#allocation41_spill] sm:$0xff] }
 0x18c   : > { %2753 = vxpose.xlu1.b32.cont [4/16] %v5418_v5, 128  ;;  %v5427_v5 = vld [vmem:[#allocation39_spill] sm:$0xff]  ;;  %v3185_v37 = vpop.eup %3184 }
 0x18d   : > { %v2648_v44 = vpack.i.bf16 %v1202_v53, %v1170_v10  ;;  %v920_v53 = vmax.f32 %v5432_v46, 1e-24  ;;  %3196 = vrsqrt.f32 %v919_v25  ;;  %v1172_v21 = vmul.f32 %v3185_v37, %v5433_v30  ;;  %v5437_v25 = vld [vmem:[#allocation24_spill] sm:$0xff] }
 0x18e   : > { %v4578_v29 = vpop.xlane.xlu1 %871  ;;  %2645 = vxpose.xlu0.b32.cont [6/16] %v2644_v50, 128  ;;  %v1203_v50 = vmul.f32 %v3179_v49, %v5427_v5  ;;  %3198 = vrsqrt.f32 %v952_v22  ;;  %v953_v10 = vmax.f32 %v4480_v39, 1e-24  ;;  %v5440_v22 = vld [vmem:[#allocation40_spill] sm:$0xff]  ;;  %v971_v30 = vmax.f32 %v4488_v40, 1e-24  ;;  %v5444_v40 = vld [vmem:[#allocation26_spill] sm:$0xff] }
 0x18f   : > { %v4580_v11 = vpop.xlane.xlu0 %807  ;;  %3200 = vrsqrt.f32 %v920_v53 }
 0x190   : > { %2755 = vxpose.xlu1.b32.cont [5/16] %v5422_v19, 128  ;;  %v2650_v35 = vpack.i.bf16 %v1203_v50, %v1171_v28  ;;  %v1204_v19 = vmul.f32 %v3183_v45, %v5431_v43  ;;  %v954_v50 = vmax.f32 %v4478_v9, 1e-24  ;;  %3202 = vrsqrt.f32 %v953_v10 }
 0x191   : > { %v5439_v28 = vpack.i.bf16 %v4374_v23, %v4371_v16  ;;  %v1003_v9 = vmax.f32 %v4486_v54, 1e-24  ;;  %v5442_v16 = vpack.i.bf16 %v4366_v2, %v4363_v62  ;;  %v956_v54 = vmax.f32 %v4482_v36, 1e-24 }
 0x192   : > { %v4589_v24 = vpop.xlane.xlu1 %839  ;;  %2647 = vxpose.xlu0.b32.cont [7/16] %v2646_v42, 128  ;;  %v3187_v42 = vpop.eup %3186  ;;  %v2652_v13 = vpack.i.bf16 %v1204_v19, %v1172_v21  ;;  %v5443_v21 = vld [vmem:[#allocation43_spill] sm:$0xff]  ;;  %v955_v62 = vmax.f32 %v4484_v32, 1e-24  ;;  %v972_v2 = vmax.f32 %v4492_v4, 1e-24  ;;  %v5447_v4 = vld [vmem:[#allocation25_spill] sm:$0xff] }
 0x193   : > { %v4591_v33 = vpop.xlane.xlu0 %775  ;;  %v3189_v59 = vpop.eup %3188  ;;  %v1205_v41 = vmul.f32 %v3187_v42, %v5435_v55  ;;  %v5441_v42 = vld [vmem:[#allocation23_spill] sm:$0xff] }
 0x194   : > { %2757 = vxpose.xlu1.b32.cont [6/16] %v5426_v38, 128  ;;  %v3191_v38 = vpop.eup %3190  ;;  %v1173_v39 = vmul.f32 %v3189_v59, %v5437_v25  ;;  %v987_v25 = vmax.f32 %v4494_v34, 1e-24  ;;  %v5448_v34 = vld [vmem:[#allocation123_spill] sm:$0xff] }
 0x195   : > { %v3193_v27 = vpop.eup %3192 }
 0x196   : > { %v4600_v12 = vpop.xlane.xlu1 %873  ;;  %2649 = vxpose.xlu0.b32.cont [8/16] %v2648_v44, 128  ;;  %v5436_v44 = vld [vmem:[#allocation103_spill] sm:$0xff]  ;;  %v2654_v37 = vpack.i.bf16 %v1205_v41, %v1173_v39  ;;  %v1174_v46 = vmul.f32 %v3193_v27, %v5441_v42  ;;  %v1005_v39 = vmax.f32 %v4504_v7, 1e-24 }
 0x197   : > { %v4602_v47 = vpop.xlane.xlu0 %809  ;;  %v921_v5 = vmax.f32 %v5436_v44, 1e-24  ;;  %v5445_v44 = vpack.i.bf16 %v4404_v56, %v4401_v48  ;;  %v973_v48 = vmax.f32 %v4506_v63, 1e-24 }
 0x198   : > { %2759 = vxpose.xlu1.b32.cont [7/16] %v5430_v14, 128  ;;  %v1206_v14 = vmul.f32 %v3191_v38, %v5440_v22  ;;  %v5450_v22 = vld [vmem:[#allocation45_spill] sm:$0xff] }
 0x199   : > { %3204 = vrsqrt.f32 %v921_v5  ;;  %v5446_v5 = vld [vmem:[#allocation42_spill] sm:$0xff] }
 0x19a   : > { %v4611_v49 = vpop.xlane.xlu1 %841  ;;  %2651 = vxpose.xlu0.b32.cont [9/16] %v2650_v35, 128  ;;  %v3195_v35 = vpop.eup %3194  ;;  %3206 = vrsqrt.f32 %v954_v50  ;;  %v2656_v23 = vpack.i.bf16 %v1206_v14, %v1174_v46  ;;  %v5452_v46 = vld [vmem:[#allocation78_spill] sm:$0xff] }
 0x19b   : > { %v4613_v51 = vpop.xlane.xlu0 %777  ;;  %v3197_v53 = vpop.eup %3196  ;;  %3208 = vrsqrt.f32 %v922_v1  ;;  %v1207_v59 = vmul.f32 %v3195_v35, %v5443_v21  ;;  %v5451_v35 = vld [vmem:[#allocation79_spill] sm:$0xff]  ;;  %v5455_v21 = vld [vmem:[#allocation44_spill] sm:$0xff] }
 0x19c   : > { %2761 = vxpose.xlu1.b32.cont [8/16] %v5434_v60, 128  ;;  %v3199_v10 = vpop.eup %3198  ;;  %3210 = vrsqrt.f32 %v1003_v9  ;;  %v1004_v60 = vmax.f32 %v4500_v18, 1e-24  ;;  %v1175_v41 = vmul.f32 %v3197_v53, %v5444_v40  ;;  %v1006_v9 = vmax.f32 %v5451_v35, 1e-24  ;;  %v5457_v40 = vld [vmem:[#allocation130_spill] sm:$0xff] }
 0x19d   : > { %v3201_v38 = vpop.eup %3200  ;;  %3212 = vrsqrt.f32 %v971_v30  ;;  %v1208_v18 = vmul.f32 %v3199_v10, %v5446_v5  ;;  %v974_v53 = vmax.f32 %v5452_v46, 1e-24  ;;  %v1008_v35 = vmax.f32 %v4556_v57, 1e-24  ;;  %v5468_v57 = vld [vmem:[#allocation29_spill] sm:$0xff] }
 0x19e   : > { %v4623_v45 = vpop.xlane.xlu1 %875  ;;  %2653 = vxpose.xlu0.b32.cont [10/16] %v2652_v13, 128  ;;  %v2658_v36 = vpack.i.bf16 %v1207_v59, %v1175_v41  ;;  %v3203_v50 = vpop.eup %3202  ;;  %3214 = vrsqrt.f32 %v956_v54  ;;  %v1176_v6 = vmul.f32 %v3201_v38, %v5447_v4  ;;  %v5456_v54 = vld [vmem:[#allocation74_spill] sm:$0xff]  ;;  %v5458_v41 = vld [vmem:[#allocation129_spill] sm:$0xff]  ;;  %v975_v4 = vmax.f32 %v4535_v3, 1e-24 }
 0x19f   : > { %v4625_v17 = vpop.xlane.xlu0 %811  ;;  %3216 = vrsqrt.f32 %v1004_v60  ;;  %v1209_v14 = vmul.f32 %v3203_v50, %v5450_v22  ;;  %v957_v60 = vmax.f32 %v5456_v54, 1e-24  ;;  %v5459_v38 = vpack.i.bf16 %v5457_v40, %v5458_v41  ;;  %v5471_v40 = vld [vmem:[#allocation50_spill] sm:$0xff] }
 0x1a0   : > { %2763 = vxpose.xlu1.b32.cont [9/16] %v5439_v28, 128  ;;  %3218 = vrsqrt.f32 %v955_v62  ;;  %v988_v28 = vmax.f32 %v4498_v8, 1e-24  ;;  %v2660_v7 = vpack.i.bf16 %v1208_v18, %v1176_v6  ;;  %v5453_v8 = vld [vmem:[#allocation28_spill] sm:$0xff]  ;;  %v1007_v18 = vmax.f32 %v4533_v61, 1e-24  ;;  %v5465_v61 = vld [vmem:[#allocation49_spill] sm:$0xff] }
 0x1a1   : > { %3220 = vrsqrt.f32 %v972_v2  ;;  %v976_v3 = vmax.f32 %v4558_v15, 1e-24 }
 0x1a2   : > { %v4634_v43 = vpop.xlane.xlu1 %843  ;;  %2655 = vxpose.xlu0.b32.cont [11/16] %v2654_v37, 128  ;;  %v5449_v37 = vpack.i.bf16 %v4393_v52, %v5448_v34  ;;  %3222 = vrsqrt.f32 %v987_v25  ;;  %v5454_v52 = vld [vmem:[#allocation75_spill] sm:$0xff] }
 0x1a3   : > { %v4636_v19 = vpop.xlane.xlu0 %779  ;;  %v3205_v1 = vpop.eup %3204  ;;  %3224 = vrsqrt.f32 %v1005_v39 }
 0x1a4   : > { %2765 = vxpose.xlu1.b32.cont [10/16] %v5442_v16, 128  ;;  %v3207_v56 = vpop.eup %3206  ;;  %v1177_v16 = vmul.f32 %v3205_v1, %v5453_v8  ;;  %3226 = vrsqrt.f32 %v973_v48  ;;  %v5461_v48 = vld [vmem:[#allocation31_spill] sm:$0xff]  ;;  %v991_v8 = vmax.f32 %v4544_v31, 1e-24  ;;  %v1009_v31 = vmax.f32 %v4578_v29, 1e-24 }
 0x1a5   : > { %v3209_v42 = vpop.eup %3208  ;;  %v1210_v59 = vmul.f32 %v3207_v56, %v5455_v21  ;;  %3228 = vrsqrt.f32 %v988_v28  ;;  %v5462_v56 = vld [vmem:[#allocation127_spill] sm:$0xff]  ;;  %v5463_v28 = vld [vmem:[#allocation126_spill] sm:$0xff]  ;;  %v959_v21 = vmax.f32 %v4546_v26, 1e-24 }
 0x1a6   : > { %v4646_v13 = vpop.xlane.xlu1 %877  ;;  %2657 = vxpose.xlu0.b32.cont [12/16] %v2656_v23, 128  ;;  %v989_v23 = vmax.f32 %v5454_v52, 1e-24  ;;  %v3211_v10 = vpop.eup %3210  ;;  %v2662_v62 = vpack.i.bf16 %v1209_v14, %v1177_v16  ;;  %3230 = vrsqrt.f32 %v1006_v9  ;;  %v5464_v34 = vpack.i.bf16 %v5462_v56, %v5463_v28  ;;  %v5467_v16 = vld [vmem:[#allocation53_spill] sm:$0xff]  ;;  %v5472_v26 = vld [vmem:[#allocation51_spill] sm:$0xff] }
 0x1a7   : > { %v4648_v55 = vpop.xlane.xlu0 %813  ;;  %v3213_v2 = vpop.eup %3212  ;;  %3232 = vrsqrt.f32 %v974_v53  ;;  %v5475_v29 = vld [vmem:[#allocation131_spill] sm:$0xff] }
 0x1a8   : > { %2767 = vxpose.xlu1.b32.cont [11/16] %v5445_v44, 128  ;;  %v990_v44 = vmax.f32 %v4525_v0, 1e-24  ;;  %v4690_v39 = vpop.eup %3214  ;;  %3234 = vrsqrt.f32 %v989_v23  ;;  %v958_v0 = vmax.f32 %v5461_v48, 1e-24  ;;  %v5474_v48 = vld [vmem:[#allocation132_spill] sm:$0xff]  ;;  %v5477_v56 = vld [vmem:[#allocation55_spill] sm:$0xff] }
 0x1a9   : > { %v3217_v1 = vpop.eup %3216  ;;  %3236 = vrsqrt.f32 %v957_v60  ;;  %v992_v60 = vmax.f32 %v4567_v20, 1e-24 }
 0x1aa   : > { %v4659_v27 = vpop.xlane.xlu1 %845  ;;  %2659 = vxpose.xlu0.b32.cont [13/16] %v2658_v36, 128  ;;  %v5460_v36 = vld [vmem:[#allocation27_spill] sm:$0xff]  ;;  %v3219_v14 = vpop.eup %3218  ;;  %3238 = vrsqrt.f32 %v990_v44  ;;  %v1260_v52 = vmul.f32 %v3217_v1, %v5467_v16  ;;  %v960_v1 = vmax.f32 %v4569_v58, 1e-24 }
 0x1ab   : > { %v4661_v32 = vpop.xlane.xlu0 %781  ;;  %v1178_v5 = vmul.f32 %v3209_v42, %v5460_v36  ;;  %v3221_v9 = vpop.eup %3220  ;;  %3240 = vrsqrt.f32 %v1007_v18  ;;  %v5480_v16 = vld [vmem:[#allocation59_spill] sm:$0xff] }
 0x1ac   : > { %2769 = vxpose.xlu1.b32.cont [12/16] %v5449_v37, 128  ;;  %v1227_v37 = vmul.f32 %v3213_v2, %v5465_v61  ;;  %v3223_v53 = vpop.eup %3222  ;;  %3242 = vrsqrt.f32 %v975_v4  ;;  %v1228_v41 = vmul.f32 %v3221_v9, %v5471_v40  ;;  %v5473_v4 = vld [vmem:[#allocation47_spill] sm:$0xff]  ;;  %v5479_v9 = vld [vmem:[#allocation52_spill] sm:$0xff] }
 0x1ad   : > { %v2664_v6 = vpack.i.bf16 %v1210_v59, %v1178_v5  ;;  %v3225_v23 = vpop.eup %3224  ;;  %3244 = vrsqrt.f32 %v958_v0  ;;  %v5469_v59 = vld [vmem:[#allocation12_spill] sm:$0xff]  ;;  %v1243_v44 = vmul.f32 %v3223_v53, %v5472_v26  ;;  %v977_v5 = vmax.f32 %v4580_v11, 1e-24 }
 0x1ae   : > { %v4672_v30 = vpop.xlane.xlu1 %879  ;;  %2661 = vxpose.xlu0.b32.cont [14/16] %v2660_v7, 128  ;;  %v5466_v7 = vld [vmem:[#allocation48_spill] sm:$0xff]  ;;  %v3227_v54 = vpop.eup %3226  ;;  %3246 = vrsqrt.f32 %v1008_v35  ;;  %v2860_v18 = vpack.i.bf16 %v1260_v52, %v1228_v41  ;;  %v1211_v20 = vmul.f32 %v3219_v14, %v5473_v4  ;;  %v5476_v0 = vpack.i.bf16 %v5474_v48, %v5475_v29  ;;  %v5485_v4 = vld [vmem:[#allocation63_spill] sm:$0xff] }
 0x1af   : > { %v4674_v63 = vpop.xlane.xlu0 %815  ;;  %v1259_v22 = vmul.f32 %v3211_v10, %v5466_v7  ;;  %v5470_v10 = vpack.i.bf16 %v5468_v57, %v5469_v59  ;;  %3248 = vrsqrt.f32 %v976_v3  ;;  %v1229_v28 = vmul.f32 %v3227_v54, %v5477_v56  ;;  %v5482_v59 = vld [vmem:[#allocation46_spill] sm:$0xff] }
 0x1b0   : > { %2771 = vxpose.xlu1.b32.cont [13/16] %v5459_v38, 128  ;;  %v3229_v38 = vpop.eup %3228  ;;  %3250 = vrsqrt.f32 %v991_v8  ;;  %v1010_v7 = vmax.f32 %v4600_v12, 1e-24  ;;  %v2970_v35 = vpack.i.bf16 %v1243_v44, %v1211_v20  ;;  %v993_v8 = vmax.f32 %v4589_v24, 1e-24  ;;  %v5484_v24 = vld [vmem:[#allocation56_spill] sm:$0xff] }
 0x1b1   : > { %v2858_v15 = vpack.i.bf16 %v1259_v22, %v1227_v37  ;;  %v3231_v36 = vpop.eup %3230  ;;  %3252 = vrsqrt.f32 %v959_v21  ;;  %v978_v22 = vmax.f32 %v4602_v47, 1e-24  ;;  %v1244_v3 = vmul.f32 %v3229_v38, %v5479_v9 }
 0x1b2   : > { %v4686_v50 = vpop.xlane.xlu1 %847  ;;  %2663 = vxpose.xlu0.b32.cont [15/16] %v2662_v62, 128  ;;  %3254 = vrsqrt.f32 %v992_v60  ;;  %v961_v47 = vmax.f32 %v4591_v33, 1e-24  ;;  %v994_v54 = vmax.f32 %v4611_v49, 1e-24  ;;  %v5483_v60 = vld [vmem:[#allocation57_spill] sm:$0xff] }
 0x1b3   : > { %v4688_v25 = vpop.xlane.xlu0 %783  ;;  %3256 = vrsqrt.f32 %v1009_v31  ;;  %v1011_v31 = vmax.f32 %v4623_v45, 1e-24  ;;  %v1012_v48 = vmax.f32 %v4646_v13, 1e-24  ;;  %v995_v13 = vmax.f32 %v4634_v43, 1e-24 }
 0x1b4   : > { %2773 = vxpose.xlu1.b32.cont [14/16] %v5464_v34, 128  ;;  %v5478_v34 = vld [vmem:[#allocation54_spill] sm:$0xff]  ;;  %3258 = vrsqrt.f32 %v977_v5 }
 0x1b5   : > { %v1261_v61 = vmul.f32 %v3225_v23, %v5478_v34  ;;  %v5481_v23 = vld [vmem:[#allocation58_spill] sm:$0xff]  ;;  %3260 = vrsqrt.f32 %v960_v1 }
 0x1b6   : > { %v4701_v42 = vpop.xlane.xlu1 %881  ;;  %2665 = vxpose.xlu0.b32.end [16/16] %v2664_v6, 128  ;;  %v3233_v6 = vpop.eup %3232  ;;  %v1262_v12 = vmul.f32 %v3231_v36, %v5481_v23  ;;  %3262 = vrsqrt.f32 %v1010_v7  ;;  %v5489_v7 = vld [vmem:[#allocation66_spill] sm:$0xff]  ;;  %v5491_v23 = vld [vmem:[#allocation65_spill] sm:$0xff] }
 0x1b7   : > { %v4703_v46 = vpop.xlane.xlu0 %817  ;;  %v3235_v37 = vpop.eup %3234  ;;  %v1230_v52 = vmul.f32 %v3233_v6, %v5480_v16  ;;  %v2862_v57 = vpack.i.bf16 %v1261_v61, %v1229_v28  ;;  %3264 = vrsqrt.f32 %v978_v22  ;;  %v5486_v6 = vld [vmem:[#allocation62_spill] sm:$0xff]  ;;  %v5488_v61 = vld [vmem:[#allocation61_spill] sm:$0xff] }
 0x1b8   : > { %2775 = vxpose.xlu1.b32.cont [15/16] %v5470_v10, 128  ;;  %v3237_v11 = vpop.eup %3236  ;;  %v1212_v10 = vmul.f32 %v4690_v39, %v5482_v59  ;;  %v1245_v41 = vmul.f32 %v3235_v37, %v5484_v24  ;;  %3266 = vrsqrt.f32 %v993_v8  ;;  %v979_v39 = vmax.f32 %v4625_v17, 1e-24  ;;  %v5493_v24 = vld [vmem:[#allocation71_spill] sm:$0xff] }
 0x1b9   : > { %v3239_v53 = vpop.eup %3238  ;;  %v1213_v40 = vmul.f32 %v3237_v11, %v5483_v60  ;;  %v2864_v5 = vpack.i.bf16 %v1262_v12, %v1230_v52  ;;  %3268 = vrsqrt.f32 %v961_v47  ;;  %v980_v17 = vmax.f32 %v4648_v55, 1e-24 }
 0x1ba   : > { %v4714_v62 = vpop.xlane.xlu1 %849  ;;  %2859 = vxpose.xlu0.b32.start [1/16] %v2858_v15, 128  ;;  %v3241_v21 = vpop.eup %3240  ;;  %v2972_v44 = vpack.i.bf16 %v1244_v3, %v1212_v10  ;;  %3270 = vrsqrt.f32 %v994_v54  ;;  %v3487_v8 = vmov 0   ;;  %v996_v52 = vmax.f32 %v4659_v27, 1e-24 }
 0x1bb   : > { %v4716_v2 = vpop.xlane.xlu0 %785  ;;  %v3243_v15 = vpop.eup %3242  ;;  %v1263_v45 = vmul.f32 %v3241_v21, %v5486_v6  ;;  %v2974_v29 = vpack.i.bf16 %v1245_v41, %v1213_v40  ;;  %3272 = vrsqrt.f32 %v1011_v31  ;;  %1756 = vmatprep.mubr.bf16.mxu0 %v3487_v8  ;;  %v5492_v21 = vld [vmem:[#allocation64_spill] sm:$0xff]  ;;  %1797 = vmatprep.mubr.bf16.mxu1 %v3487_v8  ;;  %v981_v27 = vmax.f32 %v4674_v63, 1e-24  ;;  %v5495_v63 = vld [vmem:[#allocation69_spill] sm:$0xff] }
 0x1bc   : > { %2777 = vxpose.xlu1.b32.end [16/16] %v5476_v0, 128  ;;  %v3245_v38 = vpop.eup %3244  ;;  %v1231_v20 = vmul.f32 %v3243_v15, %v5485_v4  ;;  %v5487_v0 = vld [vmem:[#allocation60_spill] sm:$0xff]  ;;  %3274 = vrsqrt.f32 %v979_v39  ;;  %v964_v40 = vmax.f32 %v4661_v32, 1e-24  ;;  %v5497_v6 = vld [vmem:[#allocation77_spill] sm:$0xff] }
 0x1bd   : > { %v3247_v36 = vpop.eup %3246  ;;  %v1246_v56 = vmul.f32 %v3239_v53, %v5487_v0  ;;  %v1214_v37 = vmul.f32 %v3245_v38, %v5488_v61  ;;  %v963_v53 = vmax.f32 %v4636_v19, 1e-24  ;;  %v5494_v38 = vld [vmem:[#allocation70_spill] sm:$0xff] }
 0x1be   : > { %v4729_v14 = vpop.xlane.xlu1 %883  ;;  %2861 = vxpose.xlu0.b32.cont [2/16] %v2860_v18, 128  ;;  %v3249_v49 = vpop.eup %3248  ;;  %v962_v18 = vmax.f32 %v4613_v51, 1e-24  ;;  %v1264_v11 = vmul.f32 %v3247_v36, %v5489_v7  ;;  %v2866_v55 = vpack.i.bf16 %v1263_v45, %v1231_v20 }
 0x1bf   : > { %v4731_v58 = vpop.xlane.xlu0 %819  ;;  %v3251_v1 = vpop.eup %3250  ;;  %v2976_v10 = vpack.i.bf16 %v1246_v56, %v1214_v37  ;;  %v5500_v37 = vld [vmem:[#allocation72_spill] sm:$0xff] }
 0x1c0   : > { %2971 = vxpose.xlu1.b32.start [1/16] %v2970_v35, 128  ;;  %v3253_v28 = vpop.eup %3252  ;;  %v5490_v35 = vld [vmem:[#allocation67_spill] sm:$0xff]  ;;  %3276 = vrsqrt.f32 %v962_v18  ;;  %v1247_v47 = vmul.f32 %v3251_v1, %v5492_v21  ;;  %v5496_v18 = vld [vmem:[#allocation68_spill] sm:$0xff] }
 0x1c1   : > { %v3255_v22 = vpop.eup %3254  ;;  %v1232_v9 = vmul.f32 %v3249_v49, %v5490_v35  ;;  %3278 = vrsqrt.f32 %v1012_v48  ;;  %v1215_v12 = vmul.f32 %v3253_v28, %v5491_v23  ;;  %v5498_v1 = vld [vmem:[#allocation76_spill] sm:$0xff]  ;;  %v965_v28 = vmax.f32 %v4688_v25, 1e-24  ;;  %v5501_v25 = vld [vmem:[#allocation85_spill] sm:$0xff] }
 0x1c2   : > { %v4744_v26 = vpop.xlane.xlu1 %851  ;;  %2863 = vxpose.xlu0.b32.cont [3/16] %v2862_v57, 128  ;;  %v3257_v3 = vpop.eup %3256  ;;  %3280 = vrsqrt.f32 %v980_v17  ;;  %v1013_v57 = vmax.f32 %v4672_v30, 1e-24  ;;  %v1248_v4 = vmul.f32 %v3255_v22, %v5496_v18  ;;  %v5499_v17 = vld [vmem:[#allocation73_spill] sm:$0xff]  ;;  %v1015_v22 = vmax.f32 %v4729_v14, 1e-24 }
 0x1c3   : > { %v4746_v33 = vpop.xlane.xlu0 %787  ;;  %v3259_v16 = vpop.eup %3258  ;;  %3282 = vrsqrt.f32 %v995_v13  ;;  %v2868_v54 = vpack.i.bf16 %v1264_v11, %v1232_v9  ;;  %v1265_v30 = vmul.f32 %v3257_v3, %v5494_v38  ;;  %v2978_v36 = vpack.i.bf16 %v1247_v47, %v1215_v12 }
 0x1c4   : > { %2973 = vxpose.xlu1.b32.cont [2/16] %v2972_v44, 128  ;;  %v3261_v43 = vpop.eup %3260  ;;  %3284 = vrsqrt.f32 %v963_v53  ;;  %v1233_v41 = vmul.f32 %v3259_v16, %v5493_v24  ;;  %v1014_v44 = vmax.f32 %v4701_v42, 1e-24  ;;  %v997_v42 = vmax.f32 %v4686_v50, 1e-24  ;;  %v5502_v16 = vld [vmem:[#allocation84_spill] sm:$0xff] }
 0x1c5   : > { %v3263_v15 = vpop.eup %3262  ;;  %3286 = vrsqrt.f32 %v996_v52  ;;  %v1216_v49 = vmul.f32 %v3261_v43, %v5495_v63  ;;  %v983_v50 = vmax.f32 %v4731_v58, 1e-24  ;;  %v998_v53 = vmax.f32 %v4714_v62, 1e-24  ;;  %v5503_v62 = vld [vmem:[#allocation81_spill] sm:$0xff] }
 0x1c6   : > { %v4755_v34 = vpop.xlane.xlu1 %885  ;;  %2865 = vxpose.xlu0.b32.cont [4/16] %v2864_v5, 128  ;;  %v3265_v60 = vpop.eup %3264  ;;  %3288 = vrsqrt.f32 %v1013_v57  ;;  %v982_v5 = vmax.f32 %v4703_v46, 1e-24  ;;  %v1266_v48 = vmul.f32 %v3263_v15, %v5498_v1  ;;  %v2870_v46 = vpack.i.bf16 %v1265_v30, %v1233_v41  ;;  %v5509_v1 = vld [vmem:[#allocation101_spill] sm:$0xff] }
 0x1c7   : > { %v4757_v51 = vpop.xlane.xlu0 %821  ;;  %v3267_v31 = vpop.eup %3266  ;;  %3290 = vrsqrt.f32 %v981_v27  ;;  %v1234_v45 = vmul.f32 %v3265_v60, %v5497_v6  ;;  %v2980_v13 = vpack.i.bf16 %v1248_v4, %v1216_v49  ;;  %v966_v12 = vmax.f32 %v4716_v2, 1e-24  ;;  %v5505_v60 = vld [vmem:[#allocation93_spill] sm:$0xff] }
 0x1c8   : > { %2975 = vxpose.xlu1.b32.cont [3/16] %v2974_v29, 128  ;;  %v3269_v39 = vpop.eup %3268  ;;  %3292 = vrsqrt.f32 %v964_v40  ;;  %v1249_v7 = vmul.f32 %v3267_v31, %v5500_v37  ;;  %v1016_v58 = vmax.f32 %v4755_v34, 1e-24  ;;  %v5506_v40 = vld [vmem:[#allocation92_spill] sm:$0xff]  ;;  %v999_v38 = vmax.f32 %v4744_v26, 1e-24 }
 0x1c9   : > { %v3271_v32 = vpop.eup %3270  ;;  %3294 = vrsqrt.f32 %v1014_v44  ;;  %v1217_v61 = vmul.f32 %v3269_v39, %v5499_v17  ;;  %v2872_v9 = vpack.i.bf16 %v1266_v48, %v1234_v45  ;;  %v967_v31 = vmax.f32 %v4746_v33, 1e-24  ;;  %v5507_v44 = vld [vmem:[#allocation89_spill] sm:$0xff]  ;;  %v5508_v39 = vld [vmem:[#allocation88_spill] sm:$0xff] }
 0x1ca   : > { %v4770_v19 = vpop.xlane.xlu1 %853  ;;  %2867 = vxpose.xlu0.b32.cont [5/16] %v2866_v55, 128  ;;  %v3273_v29 = vpop.eup %3272  ;;  %3296 = vrsqrt.f32 %v982_v5 }
 0x1cb   : > { %v4772_v59 = vpop.xlane.xlu0 %789  ;;  %v3275_v56 = vpop.eup %3274  ;;  %3298 = vrsqrt.f32 %v997_v42  ;;  %v1267_v52 = vmul.f32 %v3273_v29, %v5502_v16  ;;  %v2982_v21 = vpack.i.bf16 %v1249_v7, %v1217_v61  ;;  %v1000_v33 = vmax.f32 %v4770_v19, 1e-24  ;;  %v5510_v29 = vld [vmem:[#allocation100_spill] sm:$0xff] }
 0x1cc   : > { %2977 = vxpose.xlu1.b32.cont [4/16] %v2976_v10, 128  ;;  %v3277_v11 = vpop.eup %3276  ;;  %v1235_v55 = vmul.f32 %v3275_v56, %v5501_v25  ;;  %3300 = vrsqrt.f32 %v965_v28  ;;  %v5504_v10 = vld [vmem:[#allocation80_spill] sm:$0xff] }
 0x1cd   : > { %v3279_v35 = vpop.eup %3278  ;;  %3302 = vrsqrt.f32 %v1015_v22  ;;  %v1218_v57 = vmul.f32 %v3277_v11, %v5503_v62  ;;  %v1250_v15 = vmul.f32 %v3271_v32, %v5504_v10  ;;  %v5512_v61 = vld [vmem:[#allocation96_spill] sm:$0xff]  ;;  %v5513_v11 = vld [vmem:[#allocation107_spill] sm:$0xff] }
 0x1ce   : > { %2869 = vxpose.xlu0.b32.cont [6/16] %v2868_v54, 128  ;;  %v4782_v20 = vpop.xlane.xlu1 %887  ;;  %v3281_v3 = vpop.eup %3280  ;;  %3304 = vrsqrt.f32 %v983_v50  ;;  %v984_v54 = vmax.f32 %v4757_v51, 1e-24  ;;  %v1268_v24 = vmul.f32 %v3279_v35, %v5506_v40  ;;  %v2874_v34 = vpack.i.bf16 %v1267_v52, %v1235_v55  ;;  %v5517_v10 = vld [vmem:[#allocation111_spill] sm:$0xff] }
 0x1cf   : > { %v4787_v0 = vpop.xlane.xlu0 %823  ;;  %v3283_v23 = vpop.eup %3282  ;;  %v1236_v2 = vmul.f32 %v3281_v3, %v5505_v60  ;;  %3306 = vrsqrt.f32 %v998_v53  ;;  %v1017_v51 = vmax.f32 %v4782_v20, 1e-24  ;;  %v2984_v49 = vpack.i.bf16 %v1250_v15, %v1218_v57 }
 0x1d0   : > { %2979 = vxpose.xlu1.b32.cont [5/16] %v2978_v36, 128  ;;  %v3285_v47 = vpop.eup %3284  ;;  %3308 = vrsqrt.f32 %v966_v12  ;;  %v1251_v5 = vmul.f32 %v3283_v23, %v5508_v39  ;;  %v985_v26 = vmax.f32 %v4787_v0, 1e-24  ;;  %v968_v20 = vmax.f32 %v4772_v59, 1e-24  ;;  %v5511_v0 = vld [vmem:[#allocation97_spill] sm:$0xff] }
 0x1d1   : > { %v3287_v27 = vpop.eup %3286  ;;  %v1219_v36 = vmul.f32 %v3285_v47, %v5507_v44  ;;  %3310 = vrsqrt.f32 %v1016_v58  ;;  %v2876_v32 = vpack.i.bf16 %v1268_v24, %v1236_v2  ;;  %v5515_v23 = vld [vmem:[#allocation105_spill] sm:$0xff] }
 0x1d2   : > { %2871 = vxpose.xlu0.b32.cont [7/16] %v2870_v46, 128  ;;  %v4798_v14 = vpop.xlane.xlu1 %855  ;;  %v3289_v41 = vpop.eup %3288  ;;  %3312 = vrsqrt.f32 %v984_v54  ;;  %v1252_v37 = vmul.f32 %v3287_v27, %v5512_v61  ;;  %v5519_v24 = vld [vmem:[#allocation109_spill] sm:$0xff]  ;;  %v5528_v61 = vld [vmem:[#allocation116_spill] sm:$0xff] }
 0x1d3   : > { %v4801_v43 = vpop.xlane.xlu0 %791  ;;  %v3291_v30 = vpop.eup %3290  ;;  %3314 = vrsqrt.f32 %v999_v38  ;;  %v1269_v42 = vmul.f32 %v3289_v41, %v5510_v29  ;;  %v2986_v46 = vpack.i.bf16 %v1251_v5, %v1219_v36  ;;  %v1001_v59 = vmax.f32 %v4798_v14, 1e-24  ;;  %v5520_v38 = vld [vmem:[#allocation108_spill] sm:$0xff]  ;;  %v5521_v36 = vld [vmem:[#allocation115_spill] sm:$0xff]  ;;  %v5522_v5 = vld [vmem:[#allocation114_spill] sm:$0xff] }
 0x1d4   : > { %2981 = vxpose.xlu1.b32.cont [6/16] %v2980_v13, 128  ;;  %v3293_v63 = vpop.eup %3292  ;;  %v1237_v48 = vmul.f32 %v3291_v30, %v5509_v1  ;;  %3316 = vrsqrt.f32 %v967_v31  ;;  %v5514_v13 = vld [vmem:[#allocation106_spill] sm:$0xff]  ;;  %v969_v53 = vmax.f32 %v4801_v43, 1e-24 }
 0x1d5   : > { %v3295_v18 = vpop.eup %3294  ;;  %3318 = vrsqrt.f32 %v1017_v51  ;;  %v1220_v17 = vmul.f32 %v3293_v63, %v5511_v0  ;;  %v5518_v43 = vld [vmem:[#allocation110_spill] sm:$0xff]  ;;  %v5527_v0 = vld [vmem:[#allocation117_spill] sm:$0xff] }
 0x1d6   : > { %2873 = vxpose.xlu0.b32.cont [8/16] %v2872_v9, 128  ;;  %v890_v4 = vpop.xlane.xlu1 %889  ;;  %v3297_v6 = vpop.eup %3296  ;;  %3320 = vrsqrt.f32 %v985_v26  ;;  %v1270_v35 = vmul.f32 %v3295_v18, %v5514_v13  ;;  %v2878_v9 = vpack.i.bf16 %v1269_v42, %v1237_v48  ;;  %v5523_v26 = vld [vmem:[#allocation113_spill] sm:$0xff]  ;;  %v5525_v48 = vld [vmem:[#allocation119_spill] sm:$0xff]  ;;  %v5526_v42 = vld [vmem:[#allocation118_spill] sm:$0xff] }
 0x1d7   : > { %v826_v45 = vpop.xlane.xlu0 %825  ;;  %v3299_v56 = vpop.eup %3298  ;;  %v1018_v28 = vmax.f32 %v890_v4, 1e-24  ;;  %v1238_v22 = vmul.f32 %v3297_v6, %v5513_v11  ;;  %3322 = vrsqrt.f32 %v1000_v33  ;;  %v2988_v52 = vpack.i.bf16 %v1252_v37, %v1220_v17  ;;  %v5529_v11 = vld [vmem:[#allocation124_spill] sm:$0xff]  ;;  %v5530_v13 = vld [vmem:[#allocation122_spill] sm:$0xff] }
 0x1d8   : > { %2983 = vxpose.xlu1.b32.cont [7/16] %v2982_v21, 128  ;;  %v3301_v7 = vpop.eup %3300  ;;  %v986_v19 = vmax.f32 %v826_v45, 1e-24  ;;  %3324 = vrsqrt.f32 %v968_v20  ;;  %v5516_v21 = vld [vmem:[#allocation104_spill] sm:$0xff] }
 0x1d9   : > { %v3303_v50 = vpop.eup %3302  ;;  %3326 = vrsqrt.f32 %v1018_v28  ;;  %v1221_v12 = vmul.f32 %v3301_v7, %v5515_v23  ;;  %v1253_v47 = vmul.f32 %v3299_v56, %v5516_v21  ;;  %v2880_v62 = vpack.i.bf16 %v1270_v35, %v1238_v22  ;;  %v5533_v23 = vld [vmem:[#allocation128_spill] sm:$0xff]  ;;  %v5534_v21 = vld [vmem:[#allocation125_spill] sm:$0xff] }
 0x1da   : > { %2875 = vxpose.xlu0.b32.cont [9/16] %v2874_v34, 128  ;;  %v3305_v3 = vpop.eup %3304  ;;  %v858_v25 = vpop.xlane.xlu1 %857  ;;  %3328 = vrsqrt.f32 %v986_v19  ;;  %v1271_v27 = vmul.f32 %v3303_v50, %v5518_v43 }
 0x1db   : > { %v3307_v55 = vpop.eup %3306  ;;  %v794_v16 = vpop.xlane.xlu0 %793  ;;  %3330 = vrsqrt.f32 %v1001_v59  ;;  %v1002_v57 = vmax.f32 %v858_v25, 1e-24  ;;  %v1239_v15 = vmul.f32 %v3305_v3, %v5517_v10  ;;  %v2990_v40 = vpack.i.bf16 %v1253_v47, %v1221_v12 }
 0x1dc   : > { %2985 = vxpose.xlu1.b32.cont [8/16] %v2984_v49, 128  ;;  %v3309_v58 = vpop.eup %3308  ;;  %3332 = vrsqrt.f32 %v969_v53  ;;  %v970_v60 = vmax.f32 %v794_v16, 1e-24  ;;  %v1254_v34 = vmul.f32 %v3307_v55, %v5520_v38  ;;  %v5532_v53 = vld [vmem:[#allocation120_spill] sm:$0xff] }
 0x1dd   : > { %v3311_v14 = vpop.eup %3310  ;;  %v1222_v41 = vmul.f32 %v3309_v58, %v5519_v24  ;;  %3334 = vrsqrt.f32 %v1002_v57  ;;  %v2882_v44 = vpack.i.bf16 %v1271_v27, %v1239_v15 }
 0x1de   : > { %2877 = vxpose.xlu0.b32.cont [10/16] %v2876_v32, 128  ;;  %v3313_v54 = vpop.eup %3312  ;;  %v1272_v63 = vmul.f32 %v3311_v14, %v5522_v5  ;;  %3336 = vrsqrt.f32 %v970_v60  ;;  %v5524_v32 = vld [vmem:[#allocation112_spill] sm:$0xff] }
 0x1df   : > { %v3315_v2 = vpop.eup %3314  ;;  %v1240_v39 = vmul.f32 %v3313_v54, %v5521_v36  ;;  %v2992_v18 = vpack.i.bf16 %v1254_v34, %v1222_v41 }
 0x1e0   : > { %2987 = vxpose.xlu1.b32.cont [9/16] %v2986_v46, 128  ;;  %v3317_v30 = vpop.eup %3316  ;;  %v1255_v6 = vmul.f32 %v3315_v2, %v5524_v32 }
 0x1e1   : > { %v3319_v31 = vpop.eup %3318  ;;  %v1223_v4 = vmul.f32 %v3317_v30, %v5523_v26  ;;  %v2884_v1 = vpack.i.bf16 %v1272_v63, %v1240_v39 }
 0x1e2   : > { %2879 = vxpose.xlu0.b32.cont [11/16] %v2878_v9, 128  ;;  %v3321_v51 = vpop.eup %3320  ;;  %v1273_v20 = vmul.f32 %v3319_v31, %v5526_v42  ;;  %v5531_v9 = vld [vmem:[#allocation121_spill] sm:$0xff] }
 0x1e3   : > { %v3323_v49 = vpop.eup %3322  ;;  %v1241_v29 = vmul.f32 %v3321_v51, %v5525_v48  ;;  %v2994_v28 = vpack.i.bf16 %v1255_v6, %v1223_v4 }
 0x1e4   : > { %2989 = vxpose.xlu1.b32.cont [10/16] %v2988_v52, 128  ;;  %v3325_v33 = vpop.eup %3324  ;;  %v1256_v37 = vmul.f32 %v3323_v49, %v5528_v61 }
 0x1e5   : > { %v3327_v45 = vpop.eup %3326  ;;  %v1224_v17 = vmul.f32 %v3325_v33, %v5527_v0  ;;  %v2886_v19 = vpack.i.bf16 %v1273_v20, %v1241_v29 }
 0x1e6   : > { %2881 = vxpose.xlu0.b32.cont [12/16] %v2880_v62, 128  ;;  %v3329_v46 = vpop.eup %3328  ;;  %v1274_v35 = vmul.f32 %v3327_v45, %v5530_v13 }
 0x1e7   : > { %v3331_v56 = vpop.eup %3330  ;;  %v1242_v22 = vmul.f32 %v3329_v46, %v5529_v11  ;;  %v2996_v59 = vpack.i.bf16 %v1256_v37, %v1224_v17 }
 0x1e8   : > { %2991 = vxpose.xlu1.b32.cont [11/16] %v2990_v40, 128  ;;  %v3333_v7 = vpop.eup %3332  ;;  %v1257_v25 = vmul.f32 %v3331_v56, %v5532_v53 }
 0x1e9   : > { %v3335_v50 = vpop.eup %3334  ;;  %v1225_v3 = vmul.f32 %v3333_v7, %v5531_v9  ;;  %v2888_v16 = vpack.i.bf16 %v1274_v35, %v1242_v22 }
 0x1ea   : > { %2883 = vxpose.xlu0.b32.cont [13/16] %v2882_v44, 128  ;;  %v3337_v55 = vpop.eup %3336  ;;  %v1258_v47 = vmul.f32 %v3335_v50, %v5534_v21 }
 0x1eb   : > { %v2998_v52 = vpack.i.bf16 %v1257_v25, %v1225_v3  ;;  %v1226_v12 = vmul.f32 %v3337_v55, %v5533_v23 }
 0x1ec   : > { %2993 = vxpose.xlu1.b32.cont [12/16] %v2992_v18, 128 }
 0x1ed   : > { %v3000_v62 = vpack.i.bf16 %v1258_v47, %v1226_v12 }
 0x1ee   : > { %2885 = vxpose.xlu0.b32.cont [14/16] %v2884_v1, 128 }
 0x1f0   : > { %2995 = vxpose.xlu1.b32.cont [13/16] %v2994_v28, 128 }
 0x1f2   : > { %2887 = vxpose.xlu0.b32.cont [15/16] %v2886_v19, 128 }
 0x1f4   : > { %2997 = vxpose.xlu1.b32.cont [14/16] %v2996_v59, 128 }
 0x1f6   : > { %2889 = vxpose.xlu0.b32.end [16/16] %v2888_v16, 128 }
 0x1f8   : > { %2999 = vxpose.xlu1.b32.cont [15/16] %v2998_v52, 128 }
 0x1fa   : > { %v2666_v58 = vpop.trf.xlu0 }
 0x1fb   : > { %v2667_v14 = vunpack.i.l.bf16 %v2666_v58  ;;  %v2670_v57 = vunpack.i.h.bf16 %v2666_v58 }
 0x1fc   : > { %3001 = vxpose.xlu1.b32.end [16/16] %v3000_v62, 128 }
 0x1fe   : > { %v2671_v10 = vpop.trf.xlu0 }
 0x1ff   : > { %v2672_v15 = vunpack.i.l.bf16 %v2671_v10  ;;  %v2675_v43 = vunpack.i.h.bf16 %v2671_v10 }
 0x200   : > { %v2778_v27 = vpop.trf.xlu1 }
 0x201   : > { %v1532_v54 = vpack.c.bf16 %v2672_v15, %v2667_v14  ;;  %v1534_v60 = vpack.c.bf16 %v2675_v43, %v2670_v57  ;;  %v2779_v31 = vunpack.i.l.bf16 %v2778_v27  ;;  %v2782_v44 = vunpack.i.h.bf16 %v2778_v27 }
 0x202   : > { %v2676_v2 = vpop.trf.xlu0 }
 0x203   : > { %1724 = vmatprep.subr.bf16.mxu0 %v1532_v54  ;;  %1765 = vmatprep.subr.bf16.mxu1 %v1534_v60  ;;  %v2680_v38 = vunpack.i.h.bf16 %v2676_v2  ;;  %v2677_v34 = vunpack.i.l.bf16 %v2676_v2 }
 0x204   : > { %v2783_v40 = vpop.trf.xlu1 }
 0x205   : > { %v2784_v24 = vunpack.i.l.bf16 %v2783_v40  ;;  %v2787_v41 = vunpack.i.h.bf16 %v2783_v40 }
 0x206   : > { %v2681_v30 = vpop.trf.xlu0 }
 0x207   : > { %v2685_v36 = vunpack.i.h.bf16 %v2681_v30  ;;  %v2682_v39 = vunpack.i.l.bf16 %v2681_v30  ;;  %v1531_v63 = vpack.c.bf16 %v2784_v24, %v2779_v31  ;;  %v1533_v51 = vpack.c.bf16 %v2787_v41, %v2782_v44 }
 0x208   : > { %v2788_v5 = vpop.trf.xlu1 }
 0x209   : > { %1725 = vmatpush1.bf16.msra.mxu0 %v1531_v63  ;;  %1766 = vmatpush1.bf16.msra.mxu1 %v1533_v51  ;;  %v1540_v18 = vpack.c.bf16 %v2682_v39, %v2677_v34  ;;  %v1542_v26 = vpack.c.bf16 %v2685_v36, %v2680_v38  ;;  %v2792_v33 = vunpack.i.h.bf16 %v2788_v5  ;;  %v2789_v45 = vunpack.i.l.bf16 %v2788_v5 }
 0x20a   : > { %v2686_v49 = vpop.trf.xlu0 }
 0x20b   : > { %1726 = vmatprep.subr.bf16.mxu0 %v1540_v18  ;;  %1767 = vmatprep.subr.bf16.mxu1 %v1542_v26  ;;  %v2690_v1 = vunpack.i.h.bf16 %v2686_v49  ;;  %v2687_v48 = vunpack.i.l.bf16 %v2686_v49 }
 0x20c   : > { %v2793_v4 = vpop.trf.xlu1 }
 0x20d   : > { %v2797_v32 = vunpack.i.h.bf16 %v2793_v4  ;;  %v2794_v6 = vunpack.i.l.bf16 %v2793_v4 }
 0x20e   : > { %v2691_v29 = vpop.trf.xlu0 }
 0x20f   : > { %v2695_v42 = vunpack.i.h.bf16 %v2691_v29  ;;  %v2692_v20 = vunpack.i.l.bf16 %v2691_v29  ;;  %v1539_v56 = vpack.c.bf16 %v2794_v6, %v2789_v45  ;;  %v1541_v28 = vpack.c.bf16 %v2797_v32, %v2792_v33 }
 0x210   : > { %v2798_v46 = vpop.trf.xlu1 }
 0x211   : > { %1727 = vmatpush1.bf16.msra.mxu0 %v1539_v56  ;;  %1768 = vmatpush1.bf16.msra.mxu1 %v1541_v28  ;;  %v1548_v17 = vpack.c.bf16 %v2692_v20, %v2687_v48  ;;  %v1550_v61 = vpack.c.bf16 %v2695_v42, %v2690_v1  ;;  %v2802_v11 = vunpack.i.h.bf16 %v2798_v46  ;;  %v2799_v22 = vunpack.i.l.bf16 %v2798_v46 }
 0x212   : > { %v2696_v0 = vpop.trf.xlu0 }
 0x213   : > { %1728 = vmatprep.subr.bf16.mxu0 %v1548_v17  ;;  %1769 = vmatprep.subr.bf16.mxu1 %v1550_v61  ;;  %v2700_v13 = vunpack.i.h.bf16 %v2696_v0  ;;  %v2697_v35 = vunpack.i.l.bf16 %v2696_v0 }
 0x214   : > { %v2803_v37 = vpop.trf.xlu1 }
 0x215   : > { %v2807_v7 = vunpack.i.h.bf16 %v2803_v37  ;;  %v2804_v19 = vunpack.i.l.bf16 %v2803_v37 }
 0x216   : > { %v2701_v50 = vpop.trf.xlu0 }
 0x217   : > { %v2705_v59 = vunpack.i.h.bf16 %v2701_v50  ;;  %v2702_v9 = vunpack.i.l.bf16 %v2701_v50  ;;  %v1547_v53 = vpack.c.bf16 %v2804_v19, %v2799_v22  ;;  %v1549_v25 = vpack.c.bf16 %v2807_v7, %v2802_v11 }
 0x218   : > { %v2808_v3 = vpop.trf.xlu1 }
 0x219   : > { %1729 = vmatpush1.bf16.msra.mxu0 %v1547_v53  ;;  %1770 = vmatpush1.bf16.msra.mxu1 %v1549_v25  ;;  %v1556_v16 = vpack.c.bf16 %v2702_v9, %v2697_v35  ;;  %v1558_v52 = vpack.c.bf16 %v2705_v59, %v2700_v13  ;;  %v2812_v47 = vunpack.i.h.bf16 %v2808_v3  ;;  %v2809_v58 = vunpack.i.l.bf16 %v2808_v3 }
 0x21a   : > { %v2706_v55 = vpop.trf.xlu0 }
 0x21b   : > { %1730 = vmatprep.subr.bf16.mxu0 %v1556_v16  ;;  %1771 = vmatprep.subr.bf16.mxu1 %v1558_v52  ;;  %v2710_v62 = vunpack.i.h.bf16 %v2706_v55  ;;  %v2707_v14 = vunpack.i.l.bf16 %v2706_v55 }
 0x21c   : > { %v2813_v23 = vpop.trf.xlu1 }
 0x21d   : > { %v2817_v12 = vunpack.i.h.bf16 %v2813_v23  ;;  %v2814_v21 = vunpack.i.l.bf16 %v2813_v23 }
 0x21e   : > { %v2711_v57 = vpop.trf.xlu0 }
 0x21f   : > { %v2715_v10 = vunpack.i.h.bf16 %v2711_v57  ;;  %v2712_v15 = vunpack.i.l.bf16 %v2711_v57  ;;  %v1555_v27 = vpack.c.bf16 %v2814_v21, %v2809_v58  ;;  %v1557_v54 = vpack.c.bf16 %v2817_v12, %v2812_v47 }
 0x220   : > { %v2818_v43 = vpop.trf.xlu1 }
 0x221   : > { %1731 = vmatpush1.bf16.msra.mxu0 %v1555_v27  ;;  %1772 = vmatpush1.bf16.msra.mxu1 %v1557_v54  ;;  %v1564_v2 = vpack.c.bf16 %v2712_v15, %v2707_v14  ;;  %v1566_v40 = vpack.c.bf16 %v2715_v10, %v2710_v62  ;;  %v2822_v34 = vunpack.i.h.bf16 %v2818_v43  ;;  %v2819_v30 = vunpack.i.l.bf16 %v2818_v43 }
 0x222   : > { %v2716_v60 = vpop.trf.xlu0 }
 0x223   : > { %1732 = vmatprep.subr.bf16.mxu0 %v1564_v2  ;;  %1773 = vmatprep.subr.bf16.mxu1 %v1566_v40  ;;  %v2720_v31 = vunpack.i.h.bf16 %v2716_v60  ;;  %v2717_v44 = vunpack.i.l.bf16 %v2716_v60 }
 0x224   : > { %v2823_v24 = vpop.trf.xlu1 }
 0x225   : > { %v2827_v41 = vunpack.i.h.bf16 %v2823_v24  ;;  %v2824_v38 = vunpack.i.l.bf16 %v2823_v24 }
 0x226   : > { %v2721_v36 = vpop.trf.xlu0 }
 0x227   : > { %v2725_v39 = vunpack.i.h.bf16 %v2721_v36  ;;  %v2722_v5 = vunpack.i.l.bf16 %v2721_v36  ;;  %v1563_v51 = vpack.c.bf16 %v2824_v38, %v2819_v30  ;;  %v1565_v49 = vpack.c.bf16 %v2827_v41, %v2822_v34  ;;  %v4847_v41 = vld [vmem:[%s5145_s1] sm:$0xf] }
 0x228   : > { %v2828_v63 = vpop.trf.xlu1 }
 0x229   : > { %1733 = vmatpush1.bf16.msra.mxu0 %v1563_v51  ;;  %1774 = vmatpush1.bf16.msra.mxu1 %v1565_v49  ;;  %v1572_v26 = vpack.c.bf16 %v2722_v5, %v2717_v44  ;;  %v1574_v4 = vpack.c.bf16 %v2725_v39, %v2720_v31  ;;  %v2832_v45 = vunpack.i.h.bf16 %v2828_v63  ;;  %v2829_v1 = vunpack.i.l.bf16 %v2828_v63 }
 0x22a   : > { %v2726_v18 = vpop.trf.xlu0 }
 0x22b   : > { %1734 = vmatprep.subr.bf16.mxu0 %v1572_v26  ;;  %1775 = vmatprep.subr.bf16.mxu1 %v1574_v4  ;;  %v2730_v48 = vunpack.i.h.bf16 %v2726_v18  ;;  %v2727_v29 = vunpack.i.l.bf16 %v2726_v18 }
 0x22c   : > { %v2833_v32 = vpop.trf.xlu1 }
 0x22d   : > { %v2837_v6 = vunpack.i.h.bf16 %v2833_v32  ;;  %v2834_v33 = vunpack.i.l.bf16 %v2833_v32 }
 0x22e   : > { %v2731_v42 = vpop.trf.xlu0 }
 0x22f   : > { %v2735_v20 = vunpack.i.h.bf16 %v2731_v42  ;;  %v2732_v46 = vunpack.i.l.bf16 %v2731_v42  ;;  %v1571_v28 = vpack.c.bf16 %v2834_v33, %v2829_v1  ;;  %v1573_v0 = vpack.c.bf16 %v2837_v6, %v2832_v45 }
 0x230   : > { %v2838_v56 = vpop.trf.xlu1 }
 0x231   : > { %1735 = vmatpush1.bf16.msra.mxu0 %v1571_v28  ;;  %1776 = vmatpush1.bf16.msra.mxu1 %v1573_v0  ;;  %v1580_v61 = vpack.c.bf16 %v2732_v46, %v2727_v29  ;;  %v1582_v37 = vpack.c.bf16 %v2735_v20, %v2730_v48  ;;  %v2842_v22 = vunpack.i.h.bf16 %v2838_v56  ;;  %v2839_v13 = vunpack.i.l.bf16 %v2838_v56 }
 0x232   : > { %v2736_v17 = vpop.trf.xlu0 }
 0x233   : > { %1736 = vmatprep.subr.bf16.mxu0 %v1580_v61  ;;  %1777 = vmatprep.subr.bf16.mxu1 %v1582_v37  ;;  %v2740_v35 = vunpack.i.h.bf16 %v2736_v17  ;;  %v2737_v50 = vunpack.i.l.bf16 %v2736_v17 }
 0x234   : > { %v2843_v7 = vpop.trf.xlu1 }
 0x235   : > { %v2847_v19 = vunpack.i.h.bf16 %v2843_v7  ;;  %v2844_v11 = vunpack.i.l.bf16 %v2843_v7 }
 0x236   : > { %v2741_v59 = vpop.trf.xlu0 }
 0x237   : > { %v2745_v9 = vunpack.i.h.bf16 %v2741_v59  ;;  %v2742_v3 = vunpack.i.l.bf16 %v2741_v59  ;;  %v1579_v25 = vpack.c.bf16 %v2844_v11, %v2839_v13  ;;  %v1581_v55 = vpack.c.bf16 %v2847_v19, %v2842_v22 }
 0x238   : > { %v2848_v53 = vpop.trf.xlu1 }
 0x239   : > { %1737 = vmatpush1.bf16.msra.mxu0 %v1579_v25  ;;  %1778 = vmatpush1.bf16.msra.mxu1 %v1581_v55  ;;  %v1588_v52 = vpack.c.bf16 %v2742_v3, %v2737_v50  ;;  %v1590_v23 = vpack.c.bf16 %v2745_v9, %v2740_v35  ;;  %v2852_v58 = vunpack.i.h.bf16 %v2848_v53  ;;  %v2849_v62 = vunpack.i.l.bf16 %v2848_v53 }
 0x23a   : > { %v2890_v16 = vpop.trf.xlu0 }
 0x23b   : > { %1738 = vmatprep.subr.bf16.mxu0 %v1588_v52  ;;  %1779 = vmatprep.subr.bf16.mxu1 %v1590_v23  ;;  %v2894_v14 = vunpack.i.h.bf16 %v2890_v16  ;;  %v2891_v57 = vunpack.i.l.bf16 %v2890_v16 }
 0x23c   : > { %v2853_v12 = vpop.trf.xlu1 }
 0x23d   : > { %v2857_v21 = vunpack.i.h.bf16 %v2853_v12  ;;  %v2854_v47 = vunpack.i.l.bf16 %v2853_v12 }
 0x23e   : > { %v2895_v10 = vpop.trf.xlu0 }
 0x23f   : > { %v2899_v15 = vunpack.i.h.bf16 %v2895_v10  ;;  %v2896_v43 = vunpack.i.l.bf16 %v2895_v10  ;;  %v1587_v54 = vpack.c.bf16 %v2854_v47, %v2849_v62  ;;  %v1589_v60 = vpack.c.bf16 %v2857_v21, %v2852_v58 }
 0x240   : > { %v3002_v27 = vpop.trf.xlu1 }
 0x241   : > { %1739 = vmatpush1.bf16.msra.mxu0 %v1587_v54  ;;  %1780 = vmatpush1.bf16.msra.mxu1 %v1589_v60  ;;  %v1536_v40 = vpack.c.bf16 %v2896_v43, %v2891_v57  ;;  %v1538_v24 = vpack.c.bf16 %v2899_v15, %v2894_v14  ;;  %v3006_v31 = vunpack.i.h.bf16 %v3002_v27  ;;  %v3003_v44 = vunpack.i.l.bf16 %v3002_v27 }
 0x242   : > { %v2900_v2 = vpop.trf.xlu0 }
 0x243   : > { %1806 = vmatprep.subr.bf16.mxu0 %v1536_v40  ;;  %1847 = vmatprep.subr.bf16.mxu1 %v1538_v24  ;;  %v2904_v36 = vunpack.i.h.bf16 %v2900_v2  ;;  %v2901_v39 = vunpack.i.l.bf16 %v2900_v2 }
 0x244   : > { %v3007_v38 = vpop.trf.xlu1  ;;  %1757 = vmatmul.mubr.bf16.vlgmr.msra.gmra.mrb[0].mxu0 %v4847_v41  ;;  %1798 = vmatmul.mubr.bf16.vlgmr.msra.gmra.mrb[0].mxu1 %v4847_v41 }
 0x245   : > { %v3011_v34 = vunpack.i.h.bf16 %v3007_v38  ;;  %v3008_v30 = vunpack.i.l.bf16 %v3007_v38  ;;  %1838 = vmatprep.mubr.bf16.mxu0 %v3487_v8  ;;  %1879 = vmatprep.mubr.bf16.mxu1 %v3487_v8 }
 0x246   : > { %v2905_v5 = vpop.trf.xlu0 }
 0x247   : > { %v2909_v63 = vunpack.i.h.bf16 %v2905_v5  ;;  %v2906_v51 = vunpack.i.l.bf16 %v2905_v5  ;;  %v1535_v18 = vpack.c.bf16 %v3008_v30, %v3003_v44  ;;  %v1537_v26 = vpack.c.bf16 %v3011_v34, %v3006_v31 }
 0x248   : > { %v3012_v49 = vpop.trf.xlu1 }
 0x249   : > { %1807 = vmatpush1.bf16.msra.mxu0 %v1535_v18  ;;  %1848 = vmatpush1.bf16.msra.mxu1 %v1537_v26  ;;  %v1544_v32 = vpack.c.bf16 %v2906_v51, %v2901_v39  ;;  %v1546_v6 = vpack.c.bf16 %v2909_v63, %v2904_v36  ;;  %v3016_v48 = vunpack.i.h.bf16 %v3012_v49  ;;  %v3013_v29 = vunpack.i.l.bf16 %v3012_v49 }
 0x24a   : > { %v2910_v4 = vpop.trf.xlu0 }
 0x24b   : > { %1808 = vmatprep.subr.bf16.mxu0 %v1544_v32  ;;  %1849 = vmatprep.subr.bf16.mxu1 %v1546_v6  ;;  %v2914_v42 = vunpack.i.h.bf16 %v2910_v4  ;;  %v2911_v20 = vunpack.i.l.bf16 %v2910_v4 }
 0x24c   : > { %v3017_v33 = vpop.trf.xlu1 }
 0x24d   : > { %v3021_v45 = vunpack.i.h.bf16 %v3017_v33  ;;  %v3018_v1 = vunpack.i.l.bf16 %v3017_v33 }
 0x24e   : > { %v2915_v8 = vpop.trf.xlu0 }
 0x24f   : > { %v2919_v46 = vunpack.i.h.bf16 %v2915_v8  ;;  %v2916_v56 = vunpack.i.l.bf16 %v2915_v8  ;;  %v1543_v0 = vpack.c.bf16 %v3018_v1, %v3013_v29  ;;  %v1545_v17 = vpack.c.bf16 %v3021_v45, %v3016_v48 }
 0x250   : > { %v3022_v28 = vpop.trf.xlu1 }
 0x251   : > { %1809 = vmatpush1.bf16.msra.mxu0 %v1543_v0  ;;  %1850 = vmatpush1.bf16.msra.mxu1 %v1545_v17  ;;  %v1552_v37 = vpack.c.bf16 %v2916_v56, %v2911_v20  ;;  %v1554_v7 = vpack.c.bf16 %v2919_v46, %v2914_v42  ;;  %v3026_v13 = vunpack.i.h.bf16 %v3022_v28  ;;  %v3023_v35 = vunpack.i.l.bf16 %v3022_v28 }
 0x252   : > { %v2920_v61 = vpop.trf.xlu0 }
 0x253   : > { %1810 = vmatprep.subr.bf16.mxu0 %v1552_v37  ;;  %1851 = vmatprep.subr.bf16.mxu1 %v1554_v7  ;;  %v2924_v50 = vunpack.i.h.bf16 %v2920_v61  ;;  %v2921_v59 = vunpack.i.l.bf16 %v2920_v61 }
 0x254   : > { %v3027_v19 = vpop.trf.xlu1 }
 0x255   : > { %v3031_v11 = vunpack.i.h.bf16 %v3027_v19  ;;  %v3028_v22 = vunpack.i.l.bf16 %v3027_v19 }
 0x256   : > { %v2925_v9 = vpop.trf.xlu0 }
 0x257   : > { %v2929_v3 = vunpack.i.h.bf16 %v2925_v9  ;;  %v2926_v53 = vunpack.i.l.bf16 %v2925_v9  ;;  %v1551_v55 = vpack.c.bf16 %v3028_v22, %v3023_v35  ;;  %v1553_v16 = vpack.c.bf16 %v3031_v11, %v3026_v13 }
 0x258   : > { %v3032_v25 = vpop.trf.xlu1 }
 0x259   : > { %1811 = vmatpush1.bf16.msra.mxu0 %v1551_v55  ;;  %1852 = vmatpush1.bf16.msra.mxu1 %v1553_v16  ;;  %v1560_v23 = vpack.c.bf16 %v2926_v53, %v2921_v59  ;;  %v1562_v12 = vpack.c.bf16 %v2929_v3, %v2924_v50  ;;  %v3036_v62 = vunpack.i.h.bf16 %v3032_v25  ;;  %v3033_v14 = vunpack.i.l.bf16 %v3032_v25 }
 0x25a   : > { %v2930_v52 = vpop.trf.xlu0 }
 0x25b   : > { %1812 = vmatprep.subr.bf16.mxu0 %v1560_v23  ;;  %1853 = vmatprep.subr.bf16.mxu1 %v1562_v12  ;;  %v2934_v57 = vunpack.i.h.bf16 %v2930_v52  ;;  %v2931_v10 = vunpack.i.l.bf16 %v2930_v52 }
 0x25c   : > { %v3037_v21 = vpop.trf.xlu1 }
 0x25d   : > { %v3041_v47 = vunpack.i.h.bf16 %v3037_v21  ;;  %v3038_v58 = vunpack.i.l.bf16 %v3037_v21 }
 0x25e   : > { %v2935_v15 = vpop.trf.xlu0 }
 0x25f   : > { %v2939_v43 = vunpack.i.h.bf16 %v2935_v15  ;;  %v2936_v27 = vunpack.i.l.bf16 %v2935_v15  ;;  %v1559_v60 = vpack.c.bf16 %v3038_v58, %v3033_v14  ;;  %v1561_v2 = vpack.c.bf16 %v3041_v47, %v3036_v62 }
 0x260   : > { %v3042_v54 = vpop.trf.xlu1 }
 0x261   : > { %1813 = vmatpush1.bf16.msra.mxu0 %v1559_v60  ;;  %1854 = vmatpush1.bf16.msra.mxu1 %v1561_v2  ;;  %v1568_v24 = vpack.c.bf16 %v2936_v27, %v2931_v10  ;;  %v1570_v38 = vpack.c.bf16 %v2939_v43, %v2934_v57  ;;  %v3046_v44 = vunpack.i.h.bf16 %v3042_v54  ;;  %v3043_v36 = vunpack.i.l.bf16 %v3042_v54 }
 0x262   : > { %v2940_v40 = vpop.trf.xlu0 }
 0x263   : > { %1814 = vmatprep.subr.bf16.mxu0 %v1568_v24  ;;  %1855 = vmatprep.subr.bf16.mxu1 %v1570_v38  ;;  %v2944_v39 = vunpack.i.h.bf16 %v2940_v40  ;;  %v2941_v5 = vunpack.i.l.bf16 %v2940_v40 }
 0x264   : > { %v3047_v34 = vpop.trf.xlu1 }
 0x265   : > { %v3051_v30 = vunpack.i.h.bf16 %v3047_v34  ;;  %v3048_v31 = vunpack.i.l.bf16 %v3047_v34 }
 0x266   : > { %v2945_v63 = vpop.trf.xlu0 }
 0x267   : > { %v2949_v51 = vunpack.i.h.bf16 %v2945_v63  ;;  %v2946_v49 = vunpack.i.l.bf16 %v2945_v63  ;;  %v1567_v26 = vpack.c.bf16 %v3048_v31, %v3043_v36  ;;  %v1569_v4 = vpack.c.bf16 %v3051_v30, %v3046_v44 }
 0x268   : > { %v3052_v18 = vpop.trf.xlu1 }
 0x269   : > { %1815 = vmatpush1.bf16.msra.mxu0 %v1567_v26  ;;  %1856 = vmatpush1.bf16.msra.mxu1 %v1569_v4  ;;  %v1576_v6 = vpack.c.bf16 %v2946_v49, %v2941_v5  ;;  %v1578_v33 = vpack.c.bf16 %v2949_v51, %v2944_v39  ;;  %v3056_v29 = vunpack.i.h.bf16 %v3052_v18  ;;  %v3053_v42 = vunpack.i.l.bf16 %v3052_v18 }
 0x26a   : > { %v2950_v32 = vpop.trf.xlu0 }
 0x26b   : > { %1816 = vmatprep.subr.bf16.mxu0 %v1576_v6  ;;  %1857 = vmatprep.subr.bf16.mxu1 %v1578_v33  ;;  %v2954_v20 = vunpack.i.h.bf16 %v2950_v32  ;;  %v2951_v8 = vunpack.i.l.bf16 %v2950_v32 }
 0x26c   : > { %v3057_v45 = vpop.trf.xlu1 }
 0x26d   : > { %v3061_v1 = vunpack.i.h.bf16 %v3057_v45  ;;  %v3058_v48 = vunpack.i.l.bf16 %v3057_v45 }
 0x26e   : > { %v2955_v46 = vpop.trf.xlu0 }
 0x26f   : > { %v2959_v56 = vunpack.i.h.bf16 %v2955_v46  ;;  %v2956_v28 = vunpack.i.l.bf16 %v2955_v46  ;;  %v1575_v17 = vpack.c.bf16 %v3058_v48, %v3053_v42  ;;  %v1577_v61 = vpack.c.bf16 %v3061_v1, %v3056_v29 }
 0x270   : > { %v3062_v0 = vpop.trf.xlu1 }
 0x271   : > { %1817 = vmatpush1.bf16.msra.mxu0 %v1575_v17  ;;  %1858 = vmatpush1.bf16.msra.mxu1 %v1577_v61  ;;  %v1584_v7 = vpack.c.bf16 %v2956_v28, %v2951_v8  ;;  %v1586_v19 = vpack.c.bf16 %v2959_v56, %v2954_v20  ;;  %v3066_v35 = vunpack.i.h.bf16 %v3062_v0  ;;  %v3063_v50 = vunpack.i.l.bf16 %v3062_v0 }
 0x272   : > { %v2960_v37 = vpop.trf.xlu0 }
 0x273   : > { %1818 = vmatprep.subr.bf16.mxu0 %v1584_v7  ;;  %1859 = vmatprep.subr.bf16.mxu1 %v1586_v19  ;;  %v2964_v59 = vunpack.i.h.bf16 %v2960_v37  ;;  %v2961_v9 = vunpack.i.l.bf16 %v2960_v37 }
 0x274   : > { %v3067_v11 = vpop.trf.xlu1 }
 0x275   : > { %v3071_v22 = vunpack.i.h.bf16 %v3067_v11  ;;  %v3068_v13 = vunpack.i.l.bf16 %v3067_v11 }
 0x276   : > { %v2965_v3 = vpop.trf.xlu0 }
 0x277   : > { %v2969_v53 = vunpack.i.h.bf16 %v2965_v3  ;;  %v2966_v25 = vunpack.i.l.bf16 %v2965_v3  ;;  %v1583_v16 = vpack.c.bf16 %v3068_v13, %v3063_v50  ;;  %v1585_v52 = vpack.c.bf16 %v3071_v22, %v3066_v35 }
 0x278   : > { %v3072_v55 = vpop.trf.xlu1 }
 0x279   : > { %1819 = vmatpush1.bf16.msra.mxu0 %v1583_v16  ;;  %1860 = vmatpush1.bf16.msra.mxu1 %v1585_v52  ;;  %v1592_v23 = vpack.c.bf16 %v2966_v25, %v2961_v9  ;;  %v1594_v12 = vpack.c.bf16 %v2969_v53, %v2964_v59  ;;  %v3076_v21 = vunpack.i.h.bf16 %v3072_v55  ;;  %v3073_v47 = vunpack.i.l.bf16 %v3072_v55 }
 0x27b   : > { %1820 = vmatprep.subr.bf16.mxu0 %v1592_v23  ;;  %1861 = vmatprep.subr.bf16.mxu1 %v1594_v12 }
 0x27c   : > { %v3077_v58 = vpop.trf.xlu1 }
 0x27d   : > { %v3081_v62 = vunpack.i.h.bf16 %v3077_v58  ;;  %v3078_v14 = vunpack.i.l.bf16 %v3077_v58 }
 0x27f   : > { %v1591_v57 = vpack.c.bf16 %v3078_v14, %v3073_v47  ;;  %v1593_v10 = vpack.c.bf16 %v3081_v62, %v3076_v21 }
 0x281   : > { %1821 = vmatpush1.bf16.msra.mxu0 %v1591_v57  ;;  %1862 = vmatpush1.bf16.msra.mxu1 %v1593_v10 }
 0x284   : > { %1839 = vmatmul.mubr.bf16.vlgmr.msra.gmra.mrb[4].mxu0 %v4847_v41  ;;  %1880 = vmatmul.mubr.bf16.vlgmr.msra.gmra.mrb[4].mxu1 %v4847_v41 }
 0x317   : > { %v4855_v15 = vpop.f32.mrb[0].mxu0  ;;  %v4857_v43 = vpop.f32.mrb[0].mxu1 }
 0x318   : > { %v4860_v27 = vmul.f32 32.0, %v4855_v15  ;;  %v4863_v54 = vmul.f32 32.0, %v4857_v43  ;;  %v4865_v60 = vpop.f32.mrb[1].mxu0  ;;  %v4867_v2 = vpop.f32.mrb[1].mxu1 }
 0x319   : > { %v4870_v40 = vmul.f32 32.0, %v4865_v60  ;;  %v4873_v24 = vmul.f32 32.0, %v4867_v2  ;;  %v1762_v41 = vpop.f32.mrb[2].mxu0  ;;  %v1803_v38 = vpop.f32.mrb[2].mxu1 }
 0x31a   : > { %v1763_v34 = vpop.f32.mrb[3].mxu0  ;;  %v1804_v30 = vpop.f32.mrb[3].mxu1  ;;  %1902 = vst [vmem:[%s4897_s18] sm:$0xff] (!%p2230_p13), %v4860_v27  ;;  %1904 = vst [vmem:[%s4897_s18 + $0x10] sm:$0xff] (!%p2230_p13), %v4863_v54 }
 0x31b   : > { %1903 = vst [vmem:[%s4897_s18 + $0x8] sm:$0xff] (!%p2230_p13), %v4870_v40  ;;  %1905 = vst [vmem:[%s4897_s18 + $0x18] sm:$0xff] (!%p2230_p13), %v4873_v24 }
 0x354   : > { %1901 = sbr.rel (%p2230_p13) target bundleno = 860 (0x35c), region = 44 }
 0x357   : > { %v4875_v31 = vpop.f32.mrb[4].mxu0  ;;  %v4877_v44 = vpop.f32.mrb[4].mxu1 }
 0x358   : > { %v4880_v36 = vmul.f32 32.0, %v4875_v31  ;;  %v4883_v39 = vmul.f32 32.0, %v4877_v44  ;;  %v4885_v5 = vpop.f32.mrb[5].mxu0  ;;  %v4887_v63 = vpop.f32.mrb[5].mxu1 }
 0x359   : > { %v4890_v51 = vmul.f32 32.0, %v4885_v5  ;;  %v4893_v49 = vmul.f32 32.0, %v4887_v63  ;;  %v1844_v18 = vpop.f32.mrb[6].mxu0  ;;  %v1885_v26 = vpop.f32.mrb[6].mxu1 }
 0x35a   : > { %v1845_v4 = vpop.f32.mrb[7].mxu0  ;;  %v1886_v32 = vpop.f32.mrb[7].mxu1  ;;  %1906 = vst [vmem:[%s4897_s18 + $0x20] sm:$0xff] (!%p2230_p13), %v4880_v36  ;;  %1908 = vst [vmem:[%s4897_s18 + $0x30] sm:$0xff] (!%p2230_p13), %v4883_v39 }
 0x35b   : > { %1907 = vst [vmem:[%s4897_s18 + $0x28] sm:$0xff] %v4890_v51  ;;  %1909 = vst [vmem:[%s4897_s18 + $0x38] sm:$0xff] %v4893_v49 }
 0x35c PF: > { %p2231_p0 = scmp.eq.s32.totalorder %s3641_s14, 0 }
 0x35d   : > { %v2050_v6 = vld [vmem:[%s5147_s3] sm:$0xff] (!%p2231_p0)  ;;  %s2240_s9 = sshll.u32 (!%p2231_p0), %s3473_s22, 10  ;;  %v3488_v33 = vmov (!%p2231_p0), 0   ;;  %v1914_v48 = vmul.f32 (!%p2231_p0), %v4855_v15, %v4855_v15  ;;  %v1915_v29 = vmul.f32 (!%p2231_p0), %v4865_v60, %v4865_v60  ;;  %v1916_v42 = vmul.f32 (!%p2231_p0), %v4857_v43, %v4857_v43 }
 0x35e   : > { %1913 = sbr.rel (%p2231_p0) target bundleno = 1001 (0x3e9), region = 48  ;;  %3338 = vset.pattern.permute.xlu0 (!%p2231_p0), %v3488_v33  ;;  %v2052_v45 = vstv (!%p2231_p0), %s2240_s9  ;;  %v1917_v20 = vmul.f32 (!%p2231_p0), %v4867_v2, %v4867_v2  ;;  %v1918_v8 = vmul.f32 (!%p2231_p0), %v4875_v31, %v4875_v31  ;;  %v1919_v56 = vmul.f32 (!%p2231_p0), %v4885_v5, %v4885_v5 }
 0x35f   : > { %v2053_v1 = vsub.s32 (!%p2231_p0), %v2050_v6, %v2052_v45  ;;  %v1922_v46 = vsub.f32 (!%p2231_p0), 1.0, %v1914_v48  ;;  %v1923_v28 = vsub.f32 (!%p2231_p0), 1.0, %v1915_v29  ;;  %v1920_v0 = vmul.f32 (!%p2231_p0), %v4877_v44, %v4877_v44 }
 0x360   : > { %v1924_v17 = vsub.f32 (!%p2231_p0), 1.0, %v1916_v42  ;;  %v1921_v61 = vmul.f32 (!%p2231_p0), %v4887_v63, %v4887_v63  ;;  %v1925_v37 = vsub.f32 (!%p2231_p0), 1.0, %v1917_v20  ;;  %v1926_v7 = vsub.f32 (!%p2231_p0), 1.0, %v1918_v8 }
 0x361   : > { %2064 = vperm.xlu0 (!%p2231_p0), %3338, %v2053_v1   ;;  %v1930_v19 = vmax.f32 (!%p2231_p0), %v1922_v46, 0.0  ;;  %v1927_v11 = vsub.f32 (!%p2231_p0), 1.0, %v1919_v56  ;;  %v1931_v22 = vmax.f32 (!%p2231_p0), %v1923_v28, 0.0  ;;  %v1928_v13 = vsub.f32 (!%p2231_p0), 1.0, %v1920_v0 }
 0x362   : > { %v1932_v35 = vmax.f32 (!%p2231_p0), %v1924_v17, 0.0  ;;  %v1929_v50 = vsub.f32 (!%p2231_p0), 1.0, %v1921_v61  ;;  %v1933_v59 = vmax.f32 (!%p2231_p0), %v1925_v37, 0.0  ;;  %v1934_v9 = vmax.f32 (!%p2231_p0), %v1926_v7, 0.0 }
 0x363   : > { %v4937_v3 = vmin.f32 (!%p2231_p0), %v1930_v19, 1.0  ;;  %v1935_v53 = vmax.f32 (!%p2231_p0), %v1927_v11, 0.0  ;;  %v4939_v25 = vmin.f32 (!%p2231_p0), %v1931_v22, 1.0  ;;  %v1936_v55 = vmax.f32 (!%p2231_p0), %v1928_v13, 0.0 }
 0x364   : > { %v4941_v16 = vmin.f32 (!%p2231_p0), %v1932_v35, 1.0  ;;  %v1937_v52 = vmax.f32 (!%p2231_p0), %v1929_v50, 0.0  ;;  %v4943_v23 = vmin.f32 (!%p2231_p0), %v1933_v59, 1.0  ;;  %v4945_v12 = vmin.f32 (!%p2231_p0), %v1934_v9, 1.0 }
 0x365   : > { %3339 = vrsqrt.f32 %v4937_v3  ;;  %v4948_v21 = vmin.f32 %v1935_v53, 1.0  ;;  %v4951_v47 = vmin.f32 %v1936_v55, 1.0  ;;  %v2054_v62 = vlaneseq }
 0x366   : > { %3341 = vrsqrt.f32 %v4939_v25  ;;  %v4954_v58 = vmin.f32 %v1937_v52, 1.0  ;;  %vm1948_vm0 = vcmp.eq.f32.partialorder %v4937_v3, inf  ;;  %vm1950_vm1 = vcmp.eq.f32.partialorder %v4937_v3, 0.0 }
 0x367   : > { %3343 = vrsqrt.f32 %v4941_v16  ;;  %v4961_v14 = vand.u32 127, %v2054_v62  ;;  %v1951_v4 = vand.u32 2147483648, %v4937_v3  ;;  %vm1955_vm2 = vcmp.eq.f32.partialorder %v4939_v25, inf }
 0x368   : > { %3345 = vrsqrt.f32 %v4943_v23  ;;  %vm1957_vm3 = vcmp.eq.f32.partialorder %v4939_v25, 0.0  ;;  %v1958_v6 = vand.u32 2147483648, %v4939_v25  ;;  %vm1962_vm4 = vcmp.eq.f32.partialorder %v4941_v16, inf }
 0x369   : > { %3347 = vrsqrt.f32 %v4945_v12  ;;  %v4964_v34 = vadd.s32 128, %v4961_v14  ;;  %v4967_v30 = vadd.s32 256, %v4961_v14  ;;  %v4970_v18 = vadd.s32 384, %v4961_v14 }
 0x36a   : > { %3349 = vrsqrt.f32 %v4948_v21  ;;  %vm1964_vm5 = vcmp.eq.f32.partialorder %v4941_v16, 0.0  ;;  %v1965_v33 = vand.u32 2147483648, %v4941_v16  ;;  %vm1969_vm6 = vcmp.eq.f32.partialorder %v4943_v23, inf }
 0x36b   : > { %3351 = vrsqrt.f32 %v4951_v47  ;;  %vm1971_vm7 = vcmp.eq.f32.partialorder %v4943_v23, 0.0  ;;  %v1972_v1 = vand.u32 2147483648, %v4943_v23  ;;  %vm1976_vm8 = vcmp.eq.f32.partialorder %v4945_v12, inf }
 0x36c   : > { %3353 = vrsqrt.f32 %v4954_v58  ;;  %vm1978_vm9 = vcmp.eq.f32.partialorder %v4945_v12, 0.0  ;;  %v1979_v56 = vand.u32 2147483648, %v4945_v12  ;;  %vm1983_vm10 = vcmp.eq.f32.partialorder %v4948_v21, inf }
 0x36d   : > { %vm1985_vm11 = vcmp.eq.f32.partialorder %v4948_v21, 0.0  ;;  %v1986_v0 = vand.u32 2147483648, %v4948_v21  ;;  %vm1990_vm12 = vcmp.eq.f32.partialorder %v4951_v47, inf  ;;  %vm1992_vm13 = vcmp.eq.f32.partialorder %v4951_v47, 0.0 }
 0x36e   : > { %v1993_v61 = vand.u32 2147483648, %v4951_v47  ;;  %vm1997_vm14 = vcmp.eq.f32.partialorder %v4954_v58, inf  ;;  %vm1999_vm15 = vcmp.eq.f32.partialorder %v4954_v58, 0.0  ;;  %v2000_v59 = vand.u32 2147483648, %v4954_v58 }
 0x36f   : > { %v3340_v57 = vpop.eup %3339  ;;  %v2010_v9 = vmul.f32 28.082642, %v4855_v15  ;;  %v2011_v53 = vmul.f32 28.082642, %v4865_v60 }
 0x370   : > { %v3342_v10 = vpop.eup %3341  ;;  %v1947_v29 = vmul.f32 %v3340_v57, %v4937_v3 }
 0x371   : > { %v3344_v41 = vpop.eup %3343  ;;  %v1954_v42 = vmul.f32 %v3342_v10, %v4939_v25 }
 0x372   : > { %v3346_v38 = vpop.eup %3345  ;;  %v1961_v20 = vmul.f32 %v3344_v41, %v4941_v16  ;;  %v1949_v7 = vsel %vm1948_vm0, %v4937_v3, %v1947_v29  ;;  %v2012_v3 = vmul.f32 28.082642, %v4857_v43  ;;  %vm2002_vm0 = vcmp.gt.f32.partialorder %v4855_v15, -0.87758255 }
 0x373   : > { %v3348_v26 = vpop.eup %3347  ;;  %v1968_v8 = vmul.f32 %v3346_v38, %v4943_v23  ;;  %v1956_v19 = vsel %vm1955_vm2, %v4939_v25, %v1954_v42  ;;  %v1952_v55 = vsel %vm1950_vm1, %v1951_v4, %v1949_v7  ;;  %vm2003_vm1 = vcmp.gt.f32.partialorder %v4865_v60, -0.87758255 }
 0x374   : > { %v3350_v32 = vpop.eup %3349  ;;  %v1975_v46 = vmul.f32 %v3348_v26, %v4945_v12  ;;  %v1963_v11 = vsel %vm1962_vm4, %v4941_v16, %v1961_v20  ;;  %v1959_v52 = vsel %vm1957_vm3, %v1958_v6, %v1956_v19  ;;  %vm2004_vm2 = vcmp.gt.f32.partialorder %v4857_v43, -0.87758255 }
 0x375   : > { %v3352_v45 = vpop.eup %3351  ;;  %v1982_v28 = vmul.f32 %v3350_v32, %v4948_v21  ;;  %v1970_v22 = vsel %vm1969_vm6, %v4943_v23, %v1968_v8  ;;  %v1966_v62 = vsel %vm1964_vm5, %v1965_v33, %v1963_v11  ;;  %v2013_v16 = vmul.f32 28.082642, %v4867_v2 }
 0x376   : > { %v3354_v48 = vpop.eup %3353  ;;  %v1989_v17 = vmul.f32 %v3352_v45, %v4951_v47  ;;  %v1977_v13 = vsel %vm1976_vm8, %v4945_v12, %v1975_v46  ;;  %v1973_v10 = vsel %vm1971_vm7, %v1972_v1, %v1970_v22  ;;  %v2014_v23 = vmul.f32 28.082642, %v4875_v31 }
 0x377   : > { %v1996_v37 = vmul.f32 %v3354_v48, %v4954_v58  ;;  %v1984_v35 = vsel %vm1983_vm10, %v4948_v21, %v1982_v28  ;;  %v1980_v41 = vsel %vm1978_vm9, %v1979_v56, %v1977_v13  ;;  %v2015_v12 = vmul.f32 28.082642, %v4885_v5 }
 0x378   : > { %v1991_v50 = vsel %vm1990_vm12, %v4951_v47, %v1989_v17  ;;  %v1987_v38 = vsel %vm1985_vm11, %v1986_v0, %v1984_v35  ;;  %v2018_v26 = vmul.f32 15.341618, %v1952_v55  ;;  %v2019_v4 = vmul.f32 15.341618, %v1959_v52 }
 0x379   : > { %v1998_v57 = vsel %vm1997_vm14, %v4954_v58, %v1996_v37  ;;  %v1994_v25 = vsel %vm1992_vm13, %v1993_v61, %v1991_v50  ;;  %v2020_v32 = vmul.f32 15.341618, %v1966_v62  ;;  %v2021_v47 = vmul.f32 15.341618, %v1973_v10 }
 0x37a   : > { %v2001_v21 = vsel %vm1999_vm15, %v2000_v59, %v1998_v57  ;;  %v2022_v6 = vmul.f32 15.341618, %v1980_v41  ;;  %v2023_v33 = vmul.f32 15.341618, %v1987_v38  ;;  %vm2005_vm3 = vcmp.gt.f32.partialorder %v4867_v2, -0.87758255 }
 0x37b   : > { %v2016_v45 = vmul.f32 28.082642, %v4877_v44  ;;  %v2024_v1 = vmul.f32 15.341618, %v1994_v25  ;;  %vm2006_vm4 = vcmp.gt.f32.partialorder %v4875_v31, -0.87758255  ;;  %v2026_v42 = vsub.f32 %v2010_v9, %v2018_v26 }
 0x37c   : > { %v2017_v48 = vmul.f32 28.082642, %v4887_v63  ;;  %v2025_v29 = vmul.f32 15.341618, %v2001_v21  ;;  %v2027_v20 = vsub.f32 %v2011_v53, %v2019_v4  ;;  %v2232_v58 = vadd.f32 -7.670809, %v4860_v27 }
 0x37d   : > { %v2233_v8 = vadd.f32 -7.670809, %v4870_v40  ;;  %v2028_v46 = vsub.f32 %v2012_v3, %v2020_v32  ;;  %v2029_v56 = vsub.f32 %v2013_v16, %v2021_v47  ;;  %v2030_v28 = vsub.f32 %v2014_v23, %v2022_v6 }
 0x37e   : > { %v2031_v0 = vsub.f32 %v2015_v12, %v2023_v33  ;;  %v2032_v17 = vsub.f32 %v2016_v45, %v2024_v1  ;;  %v2234_v61 = vadd.f32 -7.670809, %v4863_v54  ;;  %v2235_v37 = vadd.f32 -7.670809, %v4873_v24 }
 0x37f   : > { %v2236_v7 = vadd.f32 -7.670809, %v4880_v36  ;;  %v2033_v19 = vsub.f32 %v2017_v48, %v2025_v29  ;;  %v2237_v11 = vadd.f32 -7.670809, %v4890_v51  ;;  %v2238_v22 = vadd.f32 -7.670809, %v4883_v39 }
 0x380   : > { %v2239_v13 = vadd.f32 -7.670809, %v4893_v49  ;;  %vm2007_vm5 = vcmp.gt.f32.partialorder %v4885_v5, -0.87758255  ;;  %vm2008_vm6 = vcmp.gt.f32.partialorder %v4877_v44, -0.87758255  ;;  %v2042_v53 = vsel %vm2002_vm0, %v2026_v42, %v2232_v58 }
 0x381   : > { %vm2009_vm7 = vcmp.gt.f32.partialorder %v4887_v63, -0.87758255  ;;  %v2059_v35 = vadd.s32 512, %v4961_v14  ;;  %v2060_v50 = vadd.s32 640, %v4961_v14  ;;  %v2061_v59 = vadd.s32 768, %v4961_v14 }
 0x382   : > { %v2062_v9 = vadd.s32 896, %v4961_v14  ;;  %v2043_v55 = vsel %vm2003_vm1, %v2027_v20, %v2233_v8  ;;  %v2044_v5 = vsel %vm2004_vm2, %v2028_v46, %v2234_v61  ;;  %v2045_v44 = vsel %vm2005_vm3, %v2029_v56, %v2235_v37 }
 0x383   : > { %v2046_v52 = vsel %vm2006_vm4, %v2030_v28, %v2236_v7  ;;  %v2047_v62 = vsel %vm2007_vm5, %v2031_v0, %v2237_v11  ;;  %v2048_v57 = vsel %vm2008_vm6, %v2032_v17, %v2238_v22  ;;  %v2049_v10 = vsel %vm2009_vm7, %v2033_v19, %v2239_v13 }
 0x3e0   : > { %v2065_v63 = vpop.permute.xlu0 %2064 }
 0x3e1   : > { %vm2066_vm8 = vcmp.eq.s32.totalorder %v4961_v14, %v2065_v63  ;;  %vm2067_vm9 = vcmp.eq.s32.totalorder %v4964_v34, %v2065_v63  ;;  %vm2068_vm10 = vcmp.eq.s32.totalorder %v4967_v30, %v2065_v63  ;;  %vm2069_vm11 = vcmp.eq.s32.totalorder %v4970_v18, %v2065_v63 }
 0x3e2   : > { %vm2070_vm12 = vcmp.eq.s32.totalorder %v2059_v35, %v2065_v63  ;;  %vm2071_vm13 = vcmp.eq.s32.totalorder %v2060_v50, %v2065_v63  ;;  %vm2072_vm14 = vcmp.eq.s32.totalorder %v2061_v59, %v2065_v63  ;;  %vm2073_vm15 = vcmp.eq.s32.totalorder %v2062_v9, %v2065_v63 }
 0x3e3   : > { %v2074_v15 = vsel %vm2066_vm8, %v2042_v53, %v4860_v27  ;;  %v2075_v43 = vsel %vm2067_vm9, %v2043_v55, %v4870_v40  ;;  %v2076_v60 = vsel %vm2068_vm10, %v2044_v5, %v4863_v54  ;;  %v2077_v2 = vsel %vm2069_vm11, %v2045_v44, %v4873_v24 }
 0x3e4   : > { %v2078_v31 = vsel %vm2070_vm12, %v2046_v52, %v4880_v36  ;;  %v2079_v14 = vsel %vm2071_vm13, %v2047_v62, %v4890_v51  ;;  %v2080_v34 = vsel %vm2072_vm14, %v2048_v57, %v4883_v39  ;;  %v2081_v30 = vsel %vm2073_vm15, %v2049_v10, %v4893_v49  ;;  %2082 = vst [vmem:[%s4897_s18] sm:$0xff] %v2074_v15 }
 0x3e5   : > { %2083 = vst [vmem:[%s4897_s18 + $0x8] sm:$0xff] %v2075_v43  ;;  %2084 = vst [vmem:[%s4897_s18 + $0x10] sm:$0xff] %v2076_v60 }
 0x3e6   : > { %2085 = vst [vmem:[%s4897_s18 + $0x18] sm:$0xff] %v2077_v2  ;;  %2086 = vst [vmem:[%s4897_s18 + $0x20] sm:$0xff] %v2078_v31 }
 0x3e7   : > { %2087 = vst [vmem:[%s4897_s18 + $0x28] sm:$0xff] %v2079_v14  ;;  %2088 = vst [vmem:[%s4897_s18 + $0x30] sm:$0xff] %v2080_v34 }
 0x3e8   : > { %2089 = vst [vmem:[%s4897_s18 + $0x38] sm:$0xff] %v2081_v30 }
 0x3e9 PF: > { %s2247_s10 = sshll.u32 %s3473_s22, 10  ;;  %s2107_s15 = sshll.u32 %s4897_s18, 4  ;;  %s2108_s15 = int_to_ptr.vmem [resolvable:$true] %s2107_s15 }
 0x3ea   : > { %s5100_s13 = scalar_lea.hbm %s5148_s4, %s2247_s10  ;;  %s2091_s25 = scalar_lea.sflag [#allocation7], %s3630_s19 }
 0x3eb   : > { %s3397_s26 = scalar_lea.vmem %s2108_s15, 1024  ;;  %p5535_p5 = scmp.ne.s32.totalorder %s5259_s6, 0 }
 0x3ec   : > { %p3398_p2 = scmp.ne.s32.totalorder %s2108_s15, %s3397_s26  ;;  %s3489_s28 = smov [#allocation8]  }
 0x3ed   : > { %s3401_s14 = sshll.u32 %s3489_s28, 4  ;;  %s3402_s14 = int_to_ptr.vmem [resolvable:$false] %s3401_s14 }
 0x3ee   : > { %p3399_p11 = pnand %p3398_p2, %p5535_p5  ;;  %s3403_s5 = scalar_lea.vmem %s3402_s14, 2048 }
 0x3ef   : > { %p3404_p7 = scmp.lt.s32.totalorder %s2108_s15, %s3402_s14  ;;  %p3405_p10 = scmp.lt.s32.totalorder %s3403_s5, %s3397_s26 }
 0x3f0   : > { %p3400_p4 = pneg %p3399_p11 }
 0x3f1   : > { %p3406_p9 = por %p3405_p10, %p3404_p7 }
 0x3f3   : > { %p3407_p12 = pnand %p3406_p9, %p3400_p4 }
 0x3f5   : > { %3410 = shalt.err (!%p3407_p12)
}
 0x3f6   : > { %s3411_s22 = scalar_lea.hbm %s5100_s13, 1024  ;;  %s3415_s17 = scalar_lea.hbm %s5148_s4, 2048 }
 0x3f7   : > { %p3412_p1 = scmp.ne.s32.totalorder %s5100_s13, %s3411_s22  ;;  %p3416_p8 = scmp.lt.u32.totalorder %s5100_s13, %s5148_s4 }
 0x3f8   : > { %p3417_p13 = scmp.lt.u32.totalorder %s3415_s17, %s3411_s22  ;;  %p3419_p2 = scmp.lt.u32.totalorder %s3411_s22, %s5100_s13 }
 0x3f9   : > { %p3413_p3 = pnand %p3412_p1, %p5535_p5 }
 0x3fa   : > { %p3418_p0 = por %p3417_p13, %p3416_p8 }
 0x3fb   : > { %p3414_p6 = pneg %p3413_p3 }
 0x3fc   : > { %p3420_p11 = por %p3419_p2, %p3418_p0 }
 0x3fe   : > { %p3421_p4 = pnand %p3420_p11, %p3414_p6 }
 0x400   : > { %3424 = shalt.err (!%p3421_p4)
}
 0x401   : > { %2569 = dma.vmem_to_hbm [thread:$0]  (%p5535_p5), %s2108_s15, 1024, %s5100_s13, %s2091_s25  }
 0x402 PF: > { %s2119_s30 = sand.u32 1, %s3461_s20   ;;  %p5536_p7 = scmp.ne.s32.totalorder %s5260_s8, 0 }
 0x403   : > { %p5537_p10 = scmp.ge.s32.totalorder %s3481_s24, 2  ;;  %s2120_s9 = scalar_lea.sflag [#allocation7], %s2119_s30 }
 0x405   : > { %p2576_p9 = pnand %p5537_p10, %p5536_p7 }
 0x407   : > { %3456 = dma.done.wait (!%p2576_p9), %s2120_s9, 1024  }
 0x408   : > { %3458 = vsyncadd (!%p2576_p9), %s2120_s9, 4294966272  ;;  %s26_s24 = sadd.s32 1, %s3481_s24   ;;  %s5538_s20 = smov %s3465_s0 }
 0x409   : > { %p23_p12 = scmp.ge.s32.totalorder %s26_s24, 4   ;;  %s5539_s0 = smov %s3469_s21 }
 0x40a   : > { %s5540_s21 = smov %s3574_s7  ;;  %s5541_s22 = smov %s3477_s23 }
 0x40b   : > { %s5542_s23 = smov %s5544_s27  ;;  %25 = sbr.rel (!%p23_p12) target bundleno = 21 (0x15), region = 95 }
 0x412   :  { %2125 = vsyncpa [#allocation6], 1 }
 0x413   :  { %2127 = vsyncpa [#allocation6 + $0x1], 1 }
 0x414   :  { %2128 = vsyncpa [#allocation7], 1 }
 0x415   :  { %2130 = vsyncpa [#allocation7 + $0x1], 1 }

</bundles_post_ra>
